<compile_context>
chip_gen: v5e
topology: v5e:2x2
jax: 0.10.0
libtpu: 0.0.40
codegen_flags: <defaults>
</compile_context>

<pallas_src>
import jax
import jax.numpy as jnp
import numpy as np
from jax.experimental import pallas as pl
from jax.experimental.pallas import tpu as pltpu

# --------------------------------------------------------------------------
# Model hyper-parameters
# --------------------------------------------------------------------------
BATCH = 1024                    # rows per forward call
INPUT_DIM = 32
HIDDEN_DIM = 128
OUTPUT_DIM = 16
N_BLOCKS = 3
SCALE = 1.0 / N_BLOCKS          # use_scale=True
USE_BIG_SKIP = False            # would require input_dim == output_dim


def _num_grid_steps():
    """1 grid step on single-TensorCore chips (v5e/v6e); 2 on dual-TC chips
    (v7x, v4/v5p megacore) so `parallel` sharding puts one tile per core."""
    try:
        kind = jax.devices()[0].device_kind.lower()
    except Exception:
        return 1
    if "v7" in kind or "7x" in kind:
        return 2
    if "v4" in kind or "v5p" in kind:
        return 2
    return 1


# --------------------------------------------------------------------------
# Pallas kernel: one batch tile per grid step; weights are VMEM-resident.
#   x_ref      : (TILE, INPUT_DIM)              f32   (streamed)
#   w_in_ref   : (INPUT_DIM, HIDDEN_DIM)        bf16  (resident)
#   w_stack_ref: (N_BLOCKS, HIDDEN, HIDDEN)     bf16  (resident, SCALE folded)
#   w_out_ref  : (HIDDEN_DIM, OUTPUT_DIM)       bf16  (resident, un-padded)
#   b_ref      : (N_BLOCKS+2, HIDDEN)           f32   (resident)
#                row 0 = b_in, rows 1..N_BLOCKS = SCALE-folded block biases,
#                row N_BLOCKS+1 = output bias zero-padded to 128 lanes
#   out_ref    : (TILE, OUTPUT_DIM)             bf16  (narrow store)
# --------------------------------------------------------------------------
def _resnet_kernel(x_ref, w_in_ref, w_stack_ref, w_out_ref, b_ref, out_ref):
    b = b_ref[...]                                     # (N_BLOCKS+2, 128) f32

    # input layer: x @ W_in + b_in   (bf16 MXU operands, f32 accumulation)
    h = jnp.dot(x_ref[...].astype(jnp.bfloat16), w_in_ref[...],
                preferred_element_type=jnp.float32) + b[0][None, :]

    # pre-activation residual blocks (scale already folded into weights/bias):
    #   identity = h ; a = relu(h) ; y = a @ (scale*W) + scale*b ; h = identity + y
    for i in range(N_BLOCKS):                          # static unroll, small
        identity = h
        a = jnp.maximum(h, 0.0)
        y = jnp.dot(a.astype(jnp.bfloat16), w_stack_ref[i],
                    preferred_element_type=jnp.float32) + b[i + 1][None, :]
        h = identity + y

    # final pre-act activation + output layer (narrow N=16, bf16 store)
    h = jnp.maximum(h, 0.0)
    out = jnp.dot(h.astype(jnp.bfloat16), w_out_ref[...],
                  preferred_element_type=jnp.float32)
    out = out + b[N_BLOCKS + 1][:OUTPUT_DIM][None, :]
    out_ref[...] = out.astype(out_ref.dtype)


def resnet_forward(x, w_in_bf16, w_stack_bf16, w_out_bf16, b_all):
    """x: (BATCH, INPUT_DIM) f32. Returns (BATCH, OUTPUT_DIM) bf16."""
    n_steps = _num_grid_steps()
    tile = BATCH // n_steps
    assert BATCH % n_steps == 0 and tile % 8 == 0

    flops = 2 * BATCH * (INPUT_DIM * HIDDEN_DIM
                         + N_BLOCKS * HIDDEN_DIM * HIDDEN_DIM
                         + HIDDEN_DIM * OUTPUT_DIM)
    bytes_accessed = (x.size * 4
                      + w_in_bf16.size * 2 + w_stack_bf16.size * 2
                      + w_out_bf16.size * 2 + b_all.size * 4
                      + BATCH * OUTPUT_DIM * 2)

    out = pl.pallas_call(
        _resnet_kernel,
        out_shape=jax.ShapeDtypeStruct((BATCH, OUTPUT_DIM), jnp.bfloat16),
        grid_spec=pl.GridSpec(
            grid=(n_steps,),
            in_specs=[
                # activations: one batch tile per step
                pl.BlockSpec((tile, INPUT_DIM), lambda i: (i, 0)),
                # weights/biases: constant index_map -> DMA'd once, VMEM-resident
                pl.BlockSpec((INPUT_DIM, HIDDEN_DIM), lambda i: (0, 0)),
                pl.BlockSpec((N_BLOCKS, HIDDEN_DIM, HIDDEN_DIM),
                             lambda i: (0, 0, 0)),
                pl.BlockSpec((HIDDEN_DIM, OUTPUT_DIM), lambda i: (0, 0)),
                pl.BlockSpec((N_BLOCKS + 2, HIDDEN_DIM), lambda i: (0, 0)),
            ],
            out_specs=pl.BlockSpec((tile, OUTPUT_DIM), lambda i: (i, 0)),
        ),
        compiler_params=pltpu.CompilerParams(
            dimension_semantics=("parallel",),       # shards tiles on 2-TC chips
        ),
        cost_estimate=pl.CostEstimate(flops=flops, transcendentals=0,
                                      bytes_accessed=bytes_accessed),
    )(x, w_in_bf16, w_stack_bf16, w_out_bf16, b_all)
    return out


# --------------------------------------------------------------------------
# Parameter prep: fold SCALE into block weights/biases, pre-cast MXU operands
# to bf16, carry the output bias as a zero-padded row of the bias stack.
# --------------------------------------------------------------------------
def prepare_params(w_in, b_in, w_blk, b_blk, w_out, b_out):
    w_blk_s = w_blk * SCALE                                   # (N, H, H)
    b_blk_s = b_blk * SCALE                                   # (N, H)

    b_out_p = jnp.zeros((HIDDEN_DIM,), jnp.float32).at[:OUTPUT_DIM].set(b_out)

    w_in_bf16 = w_in.astype(jnp.bfloat16)                     # (IN, H)
    w_stack_bf16 = w_blk_s.astype(jnp.bfloat16)               # (N, H, H)
    w_out_bf16 = w_out.astype(jnp.bfloat16)                   # (H, OUT)
    b_all = jnp.concatenate([b_in[None], b_blk_s, b_out_p[None]], axis=0)  # f32
    return w_in_bf16, w_stack_bf16, w_out_bf16, b_all


# --------------------------------------------------------------------------
# Pure-JAX reference mirroring the PyTorch forward (bf16 matmul operands,
# f32 accumulation, explicit SCALE multiply — validates the folding).
# --------------------------------------------------------------------------
def resnet_reference(x, w_in, b_in, w_blk, b_blk, w_out, b_out):
    bf = lambda a: a.astype(jnp.bfloat16)
    h = jnp.dot(bf(x), bf(w_in), preferred_element_type=jnp.float32) + b_in
    for i in range(N_BLOCKS):
        identity = h
        a = jnp.maximum(h, 0.0)
        y = jnp.dot(bf(a), bf(w_blk[i]), preferred_element_type=jnp.float32) + b_blk[i]
        h = identity + SCALE * y
    h = jnp.maximum(h, 0.0)
    return jnp.dot(bf(h), bf(w_out), preferred_element_type=jnp.float32) + b_out


# --------------------------------------------------------------------------
# Deterministic parameter initialization (synthetic, PyTorch-like scales).
# Weights stored pre-transposed as (in_features, out_features).
# --------------------------------------------------------------------------
def init_params(key):
    ks = jax.random.split(key, 8)

    def lin(k, fan_in, fan_out):
        bound = 1.0 / np.sqrt(fan_in)
        kw, kb = jax.random.split(k)
        w = jax.random.uniform(kw, (fan_in, fan_out), jnp.float32, -bound, bound)
        b = jax.random.uniform(kb, (fan_out,), jnp.float32, -bound, bound)
        return w, b

    w_in, b_in = lin(ks[0], INPUT_DIM, HIDDEN_DIM)
    w_out, b_out = lin(ks[1], HIDDEN_DIM, OUTPUT_DIM)

    w_blks, b_blks = [], []
    for i in range(N_BLOCKS):
        w, b = lin(ks[2 + i], HIDDEN_DIM, HIDDEN_DIM)
        w_blks.append(w)
        b_blks.append(b)
    w_blk = jnp.stack(w_blks, axis=0)          # (n_blocks, hidden, hidden)
    b_blk = jnp.stack(b_blks, axis=0)          # (n_blocks, hidden)
    return w_in, b_in, w_blk, b_blk, w_out, b_out


if __name__ == "__main__":
    key = jax.random.PRNGKey(0)
    kx, kp = jax.random.split(key)
    x = jax.random.normal(kx, (BATCH, INPUT_DIM), jnp.float32)
    raw_params = init_params(kp)

    kernel_params = prepare_params(*raw_params)
    out = resnet_forward(x, *kernel_params)
    out = jax.block_until_ready(out)

    ref = resnet_reference(x, *raw_params)
    np.testing.assert_allclose(np.asarray(out, dtype=np.float32),
                               np.asarray(ref),
                               rtol=2e-2, atol=2e-2)
    print("KERNEL_OK")
</pallas_src>

<mosaic_0001>
module attributes {stable_mosaic.version = 11 : i64} {
  func.func @_resnet_kernel(%arg0: i32, %arg1: memref<1024x32xf32, #tpu.memory_space<vmem>>, %arg2: memref<32x128xbf16, #tpu.memory_space<vmem>>, %arg3: memref<3x128x128xbf16, #tpu.memory_space<vmem>>, %arg4: memref<128x16xbf16, #tpu.memory_space<vmem>>, %arg5: memref<5x128xf32, #tpu.memory_space<vmem>>, %arg6: memref<1024x16xbf16, #tpu.memory_space<vmem>>) attributes {dimension_semantics = [#tpu.dimension_semantics<parallel>], iteration_bounds = array<i64: 1>, scalar_prefetch = 0 : i64, scratch_operands = 0 : i64, tpu.core_type = #tpu.core_type<tc>, window_params = [{transform_indices = @transform_0, window_bounds = array<i64: 1024, 32>}, {pipeline_mode = #tpu.pipeline_mode<synchronous>, transform_indices = @transform_1, window_bounds = array<i64: 32, 128>}, {pipeline_mode = #tpu.pipeline_mode<synchronous>, transform_indices = @transform_2, window_bounds = array<i64: 3, 128, 128>}, {pipeline_mode = #tpu.pipeline_mode<synchronous>, transform_indices = @transform_3, window_bounds = array<i64: 128, 16>}, {pipeline_mode = #tpu.pipeline_mode<synchronous>, transform_indices = @transform_4, window_bounds = array<i64: 5, 128>}, {transform_indices = @transform_5, window_bounds = array<i64: 1024, 16>}]} {
    %c0 = arith.constant 0 : index
    %c0_0 = arith.constant 0 : index
    %0 = vector.load %arg5[%c0, %c0_0] : memref<5x128xf32, #tpu.memory_space<vmem>>, vector<5x128xf32>
    %c0_1 = arith.constant 0 : index
    %c0_2 = arith.constant 0 : index
    %1 = vector.load %arg1[%c0_1, %c0_2] : memref<1024x32xf32, #tpu.memory_space<vmem>>, vector<1024x32xf32>
    %2 = arith.truncf %1 : vector<1024x32xf32> to vector<1024x32xbf16>
    %c0_3 = arith.constant 0 : index
    %c0_4 = arith.constant 0 : index
    %3 = vector.load %arg2[%c0_3, %c0_4] : memref<32x128xbf16, #tpu.memory_space<vmem>>, vector<32x128xbf16>
    %cst = arith.constant dense<0.000000e+00> : vector<1024x128xf32>
    %4 = tpu.matmul %2, %3, %cst {dimension_numbers = #tpu.dot_dimension_numbers<[1], [0], [0], [1], [0, 0, 1, 1], [], []>} : vector<1024x32xbf16>, vector<32x128xbf16>, vector<1024x128xf32> -> vector<1024x128xf32>
    %5 = vector.extract_strided_slice %0 {offsets = [0, 0], sizes = [1, 128], strides = [1, 1]} : vector<5x128xf32> to vector<1x128xf32>
    %6 = vector.shape_cast %5 : vector<1x128xf32> to vector<128xf32>
    %7 = vector.shape_cast %6 : vector<128xf32> to vector<1x128xf32>
    %8 = vector.broadcast %7 : vector<1x128xf32> to vector<1024x128xf32>
    %9 = arith.addf %4, %8 : vector<1024x128xf32>
    %cst_5 = arith.constant 0.000000e+00 : f32
    %10 = vector.broadcast %cst_5 : f32 to vector<1024x128xf32>
    %11 = arith.maximumf %9, %10 : vector<1024x128xf32>
    %12 = arith.truncf %11 : vector<1024x128xf32> to vector<1024x128xbf16>
    %c0_6 = arith.constant 0 : index
    %c0_7 = arith.constant 0 : index
    %c0_8 = arith.constant 0 : index
    %13 = vector.load %arg3[%c0_6, %c0_7, %c0_8] : memref<3x128x128xbf16, #tpu.memory_space<vmem>>, vector<1x128x128xbf16>
    %14 = vector.shape_cast %13 : vector<1x128x128xbf16> to vector<128x128xbf16>
    %cst_9 = arith.constant dense<0.000000e+00> : vector<1024x128xf32>
    %15 = tpu.matmul %12, %14, %cst_9 {dimension_numbers = #tpu.dot_dimension_numbers<[1], [0], [0], [1], [0, 0, 1, 1], [], []>} : vector<1024x128xbf16>, vector<128x128xbf16>, vector<1024x128xf32> -> vector<1024x128xf32>
    %16 = vector.extract_strided_slice %0 {offsets = [1, 0], sizes = [1, 128], strides = [1, 1]} : vector<5x128xf32> to vector<1x128xf32>
    %17 = vector.shape_cast %16 : vector<1x128xf32> to vector<128xf32>
    %18 = vector.shape_cast %17 : vector<128xf32> to vector<1x128xf32>
    %19 = vector.broadcast %18 : vector<1x128xf32> to vector<1024x128xf32>
    %20 = arith.addf %15, %19 : vector<1024x128xf32>
    %21 = arith.addf %9, %20 : vector<1024x128xf32>
    %cst_10 = arith.constant 0.000000e+00 : f32
    %22 = vector.broadcast %cst_10 : f32 to vector<1024x128xf32>
    %23 = arith.maximumf %21, %22 : vector<1024x128xf32>
    %24 = arith.truncf %23 : vector<1024x128xf32> to vector<1024x128xbf16>
    %c1 = arith.constant 1 : index
    %c0_11 = arith.constant 0 : index
    %c0_12 = arith.constant 0 : index
    %25 = vector.load %arg3[%c1, %c0_11, %c0_12] : memref<3x128x128xbf16, #tpu.memory_space<vmem>>, vector<1x128x128xbf16>
    %26 = vector.shape_cast %25 : vector<1x128x128xbf16> to vector<128x128xbf16>
    %cst_13 = arith.constant dense<0.000000e+00> : vector<1024x128xf32>
    %27 = tpu.matmul %24, %26, %cst_13 {dimension_numbers = #tpu.dot_dimension_numbers<[1], [0], [0], [1], [0, 0, 1, 1], [], []>} : vector<1024x128xbf16>, vector<128x128xbf16>, vector<1024x128xf32> -> vector<1024x128xf32>
    %28 = vector.extract_strided_slice %0 {offsets = [2, 0], sizes = [1, 128], strides = [1, 1]} : vector<5x128xf32> to vector<1x128xf32>
    %29 = vector.shape_cast %28 : vector<1x128xf32> to vector<128xf32>
    %30 = vector.shape_cast %29 : vector<128xf32> to vector<1x128xf32>
    %31 = vector.broadcast %30 : vector<1x128xf32> to vector<1024x128xf32>
    %32 = arith.addf %27, %31 : vector<1024x128xf32>
    %33 = arith.addf %21, %32 : vector<1024x128xf32>
    %cst_14 = arith.constant 0.000000e+00 : f32
    %34 = vector.broadcast %cst_14 : f32 to vector<1024x128xf32>
    %35 = arith.maximumf %33, %34 : vector<1024x128xf32>
    %36 = arith.truncf %35 : vector<1024x128xf32> to vector<1024x128xbf16>
    %c2 = arith.constant 2 : index
    %c0_15 = arith.constant 0 : index
    %c0_16 = arith.constant 0 : index
    %37 = vector.load %arg3[%c2, %c0_15, %c0_16] : memref<3x128x128xbf16, #tpu.memory_space<vmem>>, vector<1x128x128xbf16>
    %38 = vector.shape_cast %37 : vector<1x128x128xbf16> to vector<128x128xbf16>
    %cst_17 = arith.constant dense<0.000000e+00> : vector<1024x128xf32>
    %39 = tpu.matmul %36, %38, %cst_17 {dimension_numbers = #tpu.dot_dimension_numbers<[1], [0], [0], [1], [0, 0, 1, 1], [], []>} : vector<1024x128xbf16>, vector<128x128xbf16>, vector<1024x128xf32> -> vector<1024x128xf32>
    %40 = vector.extract_strided_slice %0 {offsets = [3, 0], sizes = [1, 128], strides = [1, 1]} : vector<5x128xf32> to vector<1x128xf32>
    %41 = vector.shape_cast %40 : vector<1x128xf32> to vector<128xf32>
    %42 = vector.shape_cast %41 : vector<128xf32> to vector<1x128xf32>
    %43 = vector.broadcast %42 : vector<1x128xf32> to vector<1024x128xf32>
    %44 = arith.addf %39, %43 : vector<1024x128xf32>
    %45 = arith.addf %33, %44 : vector<1024x128xf32>
    %cst_18 = arith.constant 0.000000e+00 : f32
    %46 = vector.broadcast %cst_18 : f32 to vector<1024x128xf32>
    %47 = arith.maximumf %45, %46 : vector<1024x128xf32>
    %48 = arith.truncf %47 : vector<1024x128xf32> to vector<1024x128xbf16>
    %c0_19 = arith.constant 0 : index
    %c0_20 = arith.constant 0 : index
    %49 = vector.load %arg4[%c0_19, %c0_20] : memref<128x16xbf16, #tpu.memory_space<vmem>>, vector<128x16xbf16>
    %cst_21 = arith.constant dense<0.000000e+00> : vector<1024x16xf32>
    %50 = tpu.matmul %48, %49, %cst_21 {dimension_numbers = #tpu.dot_dimension_numbers<[1], [0], [0], [1], [0, 0, 1, 1], [], []>} : vector<1024x128xbf16>, vector<128x16xbf16>, vector<1024x16xf32> -> vector<1024x16xf32>
    %51 = vector.extract_strided_slice %0 {offsets = [4, 0], sizes = [1, 128], strides = [1, 1]} : vector<5x128xf32> to vector<1x128xf32>
    %52 = vector.shape_cast %51 : vector<1x128xf32> to vector<128xf32>
    %53 = vector.extract_strided_slice %52 {offsets = [0], sizes = [16], strides = [1]} : vector<128xf32> to vector<16xf32>
    %54 = vector.shape_cast %53 : vector<16xf32> to vector<1x16xf32>
    %55 = vector.broadcast %54 : vector<1x16xf32> to vector<1024x16xf32>
    %56 = arith.addf %50, %55 : vector<1024x16xf32>
    %57 = arith.truncf %56 : vector<1024x16xf32> to vector<1024x16xbf16>
    %c0_22 = arith.constant 0 : index
    %c0_23 = arith.constant 0 : index
    %58 = vector.load %arg6[%c0_22, %c0_23] : memref<1024x16xbf16, #tpu.memory_space<vmem>>, vector<1024x16xbf16>
    tpu.vector_store %arg6[%c0_22, %c0_23], %57 {strides = array<i32>} : memref<1024x16xbf16, #tpu.memory_space<vmem>>, vector<1024x16xbf16>,
    return
  }
  func.func @transform_0(%arg0: i32) -> (i32, i32) {
    %c0_i32 = arith.constant 0 : i32
    %c0_i32_0 = arith.constant 0 : i32
    return %arg0, %c0_i32 : i32, i32
  }
  func.func @transform_1(%arg0: i32) -> (i32, i32) {
    %c0_i32 = arith.constant 0 : i32
    %c0_i32_0 = arith.constant 0 : i32
    %c0_i32_1 = arith.constant 0 : i32
    return %c0_i32, %c0_i32_0 : i32, i32
  }
  func.func @transform_2(%arg0: i32) -> (i32, i32, i32) {
    %c0_i32 = arith.constant 0 : i32
    %c0_i32_0 = arith.constant 0 : i32
    %c0_i32_1 = arith.constant 0 : i32
    %c0_i32_2 = arith.constant 0 : i32
    return %c0_i32, %c0_i32_0, %c0_i32_1 : i32, i32, i32
  }
  func.func @transform_3(%arg0: i32) -> (i32, i32) {
    %c0_i32 = arith.constant 0 : i32
    %c0_i32_0 = arith.constant 0 : i32
    %c0_i32_1 = arith.constant 0 : i32
    return %c0_i32, %c0_i32_0 : i32, i32
  }
  func.func @transform_4(%arg0: i32) -> (i32, i32) {
    %c0_i32 = arith.constant 0 : i32
    %c0_i32_0 = arith.constant 0 : i32
    %c0_i32_1 = arith.constant 0 : i32
    return %c0_i32, %c0_i32_0 : i32, i32
  }
  func.func @transform_5(%arg0: i32) -> (i32, i32) {
    %c0_i32 = arith.constant 0 : i32
    %c0_i32_0 = arith.constant 0 : i32
    return %arg0, %c0_i32 : i32, i32
  }
}

</mosaic_0001>

<bundles_post_ra>
// kernel: tpu_custom_call.1
= control target key start
LH: loop header
LB: loop body
LE: loop exit
PB: predicated region body
PF: predicated region fallthrough
CT: control target
= control target key end

     0   :  { %vm231_vm0 = vcmask 261120   ;;  %vm3611_vm1 = vcmask 125952   ;;  %s7626_s1 = inlined_call_operand.vmem [shape: bf16[32,128], index: 1, kind: input, shape index: {}]   ;;  %s7627_s0 = inlined_call_operand.vmem [shape: f32[1024,32], index: 0, kind: input, shape index: {}]   ;;  %s7628_s2 = inlined_call_operand.vmem [shape: bf16[3,128,128], index: 2, kind: input, shape index: {}]   ;;  %s7629_s4 = inlined_call_operand.vmem [shape: f32[5,128], index: 4, kind: input, shape index: {}]   ;;  %s7630_s3 = inlined_call_operand.vmem [shape: bf16[128,16], index: 3, kind: input, shape index: {}]   ;;  %s7631_s5 = inlined_call_operand.vmem [shape: bf16[1024,16], index: 5, kind: output, shape index: {}]  }
   0x1   :  { %v3977_v0 = vld [vmem:[%s7626_s1 + $0x8] sm:$0xff]  ;;  %v3976_v1 = vld [vmem:[%s7626_s1] sm:$0xff]  ;;  %v56_v2 = vld [vmem:[%s7627_s0 + $0x110] sm:$0xff] }
   0x2   :  { %4010 = vmatpush.bf16.msra.mxu1 %v3977_v0  ;;  %v57_v3 = vld [vmem:[%s7627_s0 + $0x118] sm:$0xff]  ;;  %430 = vmatpush.bf16.msra.mxu0 %v3977_v0  ;;  %v3984_v6 = vld [vmem:[%s7628_s2 + $0x30] sm:$0xff]  ;;  %v58_v7 = vld [vmem:[%s7627_s0 + $0x120] sm:$0xff] }
   0x3   :  { %v3985_v4 = vld [vmem:[%s7628_s2 + $0x38] sm:$0xff]  ;;  %4011 = vmatpush.bf16.msra.mxu2 %v3977_v0  ;;  %4012 = vmatpush.bf16.msra.mxu3 %v3977_v0  ;;  %v167_v5 = vpack.c.bf16 %v57_v3, %v56_v2  ;;  %v59_v8 = vld [vmem:[%s7627_s0 + $0x128] sm:$0xff]  ;;  %v60_v10 = vld [vmem:[%s7627_s0 + $0x130] sm:$0xff] }
   0x4   :  { %v168_v9 = vpack.c.bf16 %v59_v8, %v58_v7  ;;  %v61_v11 = vld [vmem:[%s7627_s0 + $0x138] sm:$0xff]  ;;  %v3983_v13 = vld [vmem:[%s7628_s2 + $0x28] sm:$0xff]  ;;  %v62_v14 = vld [vmem:[%s7627_s0 + $0x140] sm:$0xff] }
   0x5   :  { %v169_v12 = vpack.c.bf16 %v61_v11, %v60_v10  ;;  %v63_v15 = vld [vmem:[%s7627_s0 + $0x148] sm:$0xff]  ;;  %v64_v17 = vld [vmem:[%s7627_s0 + $0x150] sm:$0xff]  ;;  %v65_v18 = vld [vmem:[%s7627_s0 + $0x158] sm:$0xff] }
   0x6   :  { %4013 = vmatpush.bf16.msra.mxu1 %v3976_v1  ;;  %431 = vmatpush.bf16.msra.mxu0 %v3976_v1  ;;  %v170_v16 = vpack.c.bf16 %v63_v15, %v62_v14  ;;  %v171_v19 = vpack.c.bf16 %v65_v18, %v64_v17  ;;  %v3982_v20 = vld [vmem:[%s7628_s2 + $0x20] sm:$0xff]  ;;  %v67_v22 = vld [vmem:[%s7627_s0 + $0x168] sm:$0xff]  ;;  %v68_v27 = vld [vmem:[%s7627_s0 + $0x170] sm:$0xff] }
   0x7   :  { %4014 = vmatpush.bf16.msra.mxu2 %v3976_v1  ;;  %4015 = vmatpush.bf16.msra.mxu3 %v3976_v1  ;;  %v66_v21 = vld [vmem:[%s7627_s0 + $0x160] sm:$0xff]  ;;  %v23_v25 = vld [vmem:[%s7627_s0 + $0x8] sm:$0xff]  ;;  %v69_v28 = vld [vmem:[%s7627_s0 + $0x178] sm:$0xff] }
   0x8   :  { %v172_v23 = vpack.c.bf16 %v67_v22, %v66_v21  ;;  %v22_v24 = vld [vmem:[%s7627_s0] sm:$0xff]  ;;  %v173_v29 = vpack.c.bf16 %v69_v28, %v68_v27  ;;  %v3981_v30 = vld [vmem:[%s7628_s2 + $0x18] sm:$0xff]  ;;  %v24_v31 = vld [vmem:[%s7627_s0 + $0x10] sm:$0xff] }
   0x9   :  { %3769 = vmatmul.msk.bf16.vlgmr.msra.gmra.mxu1 %vm231_vm0, %v167_v5  ;;  %v150_v26 = vpack.c.bf16 %v23_v25, %v22_v24  ;;  %v25_v32 = vld [vmem:[%s7627_s0 + $0x18] sm:$0xff]  ;;  %v70_v33 = vld [vmem:[%s7627_s0 + $0x180] sm:$0xff]  ;;  %v71_v34 = vld [vmem:[%s7627_s0 + $0x188] sm:$0xff] }
   0xa   :  { %1010 = vmatpush.bf16.msrb.mxu1 %v3985_v4  ;;  %v151_v35 = vpack.c.bf16 %v25_v32, %v24_v31  ;;  %v174_v36 = vpack.c.bf16 %v71_v34, %v70_v33  ;;  %v90_v37 = vld [vmem:[%s7627_s0 + $0x220] sm:$0xff]  ;;  %v91_v38 = vld [vmem:[%s7627_s0 + $0x228] sm:$0xff]  ;;  %v72_v42 = vld [vmem:[%s7627_s0 + $0x190] sm:$0xff] }
   0xb   :  { %3752 = vmatmul.msk.bf16.vlgmr.msra.gmra.mxu0 %vm231_vm0, %v150_v26  ;;  %v184_v39 = vpack.c.bf16 %v91_v38, %v90_v37  ;;  %v26_v40 = vld [vmem:[%s7627_s0 + $0x20] sm:$0xff]  ;;  %v27_v41 = vld [vmem:[%s7627_s0 + $0x28] sm:$0xff]  ;;  %v73_v43 = vld [vmem:[%s7627_s0 + $0x198] sm:$0xff] }
   0xc   :  { %v152_v44 = vpack.c.bf16 %v27_v41, %v26_v40  ;;  %v175_v45 = vpack.c.bf16 %v73_v43, %v72_v42  ;;  %v3993_v47 = vld [vmem:[%s7628_s2 + $0x78] sm:$0xff]  ;;  %v92_v48 = vld [vmem:[%s7627_s0 + $0x230] sm:$0xff]  ;;  %v74_v55 = vld [vmem:[%s7627_s0 + $0x1a0] sm:$0xff] }
   0xd   :  { %3786 = vmatmul.msk.bf16.vlgmr.msra.gmra.mxu2 %vm231_vm0, %v184_v39  ;;  %v93_v49 = vld [vmem:[%s7627_s0 + $0x238] sm:$0xff]  ;;  %v3980_v52 = vld [vmem:[%s7628_s2 + $0x10] sm:$0xff]  ;;  %v75_v56 = vld [vmem:[%s7627_s0 + $0x1a8] sm:$0xff] }
   0xe   :  { %1011 = vmatpush.bf16.msrb.mxu1 %v3984_v6  ;;  %1725 = vmatpush.bf16.msrb.mxu2 %v3993_v47  ;;  %v185_v50 = vpack.c.bf16 %v93_v49, %v92_v48  ;;  %v28_v53 = vld [vmem:[%s7627_s0 + $0x30] sm:$0xff]  ;;  %v29_v54 = vld [vmem:[%s7627_s0 + $0x38] sm:$0xff]  ;;  %v176_v58 = vpack.c.bf16 %v75_v56, %v74_v55  ;;  %v94_v60 = vld [vmem:[%s7627_s0 + $0x240] sm:$0xff] }
   0xf   :  { %v153_v57 = vpack.c.bf16 %v29_v54, %v28_v53  ;;  %v95_v61 = vld [vmem:[%s7627_s0 + $0x248] sm:$0xff]  ;;  %v30_v0 = vld [vmem:[%s7627_s0 + $0x40] sm:$0xff]  ;;  %v76_v2 = vld [vmem:[%s7627_s0 + $0x1b0] sm:$0xff] }
  0x10   :  { %v186_v62 = vpack.c.bf16 %v95_v61, %v94_v60  ;;  %v31_v1 = vld [vmem:[%s7627_s0 + $0x48] sm:$0xff]  ;;  %v77_v3 = vld [vmem:[%s7627_s0 + $0x1b8] sm:$0xff]  ;;  %v3992_v7 = vld [vmem:[%s7628_s2 + $0x70] sm:$0xff] }
  0x11   :  { %v154_v4 = vpack.c.bf16 %v31_v1, %v30_v0  ;;  %v177_v5 = vpack.c.bf16 %v77_v3, %v76_v2  ;;  %v96_v8 = vld [vmem:[%s7627_s0 + $0x250] sm:$0xff]  ;;  %v3979_v14 = vld [vmem:[%s7628_s2 + $0x8] sm:$0xff]  ;;  %v78_v15 = vld [vmem:[%s7627_s0 + $0x1c0] sm:$0xff] }
  0x12   :  { %1012 = vmatpush.bf16.msrb.mxu1 %v3983_v13  ;;  %1726 = vmatpush.bf16.msrb.mxu2 %v3992_v7  ;;  %v33_v13 = vld [vmem:[%s7627_s0 + $0x58] sm:$0xff]  ;;  %v99_v21 = vld [vmem:[%s7627_s0 + $0x268] sm:$0xff]  ;;  %v34_v24 = vld [vmem:[%s7627_s0 + $0x60] sm:$0xff] }
  0x13   :  { %v35_v25 = vld [vmem:[%s7627_s0 + $0x68] sm:$0xff]  ;;  %v80_v26 = vld [vmem:[%s7627_s0 + $0x1d0] sm:$0xff]  ;;  %v81_v27 = vld [vmem:[%s7627_s0 + $0x1d8] sm:$0xff] }
  0x14   :  { %v156_v28 = vpack.c.bf16 %v35_v25, %v34_v24  ;;  %v3991_v31 = vld [vmem:[%s7628_s2 + $0x68] sm:$0xff]  ;;  %v100_v32 = vld [vmem:[%s7627_s0 + $0x270] sm:$0xff]  ;;  %v101_v33 = vld [vmem:[%s7627_s0 + $0x278] sm:$0xff] }
  0x15   :  { %v189_v34 = vpack.c.bf16 %v101_v33, %v100_v32  ;;  %v37_v37 = vld [vmem:[%s7627_s0 + $0x78] sm:$0xff]  ;;  %v82_v38 = vld [vmem:[%s7627_s0 + $0x1e0] sm:$0xff]  ;;  %v83_v39 = vld [vmem:[%s7627_s0 + $0x1e8] sm:$0xff] }
  0x16   :  { %1013 = vmatpush.bf16.msrb.mxu1 %v3982_v20  ;;  %v98_v20 = vld [vmem:[%s7627_s0 + $0x260] sm:$0xff]  ;;  %1727 = vmatpush.bf16.msrb.mxu2 %v3991_v31  ;;  %v180_v41 = vpack.c.bf16 %v83_v39, %v82_v38  ;;  %v84_v53 = vld [vmem:[%s7627_s0 + $0x1f0] sm:$0xff]  ;;  %v85_v54 = vld [vmem:[%s7627_s0 + $0x1f8] sm:$0xff] }
  0x17   :  { %v188_v22 = vpack.c.bf16 %v99_v21, %v98_v20  ;;  %v3978_v43 = vld [vmem:[%s7628_s2] sm:$0xff]  ;;  %v181_v56 = vpack.c.bf16 %v85_v54, %v84_v53  ;;  %v104_v61 = vld [vmem:[%s7627_s0 + $0x290] sm:$0xff]  ;;  %v87_v7 = vld [vmem:[%s7627_s0 + $0x208] sm:$0xff] }
  0x18   :  { %v40_v3 = vld [vmem:[%s7627_s0 + $0x90] sm:$0xff]  ;;  %v43_v20 = vld [vmem:[%s7627_s0 + $0xa8] sm:$0xff]  ;;  %v4400_v31 = vld [vmem:[%s7629_s4] sm:$0x1f] }
  0x19   :  { %3770 = vmatmul.msk.bf16.gmra.mxu1 %vm231_vm0, %v168_v9  ;;  %v97_v9 = vld [vmem:[%s7627_s0 + $0x258] sm:$0xff]  ;;  %v88_v21 = vld [vmem:[%s7627_s0 + $0x210] sm:$0xff] }
  0x1a   :  { %1014 = vmatpush.bf16.msrb.mxu1 %v3981_v30  ;;  %v187_v10 = vpack.c.bf16 %v97_v9, %v96_v8  ;;  %v108_v33 = vld [vmem:[%s7627_s0 + $0x2b0] sm:$0xff] }
  0x1b   :  { %3753 = vmatmul.msk.bf16.gmra.mxu0 %vm231_vm0, %v151_v35 }
  0x1d   :  { %3787 = vmatmul.msk.bf16.gmra.mxu2 %vm231_vm0, %v185_v50  ;;  %v38_v50 = vld [vmem:[%s7627_s0 + $0x80] sm:$0xff] }
  0x1e   :  { %1015 = vmatpush.bf16.msrb.mxu1 %v3980_v52  ;;  %v39_v52 = vld [vmem:[%s7627_s0 + $0x88] sm:$0xff] }
  0x1f   :  { %v158_v55 = vpack.c.bf16 %v39_v52, %v38_v50 }
  0x22   :  { %1016 = vmatpush.bf16.msrb.mxu1 %v3979_v14  ;;  %v107_v14 = vld [vmem:[%s7627_s0 + $0x2a8] sm:$0xff] }
  0x26   :  { %1017 = vmatpush.bf16.msrb.mxu1 %v3978_v43  ;;  %v44_v43 = vld [vmem:[%s7627_s0 + $0xb0] sm:$0xff] }
  0x29   :  { %3771 = vmatmul.msk.bf16.gmra.mxu1 %vm231_vm0, %v169_v12  ;;  %v32_v12 = vld [vmem:[%s7627_s0 + $0x50] sm:$0xff] }
  0x2a   :  { %v155_v17 = vpack.c.bf16 %v33_v13, %v32_v12  ;;  %v106_v13 = vld [vmem:[%s7627_s0 + $0x2a0] sm:$0xff] }
  0x2b   :  { %3754 = vmatmul.msk.bf16.gmra.mxu0 %vm231_vm0, %v152_v44  ;;  %v102_v44 = vld [vmem:[%s7627_s0 + $0x280] sm:$0xff] }
  0x2d   :  { %3788 = vmatmul.msk.bf16.gmra.mxu2 %vm231_vm0, %v186_v62  ;;  %v105_v62 = vld [vmem:[%s7627_s0 + $0x298] sm:$0xff] }
  0x2e   :  { %v191_v0 = vpack.c.bf16 %v105_v62, %v104_v61 }
  0x39   :  { %3772 = vmatmul.msk.bf16.gmra.mxu1 %vm231_vm0, %v170_v16  ;;  %v79_v16 = vld [vmem:[%s7627_s0 + $0x1c8] sm:$0xff] }
  0x3a   :  { %v178_v18 = vpack.c.bf16 %v79_v16, %v78_v15  ;;  %v192_v15 = vpack.c.bf16 %v107_v14, %v106_v13  ;;  %v3988_v14 = vld [vmem:[%s7628_s2 + $0x50] sm:$0xff] }
  0x3b   :  { %3755 = vmatmul.msk.bf16.gmra.mxu0 %vm231_vm0, %v153_v57 }
  0x3d   :  { %3789 = vmatmul.msk.bf16.gmra.mxu2 %vm231_vm0, %v187_v10 }
  0x49   :  { %3773 = vmatmul.msk.bf16.gmra.mxu1 %vm231_vm0, %v171_v19 }
  0x4b   :  { %3756 = vmatmul.msk.bf16.gmra.mxu0 %vm231_vm0, %v154_v4  ;;  %v41_v4 = vld [vmem:[%s7627_s0 + $0x98] sm:$0xff] }
  0x4c   :  { %v159_v8 = vpack.c.bf16 %v41_v4, %v40_v3  ;;  %v46_v4 = vld [vmem:[%s7627_s0 + $0xc0] sm:$0xff] }
  0x4d   :  { %3790 = vmatmul.msk.bf16.gmra.mxu2 %vm231_vm0, %v188_v22  ;;  %v89_v22 = vld [vmem:[%s7627_s0 + $0x218] sm:$0xff] }
  0x59   :  { %3774 = vmatmul.msk.bf16.gmra.mxu1 %vm231_vm0, %v172_v23 }
  0x5b   :  { %3757 = vmatmul.msk.bf16.gmra.mxu0 %vm231_vm0, %v155_v17 }
  0x5d   :  { %3791 = vmatmul.msk.bf16.gmra.mxu2 %vm231_vm0, %v189_v34  ;;  %v109_v34 = vld [vmem:[%s7627_s0 + $0x2b8] sm:$0xff] }
  0x69   :  { %3775 = vmatmul.msk.bf16.gmra.mxu1 %vm231_vm0, %v173_v29  ;;  %v179_v29 = vpack.c.bf16 %v81_v27, %v80_v26  ;;  %v183_v26 = vpack.c.bf16 %v89_v22, %v88_v21  ;;  %v113_v21 = vld [vmem:[%s7627_s0 + $0x2d8] sm:$0xff] }
  0x6b   :  { %3758 = vmatmul.msk.bf16.gmra.mxu0 %vm231_vm0, %v156_v28  ;;  %v3989_v28 = vld [vmem:[%s7628_s2 + $0x58] sm:$0xff] }
  0x79   :  { %3776 = vmatmul.msk.bf16.gmra.mxu1 %vm231_vm0, %v174_v36  ;;  %v36_v36 = vld [vmem:[%s7627_s0 + $0x70] sm:$0xff] }
  0x7a   :  { %v157_v40 = vpack.c.bf16 %v37_v37, %v36_v36  ;;  %v4411_v36 = vperm.slane %v4400_v31, 0  ;;  %v193_v37 = vpack.c.bf16 %v109_v34, %v108_v33  ;;  %v122_v33 = vld [vmem:[%s7627_s0 + $0x320] sm:$0xff]  ;;  %v123_v34 = vld [vmem:[%s7627_s0 + $0x328] sm:$0xff] }
  0x7c   :  { %3759 = vmatmul.msk.bf16.gmra.mxu0 %vm231_vm0, %v157_v40 }
  0x86   :  { %v4166_v46 = vpop.f32.mrf.mxu1 }
  0x88   :  { %v433_v49 = vpop.f32.mrf.mxu0 }
  0x89   :  { %3777 = vmatmul.msk.bf16.gmra.mxu1 %vm231_vm0, %v175_v45  ;;  %v103_v45 = vld [vmem:[%s7627_s0 + $0x288] sm:$0xff]  ;;  %v4416_v39 = vadd.f32 %v433_v49, %v4411_v36 }
  0x8a   :  { %v190_v47 = vpack.c.bf16 %v103_v45, %v102_v44  ;;  %v45_v44 = vld [vmem:[%s7627_s0 + $0xb8] sm:$0xff] }
  0x8b   :  { %v753_v49 = vmax.f32 %v4416_v39, 0.0 }
  0x8c   :  { %3792 = vmatmul.msk.bf16.gmra.mxu2 %vm231_vm0, %v190_v47  ;;  %3760 = vmatmul.msk.bf16.gmra.mxu0 %vm231_vm0, %v158_v55  ;;  %v161_v47 = vpack.c.bf16 %v45_v44, %v44_v43  ;;  %v200_v43 = vpack.c.bf16 %v123_v34, %v122_v33 }
  0x8e   :  { %v4178_v51 = vpop.f32.mrf.mxu1  ;;  %3802 = vmatmul.msk.bf16.vlgmr.msra.gmra.mxu3 %vm231_vm0, %v200_v43 }
  0x90   :  { %v435_v60 = vpop.f32.mrf.mxu0  ;;  %v4388_v24 = vpop.f32.mrf.mxu2 }
  0x91   :  { %7715 = vst [vmem:[#allocation4_spill] sm:$0xff] %v4388_v24  ;;  %v4419_v40 = vadd.f32 %v435_v60, %v4411_v36 }
  0x93   :  { %v754_v50 = vmax.f32 %v4419_v40, 0.0 }
  0x95   :  { %v881_v53 = vpack.c.bf16 %v754_v50, %v753_v49 }
  0x96   :  { %v4197_v59 = vpop.f32.mrf.mxu1 }
  0x98   :  { %v438_v2 = vpop.f32.mrf.mxu0  ;;  %v4402_v32 = vpop.f32.mrf.mxu2 }
  0x99   :  { %3778 = vmatmul.msk.bf16.gmra.mxu1 %vm231_vm0, %v176_v58  ;;  %v3990_v58 = vld [vmem:[%s7628_s2 + $0x60] sm:$0xff]  ;;  %7717 = vst [vmem:[#allocation6_spill] sm:$0xff] %v4402_v32  ;;  %v4448_v62 = vadd.f32 %v438_v2, %v4411_v36 }
  0x9a   :  { %1728 = vmatpush.bf16.msrb.mxu2 %v3990_v58  ;;  %v111_v58 = vld [vmem:[%s7627_s0 + $0x2c8] sm:$0xff] }
  0x9b   :  { %v755_v2 = vmax.f32 %v4448_v62, 0.0 }
  0x9c   :  { %3793 = vmatmul.msk.bf16.gmra.mxu2 %vm231_vm0, %v191_v0  ;;  %3761 = vmatmul.msk.bf16.gmra.mxu0 %vm231_vm0, %v159_v8 }
  0x9e   :  { %v4206_v63 = vpop.f32.mrf.mxu1  ;;  %1729 = vmatpush.bf16.msrb.mxu2 %v3989_v28 }
  0xa0   :  { %v440_v12 = vpop.f32.mrf.mxu0  ;;  %v4430_v45 = vpop.f32.mrf.mxu2 }
  0xa1   :  { %7719 = vst [vmem:[#allocation8_spill] sm:$0xff] %v4430_v45  ;;  %v4451_v0 = vadd.f32 %v440_v12, %v4411_v36 }
  0xa2   :  { %1730 = vmatpush.bf16.msrb.mxu2 %v3988_v14 }
  0xa6   :  { %v4222_v6 = vpop.f32.mrf.mxu1 }
  0xa8   :  { %v4374_v17 = vpop.f32.mrf.mxu0  ;;  %v4437_v55 = vpop.f32.mrf.mxu2 }
  0xa9   :  { %3779 = vmatmul.msk.bf16.gmra.mxu1 %vm231_vm0, %v177_v5  ;;  %v86_v5 = vld [vmem:[%s7627_s0 + $0x200] sm:$0xff]  ;;  %7721 = vst [vmem:[#allocation10_spill] sm:$0xff] %v4437_v55 }
  0xaa   :  { %v182_v9 = vpack.c.bf16 %v87_v7, %v86_v5  ;;  %v47_v5 = vld [vmem:[%s7627_s0 + $0xc8] sm:$0xff] }
  0xab   :  { %v162_v8 = vpack.c.bf16 %v47_v5, %v46_v4  ;;  %v114_v5 = vld [vmem:[%s7627_s0 + $0x2e0] sm:$0xff] }
  0xac   :  { %3794 = vmatmul.msk.bf16.gmra.mxu2 %vm231_vm0, %v192_v15 }
  0xae   :  { %v4234_v11 = vpop.f32.mrf.mxu1 }
  0xb0   :  { %v4462_v7 = vpop.f32.mrf.mxu2 }
  0xb1   :  { %7723 = vst [vmem:[#allocation12_spill] sm:$0xff] %v4462_v7 }
  0xb6   :  { %v4253_v19 = vpop.f32.mrf.mxu1 }
  0xb9   :  { %3780 = vmatmul.msk.bf16.gmra.mxu1 %vm231_vm0, %v178_v18  ;;  %v42_v18 = vld [vmem:[%s7627_s0 + $0xa0] sm:$0xff] }
  0xba   :  { %v160_v25 = vpack.c.bf16 %v43_v20, %v42_v18  ;;  %v4472_v18 = vpop.f32.mrf.mxu2  ;;  %v112_v20 = vld [vmem:[%s7627_s0 + $0x2d0] sm:$0xff] }
  0xbb   :  { %7725 = vst [vmem:[#allocation14_spill] sm:$0xff] %v4472_v18  ;;  %v195_v22 = vpack.c.bf16 %v113_v21, %v112_v20  ;;  %v124_v20 = vld [vmem:[%s7627_s0 + $0x330] sm:$0xff]  ;;  %v125_v21 = vld [vmem:[%s7627_s0 + $0x338] sm:$0xff] }
  0xbc   :  { %3762 = vmatmul.msk.bf16.gmra.mxu0 %vm231_vm0, %v160_v25  ;;  %3795 = vmatmul.msk.bf16.gmra.mxu2 %vm231_vm0, %v193_v37  ;;  %v201_v33 = vpack.c.bf16 %v125_v21, %v124_v20 }
  0xbe   :  { %v4262_v23 = vpop.f32.mrf.mxu1  ;;  %3803 = vmatmul.msk.bf16.gmra.mxu3 %vm231_vm0, %v201_v33 }
  0xc2   :  { %v4504_v44 = vpop.f32.mrf.mxu2 }
  0xc3   :  { %7727 = vst [vmem:[#allocation16_spill] sm:$0xff] %v4504_v44 }
  0xc6   :  { %v4278_v30 = vpop.f32.mrf.mxu1 }
  0xc9   :  { %3781 = vmatmul.msk.bf16.gmra.mxu1 %vm231_vm0, %v179_v29  ;;  %v445_v29 = vpop.f32.mrf.mxu0 }
  0xca   :  { %v4487_v28 = vadd.f32 %v445_v29, %v4411_v36  ;;  %v49_v29 = vld [vmem:[%s7627_s0 + $0xd8] sm:$0xff]  ;;  %v4515_v4 = vpop.f32.mrf.mxu2 }
  0xcb   :  { %7729 = vst [vmem:[#allocation18_spill] sm:$0xff] %v4515_v4  ;;  %v3986_v4 = vld [vmem:[%s7628_s2 + $0x40] sm:$0xff] }
  0xcc   :  { %3763 = vmatmul.msk.bf16.gmra.mxu0 %vm231_vm0, %v161_v47  ;;  %v758_v50 = vmax.f32 %v4487_v28, 0.0 }
  0xce   :  { %v4290_v35 = vpop.f32.mrf.mxu1 }
  0xd2   :  { %v4547_v34 = vpop.f32.mrf.mxu2 }
  0xd3   :  { %7731 = vst [vmem:[#allocation20_spill] sm:$0xff] %v4547_v34 }
  0xd6   :  { %v4306_v42 = vpop.f32.mrf.mxu1 }
  0xd9   :  { %3782 = vmatmul.msk.bf16.gmra.mxu1 %vm231_vm0, %v180_v41  ;;  %v4422_v41 = vpop.f32.mrf.mxu0 }
  0xdc   :  { %3764 = vmatmul.msk.bf16.gmra.mxu0 %vm231_vm0, %v162_v8  ;;  %v115_v8 = vld [vmem:[%s7627_s0 + $0x2e8] sm:$0xff] }
  0xde   :  { %v4318_v48 = vpop.f32.mrf.mxu1 }
  0xe1   :  { %v450_v54 = vpop.f32.mrf.mxu0 }
  0xe2   :  { %v4530_v14 = vadd.f32 %v450_v54, %v4411_v36  ;;  %v51_v54 = vld [vmem:[%s7627_s0 + $0xe8] sm:$0xff] }
  0xe6   :  { %v4334_v57 = vpop.f32.mrf.mxu1 }
  0xe9   :  { %3783 = vmatmul.msk.bf16.gmra.mxu1 %vm231_vm0, %v181_v56  ;;  %v110_v56 = vld [vmem:[%s7627_s0 + $0x2c0] sm:$0xff]  ;;  %v4454_v3 = vpop.f32.mrf.mxu0 }
  0xea   :  { %v194_v60 = vpack.c.bf16 %v111_v58, %v110_v56  ;;  %v4570_v21 = vadd.f32 %v4454_v3, %v4411_v36  ;;  %v52_v3 = vld [vmem:[%s7627_s0 + $0xf0] sm:$0xff] }
  0xec   :  { %3796 = vmatmul.msk.bf16.gmra.mxu2 %vm231_vm0, %v194_v60  ;;  %v4001_v60 = vld [vmem:[%s7628_s2 + $0xb8] sm:$0xff] }
  0xed   :  { %2440 = vmatpush.bf16.msrb.mxu3 %v4001_v60  ;;  %v4558_v60 = vpop.f32.mrf.mxu2 }
  0xee   :  { %v4346_v1 = vpop.f32.mrf.mxu1  ;;  %7733 = vst [vmem:[#allocation22_spill] sm:$0xff] %v4558_v60 }
  0xf1   :  { %v455_v15 = vpop.f32.mrf.mxu0 }
  0xf2   :  { %v4573_v33 = vadd.f32 %v455_v15, %v4411_v36  ;;  %v53_v15 = vld [vmem:[%s7627_s0 + $0xf8] sm:$0xff] }
  0xf6   :  { %v4362_v10 = vpop.f32.mrf.mxu1 }
  0xf7   :  { %7713 = vst [vmem:[#allocation2_spill] sm:$0xff] %v4362_v10 }
  0xf9   :  { %3784 = vmatmul.msk.bf16.gmra.mxu1 %vm231_vm0, %v182_v9  ;;  %v756_v9 = vmax.f32 %v4451_v0, 0.0  ;;  %v4496_v37 = vpop.f32.mrf.mxu0 }
  0xfb   :  { %v882_v13 = vpack.c.bf16 %v756_v9, %v755_v2  ;;  %v196_v2 = vpack.c.bf16 %v115_v8, %v114_v5  ;;  %v116_v5 = vld [vmem:[%s7627_s0 + $0x2f0] sm:$0xff]  ;;  %v117_v8 = vld [vmem:[%s7627_s0 + $0x2f8] sm:$0xff] }
  0xfc   :  { %3797 = vmatmul.msk.bf16.gmra.mxu2 %vm231_vm0, %v195_v22 }
  0xfe   :  { %v4371_v16 = vpop.f32.mrf.mxu1 }
  0xff   :  { %7714 = vst [vmem:[#allocation3_spill] sm:$0xff] %v4371_v16 }
 0x101   :  { %v460_v58 = vpop.f32.mrf.mxu0 }
 0x106   :  { %v4391_v27 = vpop.f32.mrf.mxu1 }
 0x107   :  { %7716 = vst [vmem:[#allocation5_spill] sm:$0xff] %v4391_v27 }
 0x109   :  { %3785 = vmatmul.msk.bf16.gmra.mxu1 %vm231_vm0, %v183_v26  ;;  %v4484_v26 = vadd.f32 %v4374_v17, %v4411_v36  ;;  %v48_v17 = vld [vmem:[%s7627_s0 + $0xd0] sm:$0xff]  ;;  %v4539_v22 = vpop.f32.mrf.mxu0 }
 0x10a   :  { %v163_v47 = vpack.c.bf16 %v49_v29, %v48_v17  ;;  %v760_v29 = vmax.f32 %v4530_v14, 0.0 }
 0x10b   :  { %v757_v49 = vmax.f32 %v4484_v26, 0.0 }
 0x10c   :  { %3765 = vmatmul.msk.bf16.gmra.mxu0 %vm231_vm0, %v163_v47  ;;  %3798 = vmatmul.msk.bf16.gmra.mxu2 %vm231_vm0, %v196_v2  ;;  %v197_v2 = vpack.c.bf16 %v117_v8, %v116_v5  ;;  %v762_v5 = vmax.f32 %v4573_v33, 0.0 }
 0x10d   :  { %v883_v56 = vpack.c.bf16 %v758_v50, %v757_v49  ;;  %v3987_v50 = vld [vmem:[%s7628_s2 + $0x48] sm:$0xff] }
 0x10e   :  { %v4413_v38 = vpop.f32.mrf.mxu1  ;;  %1731 = vmatpush.bf16.msrb.mxu2 %v3987_v50  ;;  %v761_v50 = vmax.f32 %v4570_v21, 0.0 }
 0x10f   :  { %7718 = vst [vmem:[#allocation7_spill] sm:$0xff] %v4413_v38 }
 0x112   :  { %1732 = vmatpush.bf16.msrb.mxu2 %v3986_v4 }
 0x116   :  { %v4435_v52 = vpop.f32.mrf.mxu1 }
 0x117   :  { %7720 = vst [vmem:[#allocation9_spill] sm:$0xff] %v4435_v52 }
 0x119   :  { %1018 = vmatmul.bf16.vlgmr.msrb.gmra.mxu1 %v881_v53 }
 0x11c   :  { %3799 = vmatmul.msk.bf16.gmra.mxu2 %vm231_vm0, %v197_v2  ;;  %v885_v2 = vpack.c.bf16 %v762_v5, %v761_v50  ;;  %v4613_v50 = vadd.f32 %v4496_v37, %v4411_v36  ;;  %v4616_v5 = vadd.f32 %v460_v58, %v4411_v36  ;;  %v54_v37 = vld [vmem:[%s7627_s0 + $0x100] sm:$0xff]  ;;  %v55_v58 = vld [vmem:[%s7627_s0 + $0x108] sm:$0xff] }
 0x11e   :  { %v4445_v61 = vpop.f32.mrf.mxu1 }
 0x11f   :  { %7722 = vst [vmem:[#allocation11_spill] sm:$0xff] %v4445_v61 }
 0x126   :  { %v4467_v12 = vpop.f32.mrf.mxu1 }
 0x127   :  { %7724 = vst [vmem:[#allocation13_spill] sm:$0xff] %v4467_v12 }
 0x129   :  { %1023 = vmatmul.bf16.gmra.mxu1 %v882_v13  ;;  %v4527_v13 = vadd.f32 %v4422_v41, %v4411_v36  ;;  %v50_v41 = vld [vmem:[%s7627_s0 + $0xe0] sm:$0xff] }
 0x12a   :  { %v164_v43 = vpack.c.bf16 %v51_v54, %v50_v41  ;;  %v126_v41 = vld [vmem:[%s7627_s0 + $0x340] sm:$0xff]  ;;  %v127_v54 = vld [vmem:[%s7627_s0 + $0x348] sm:$0xff] }
 0x12b   :  { %v759_v17 = vmax.f32 %v4527_v13, 0.0 }
 0x12c   :  { %3766 = vmatmul.msk.bf16.gmra.mxu0 %vm231_vm0, %v164_v43 }
 0x12d   :  { %v884_v49 = vpack.c.bf16 %v760_v29, %v759_v17  ;;  %v202_v17 = vpack.c.bf16 %v127_v54, %v126_v41  ;;  %v4590_v29 = vpop.f32.mrf.mxu2  ;;  %v4000_v41 = vld [vmem:[%s7628_s2 + $0xb0] sm:$0xff] }
 0x12e   :  { %v4480_v25 = vpop.f32.mrf.mxu1  ;;  %7735 = vst [vmem:[#allocation24_spill] sm:$0xff] %v4590_v29  ;;  %2441 = vmatpush.bf16.msrb.mxu3 %v4000_v41  ;;  %v129_v41 = vld [vmem:[%s7627_s0 + $0x358] sm:$0xff]  ;;  %v764_v29 = vmax.f32 %v4616_v5, 0.0 }
 0x12f   :  { %7726 = vst [vmem:[#allocation15_spill] sm:$0xff] %v4480_v25  ;;  %3804 = vmatmul.msk.bf16.gmra.mxu3 %vm231_vm0, %v202_v17  ;;  %v119_v17 = vld [vmem:[%s7627_s0 + $0x308] sm:$0xff] }
 0x135   :  { %v4601_v60 = vpop.f32.mrf.mxu2 }
 0x136   :  { %v4510_v53 = vpop.f32.mrf.mxu1  ;;  %7737 = vst [vmem:[#allocation26_spill] sm:$0xff] %v4601_v60  ;;  %v166_v60 = vpack.c.bf16 %v55_v58, %v54_v37  ;;  %v120_v58 = vld [vmem:[%s7627_s0 + $0x310] sm:$0xff] }
 0x137   :  { %7728 = vst [vmem:[#allocation17_spill] sm:$0xff] %v4510_v53 }
 0x139   :  { %1028 = vmatmul.bf16.gmra.mxu1 %v883_v56  ;;  %v465_v56 = vpop.f32.mrf.mxu0 }
 0x13a   :  { %v4657_v4 = vadd.f32 %v465_v56, %v4411_v36 }
 0x13c   :  { %v766_v56 = vmax.f32 %v4657_v4, 0.0 }
 0x13d   :  { %v4633_v34 = vpop.f32.mrf.mxu2 }
 0x13e   :  { %v4523_v9 = vpop.f32.mrf.mxu1  ;;  %7739 = vst [vmem:[#allocation28_spill] sm:$0xff] %v4633_v34 }
 0x13f   :  { %7730 = vst [vmem:[#allocation19_spill] sm:$0xff] %v4523_v9 }
 0x141   :  { %v4582_v43 = vpop.f32.mrf.mxu0 }
 0x145   :  { %v4648_v34 = vpop.f32.mrf.mxu2 }
 0x146   :  { %v4553_v47 = vpop.f32.mrf.mxu1  ;;  %7741 = vst [vmem:[#allocation30_spill] sm:$0xff] %v4648_v34 }
 0x147   :  { %7732 = vst [vmem:[#allocation21_spill] sm:$0xff] %v4553_v47 }
 0x149   :  { %1033 = vmatmul.bf16.gmra.mxu1 %v884_v49  ;;  %v165_v49 = vpack.c.bf16 %v53_v15, %v52_v3  ;;  %v470_v54 = vpop.f32.mrf.mxu0  ;;  %v118_v3 = vld [vmem:[%s7627_s0 + $0x300] sm:$0xff] }
 0x14a   :  { %v198_v15 = vpack.c.bf16 %v119_v17, %v118_v3 }
 0x14b   :  { %3767 = vmatmul.msk.bf16.gmra.mxu0 %vm231_vm0, %v165_v49 }
 0x14c   :  { %3800 = vmatmul.msk.bf16.gmra.mxu2 %vm231_vm0, %v198_v15  ;;  %v763_v15 = vmax.f32 %v4613_v50, 0.0 }
 0x14d   :  { %v4674_v7 = vpop.f32.mrf.mxu2 }
 0x14e   :  { %v4566_v20 = vpop.f32.mrf.mxu1  ;;  %7744 = vst [vmem:[#allocation33_spill] sm:$0xff] %v4674_v7 }
 0x14f   :  { %7734 = vst [vmem:[#allocation23_spill] sm:$0xff] %v4566_v20 }
 0x151   :  { %v473_v3 = vpop.f32.mrf.mxu0 }
 0x156   :  { %v4596_v8 = vpop.f32.mrf.mxu1 }
 0x157   :  { %7736 = vst [vmem:[#allocation25_spill] sm:$0xff] %v4596_v8 }
 0x159   :  { %1038 = vmatmul.bf16.gmra.mxu1 %v885_v2  ;;  %v128_v2 = vld [vmem:[%s7627_s0 + $0x350] sm:$0xff]  ;;  %v475_v37 = vpop.f32.mrf.mxu0 }
 0x15a   :  { %v203_v17 = vpack.c.bf16 %v129_v41, %v128_v2  ;;  %v886_v41 = vpack.c.bf16 %v764_v29, %v763_v15  ;;  %v4654_v29 = vadd.f32 %v4539_v22, %v4411_v36  ;;  %v130_v15 = vld [vmem:[%s7627_s0 + $0x360] sm:$0xff] }
 0x15b   :  { %3768 = vmatmul.msk.bf16.gmra.mxu0 %vm231_vm0, %v166_v60 }
 0x15c   :  { %3805 = vmatmul.msk.bf16.gmra.mxu3 %vm231_vm0, %v203_v17  ;;  %v121_v17 = vld [vmem:[%s7627_s0 + $0x318] sm:$0xff]  ;;  %v765_v22 = vmax.f32 %v4654_v29, 0.0 }
 0x15d   :  { %v199_v60 = vpack.c.bf16 %v121_v17, %v120_v58  ;;  %v3999_v17 = vld [vmem:[%s7628_s2 + $0xa8] sm:$0xff] }
 0x15e   :  { %v4609_v49 = vpop.f32.mrf.mxu1  ;;  %2442 = vmatpush.bf16.msrb.mxu3 %v3999_v17  ;;  %v887_v18 = vpack.c.bf16 %v766_v56, %v765_v22  ;;  %v133_v17 = vld [vmem:[%s7627_s0 + $0x378] sm:$0xff]  ;;  %v4691_v22 = vpop.f32.mrf.mxu2 }
 0x15f   :  { %7738 = vst [vmem:[#allocation27_spill] sm:$0xff] %v4609_v49  ;;  %3801 = vmatmul.msk.bf16.gmra.mxu2 %vm231_vm0, %v199_v60 }
 0x160   :  { %7746 = vst [vmem:[#allocation35_spill] sm:$0xff] %v4691_v22 }
 0x161   :  { %v478_v60 = vpop.f32.mrf.mxu0 }
 0x166   :  { %v4637_v2 = vpop.f32.mrf.mxu1  ;;  %v4698_v24 = vpop.f32.mrf.mxu2 }
 0x167   :  { %7740 = vst [vmem:[#allocation29_spill] sm:$0xff] %v4637_v2 }
 0x168   :  { %7748 = vst [vmem:[#allocation37_spill] sm:$0xff] %v4698_v24 }
 0x169   :  { %1043 = vmatmul.bf16.gmra.mxu1 %v886_v41  ;;  %v131_v41 = vld [vmem:[%s7627_s0 + $0x368] sm:$0xff]  ;;  %v480_v45 = vpop.f32.mrf.mxu0 }
 0x16a   :  { %v204_v58 = vpack.c.bf16 %v131_v41, %v130_v15  ;;  %v4680_v15 = vadd.f32 %v4582_v43, %v4411_v36  ;;  %v4683_v41 = vadd.f32 %v470_v54, %v4411_v36 }
 0x16c   :  { %3806 = vmatmul.msk.bf16.gmra.mxu3 %vm231_vm0, %v204_v58  ;;  %v132_v58 = vld [vmem:[%s7627_s0 + $0x370] sm:$0xff]  ;;  %v767_v56 = vmax.f32 %v4680_v15, 0.0  ;;  %v768_v43 = vmax.f32 %v4683_v41, 0.0 }
 0x16e   :  { %v4650_v44 = vpop.f32.mrf.mxu1  ;;  %v888_v7 = vpack.c.bf16 %v768_v43, %v767_v56 }
 0x16f   :  { %7742 = vst [vmem:[#allocation31_spill] sm:$0xff] %v4650_v44  ;;  %v4727_v44 = vadd.f32 %v478_v60, %v4411_v36 }
 0x171   :  { %v483_v32 = vpop.f32.mrf.mxu0 }
 0x176   :  { %v4672_v34 = vpop.f32.mrf.mxu1 }
 0x177   :  { %7743 = vst [vmem:[#allocation32_spill] sm:$0xff] %v4672_v34 }
 0x179   :  { %1048 = vmatmul.bf16.gmra.mxu1 %v887_v18  ;;  %v205_v18 = vpack.c.bf16 %v133_v17, %v132_v58  ;;  %v4706_v58 = vadd.f32 %v475_v37, %v4411_v36  ;;  %v134_v17 = vld [vmem:[%s7627_s0 + $0x380] sm:$0xff]  ;;  %v485_v24 = vpop.f32.mrf.mxu0  ;;  %v4720_v37 = vpop.f32.mrf.mxu2 }
 0x17a   :  { %7750 = vst [vmem:[#allocation39_spill] sm:$0xff] %v4720_v37 }
 0x17b   :  { %v770_v43 = vmax.f32 %v4706_v58, 0.0 }
 0x17c   :  { %3807 = vmatmul.msk.bf16.gmra.mxu3 %vm231_vm0, %v205_v18  ;;  %v135_v18 = vld [vmem:[%s7627_s0 + $0x388] sm:$0xff] }
 0x17e   :  { %v4676_v55 = vpop.f32.mrf.mxu1 }
 0x17f   :  { %7745 = vst [vmem:[#allocation34_spill] sm:$0xff] %v4676_v55  ;;  %v4703_v55 = vadd.f32 %v473_v3, %v4411_v36  ;;  %v3998_v3 = vld [vmem:[%s7628_s2 + $0xa0] sm:$0xff] }
 0x180   :  { %2443 = vmatpush.bf16.msrb.mxu3 %v3998_v3 }
 0x181   :  { %v769_v56 = vmax.f32 %v4703_v55, 0.0  ;;  %v4736_v37 = vpop.f32.mrf.mxu2 }
 0x182   :  { %7751 = vst [vmem:[#allocation40_spill] sm:$0xff] %v4736_v37 }
 0x186   :  { %v4696_v54 = vpop.f32.mrf.mxu1 }
 0x187   :  { %7747 = vst [vmem:[#allocation36_spill] sm:$0xff] %v4696_v54  ;;  %v4723_v54 = vperm.slane %v4400_v31, 1 }
 0x189   :  { %1053 = vmatmul.bf16.gmra.mxu1 %v888_v7  ;;  %v206_v7 = vpack.c.bf16 %v135_v18, %v134_v17  ;;  %v488_v18 = vpop.f32.mrf.mxu0  ;;  %v4752_v20 = vpop.f32.mrf.mxu2 }
 0x18a   :  { %7752 = vst [vmem:[#allocation41_spill] sm:$0xff] %v4752_v20  ;;  %v4798_v12 = vadd.f32 %v488_v18, %v4411_v36 }
 0x18c   :  { %3808 = vmatmul.msk.bf16.gmra.mxu3 %vm231_vm0, %v206_v7  ;;  %v4733_v7 = vadd.f32 %v480_v45, %v4411_v36 }
 0x18e   :  { %v4700_v34 = vpop.f32.mrf.mxu1 }
 0x18f   :  { %7749 = vst [vmem:[#allocation38_spill] sm:$0xff] %v4700_v34  ;;  %v889_v34 = vpack.c.bf16 %v770_v43, %v769_v56  ;;  %v771_v56 = vmax.f32 %v4727_v44, 0.0 }
 0x191   :  { %v490_v47 = vpop.f32.mrf.mxu0 }
 0x196   :  { %v1019_v22 = vpop.f32.mrf.mxu1 }
 0x197   :  { %v1020_v17 = vadd.f32 %v1019_v22, %v4723_v54  ;;  %v137_v22 = vld [vmem:[%s7627_s0 + $0x398] sm:$0xff] }
 0x199   :  { %1058 = vmatmul.bf16.gmra.mxu1 %v889_v34  ;;  %v4730_v8 = vadd.f32 %v1020_v17, %v4416_v39  ;;  %v136_v34 = vld [vmem:[%s7627_s0 + $0x390] sm:$0xff] }
 0x19a   :  { %v207_v39 = vpack.c.bf16 %v137_v22, %v136_v34  ;;  %v4759_v22 = vadd.f32 %v483_v32, %v4411_v36  ;;  %v493_v32 = vpop.f32.mrf.mxu0 }
 0x19b   :  { %v1467_v45 = vmax.f32 %v4730_v8, 0.0 }
 0x19c   :  { %3809 = vmatmul.msk.bf16.gmra.mxu3 %vm231_vm0, %v207_v39 }
 0x19e   :  { %v1021_v2 = vpop.f32.mrf.mxu1 }
 0x19f   :  { %v1022_v3 = vadd.f32 %v1021_v2, %v4723_v54  ;;  %v772_v2 = vmax.f32 %v4733_v7, 0.0 }
 0x1a1   :  { %v4745_v60 = vadd.f32 %v1022_v3, %v4419_v40  ;;  %v890_v49 = vpack.c.bf16 %v772_v2, %v771_v56  ;;  %v3997_v3 = vld [vmem:[%s7628_s2 + $0x98] sm:$0xff]  ;;  %v4765_v56 = vadd.f32 %v485_v24, %v4411_v36 }
 0x1a2   :  { %2444 = vmatpush.bf16.msrb.mxu3 %v3997_v3  ;;  %v4781_v3 = vpop.f32.mrf.mxu2  ;;  %v495_v53 = vpop.f32.mrf.mxu0 }
 0x1a3   :  { %v1468_v43 = vmax.f32 %v4745_v60, 0.0  ;;  %7753 = vst [vmem:[#allocation42_spill] sm:$0xff] %v4781_v3 }
 0x1a5   :  { %v1595_v17 = vpack.c.bf16 %v1468_v43, %v1467_v45  ;;  %v139_v45 = vld [vmem:[%s7627_s0 + $0x3a8] sm:$0xff] }
 0x1a6   :  { %v1024_v37 = vpop.f32.mrf.mxu1 }
 0x1a7   :  { %1733 = vmatmul.bf16.vlgmr.msrb.gmra.mxu2 %v1595_v17  ;;  %v1025_v40 = vadd.f32 %v1024_v37, %v4723_v54  ;;  %v138_v37 = vld [vmem:[%s7627_s0 + $0x3a0] sm:$0xff]  ;;  %v774_v17 = vmax.f32 %v4765_v56, 0.0 }
 0x1a8   :  { %v208_v43 = vpack.c.bf16 %v139_v45, %v138_v37  ;;  %v4790_v37 = vpop.f32.mrf.mxu3 }
 0x1a9   :  { %1063 = vmatmul.bf16.gmra.mxu1 %v890_v49  ;;  %v4762_v39 = vadd.f32 %v1025_v40, %v4448_v62  ;;  %v773_v62 = vmax.f32 %v4759_v22, 0.0  ;;  %7754 = vst [vmem:[#allocation43_spill] sm:$0xff] %v4790_v37 }
 0x1aa   :  { %v4793_v3 = vpop.f32.mrf.mxu2 }
 0x1ab   :  { %v1469_v24 = vmax.f32 %v4762_v39, 0.0  ;;  %v891_v45 = vpack.c.bf16 %v774_v17, %v773_v62  ;;  %7755 = vst [vmem:[#allocation44_spill] sm:$0xff] %v4793_v3  ;;  %v140_v17 = vld [vmem:[%s7627_s0 + $0x3b0] sm:$0xff] }
 0x1ac   :  { %3810 = vmatmul.msk.bf16.gmra.mxu3 %vm231_vm0, %v208_v43 }
 0x1ae   :  { %v1026_v34 = vpop.f32.mrf.mxu1 }
 0x1af   :  { %v1027_v49 = vadd.f32 %v1026_v34, %v4723_v54  ;;  %v4787_v34 = vld [vmem:[%s7630_s3 + $0x38] sm:$0xff] }
 0x1b0   :  { %3154 = vmatpush.bf16.msrb.mxu0 %v4787_v34  ;;  %v4795_v9 = vpop.f32.mrf.mxu3 }
 0x1b1   :  { %v4775_v2 = vadd.f32 %v1027_v49, %v4451_v0  ;;  %7756 = vst [vmem:[#allocation45_spill] sm:$0xff] %v4795_v9  ;;  %v498_v9 = vpop.f32.mrf.mxu0 }
 0x1b3   :  { %v1470_v40 = vmax.f32 %v4775_v2, 0.0 }
 0x1b5   :  { %v1596_v0 = vpack.c.bf16 %v1470_v40, %v1469_v24  ;;  %v4804_v40 = vadd.f32 %v490_v47, %v4411_v36 }
 0x1b6   :  { %v1029_v49 = vpop.f32.mrf.mxu1 }
 0x1b7   :  { %1738 = vmatmul.bf16.gmra.mxu2 %v1596_v0  ;;  %v1030_v20 = vadd.f32 %v1029_v49, %v4723_v54  ;;  %v141_v0 = vld [vmem:[%s7627_s0 + $0x3b8] sm:$0xff]  ;;  %v776_v47 = vmax.f32 %v4804_v40, 0.0 }
 0x1b8   :  { %v209_v18 = vpack.c.bf16 %v141_v0, %v140_v17  ;;  %v4821_v3 = vpop.f32.mrf.mxu3  ;;  %v3996_v17 = vld [vmem:[%s7628_s2 + $0x90] sm:$0xff] }
 0x1b9   :  { %1068 = vmatmul.bf16.gmra.mxu1 %v891_v45  ;;  %v4801_v24 = vadd.f32 %v1030_v20, %v4484_v26  ;;  %v775_v26 = vmax.f32 %v4798_v12, 0.0  ;;  %7757 = vst [vmem:[#allocation46_spill] sm:$0xff] %v4821_v3  ;;  %2445 = vmatpush.bf16.msrb.mxu3 %v3996_v17 }
 0x1bb   :  { %v1471_v20 = vmax.f32 %v4801_v24, 0.0  ;;  %v892_v25 = vpack.c.bf16 %v776_v47, %v775_v26  ;;  %v4838_v26 = vadd.f32 %v495_v53, %v4411_v36  ;;  %v142_v47 = vld [vmem:[%s7627_s0 + $0x3c0] sm:$0xff] }
 0x1bc   :  { %3811 = vmatmul.msk.bf16.gmra.mxu3 %vm231_vm0, %v209_v18  ;;  %v4832_v18 = vadd.f32 %v493_v32, %v4411_v36 }
 0x1bd   :  { %v778_v17 = vmax.f32 %v4838_v26, 0.0 }
 0x1be   :  { %v1031_v43 = vpop.f32.mrf.mxu1  ;;  %v777_v53 = vmax.f32 %v4832_v18, 0.0 }
 0x1bf   :  { %v1032_v62 = vadd.f32 %v1031_v43, %v4723_v54 }
 0x1c0   :  { %v4829_v52 = vpop.f32.mrf.mxu3 }
 0x1c1   :  { %v4814_v49 = vadd.f32 %v1032_v62, %v4487_v28  ;;  %v4823_v28 = vpop.f32.mrf.mxu2  ;;  %7759 = vst [vmem:[#allocation48_spill] sm:$0xff] %v4829_v52 }
 0x1c2   :  { %7758 = vst [vmem:[#allocation47_spill] sm:$0xff] %v4823_v28 }
 0x1c3   :  { %v1472_v45 = vmax.f32 %v4814_v49, 0.0 }
 0x1c5   :  { %v1597_v43 = vpack.c.bf16 %v1472_v45, %v1471_v20  ;;  %v143_v45 = vld [vmem:[%s7627_s0 + $0x3c8] sm:$0xff] }
 0x1c6   :  { %v1034_v37 = vpop.f32.mrf.mxu1 }
 0x1c7   :  { %1743 = vmatmul.bf16.gmra.mxu2 %v1597_v43  ;;  %v1035_v62 = vadd.f32 %v1034_v37, %v4723_v54  ;;  %v500_v37 = vpop.f32.mrf.mxu0 }
 0x1c8   :  { %v4857_v28 = vpop.f32.mrf.mxu3 }
 0x1c9   :  { %1073 = vmatmul.bf16.gmra.mxu1 %v892_v25  ;;  %v4835_v20 = vadd.f32 %v1035_v62, %v4527_v13  ;;  %v4850_v43 = vpop.f32.mrf.mxu2  ;;  %v210_v13 = vpack.c.bf16 %v143_v45, %v142_v47  ;;  %7761 = vst [vmem:[#allocation50_spill] sm:$0xff] %v4857_v28 }
 0x1ca   :  { %7760 = vst [vmem:[#allocation49_spill] sm:$0xff] %v4850_v43  ;;  %v4865_v43 = vld [vmem:[%s7630_s3 + $0x30] sm:$0xff] }
 0x1cb   :  { %v1473_v62 = vmax.f32 %v4835_v20, 0.0  ;;  %3155 = vmatpush.bf16.msrb.mxu0 %v4865_v43 }
 0x1cc   :  { %3812 = vmatmul.msk.bf16.gmra.mxu3 %vm231_vm0, %v210_v13 }
 0x1ce   :  { %v1036_v0 = vpop.f32.mrf.mxu1 }
 0x1cf   :  { %v1037_v25 = vadd.f32 %v1036_v0, %v4723_v54 }
 0x1d1   :  { %v4848_v32 = vadd.f32 %v1037_v25, %v4530_v14  ;;  %v893_v14 = vpack.c.bf16 %v778_v17, %v777_v53  ;;  %v503_v25 = vpop.f32.mrf.mxu0  ;;  %v4860_v45 = vpop.f32.mrf.mxu2  ;;  %v144_v17 = vld [vmem:[%s7627_s0 + $0x3d0] sm:$0xff] }
 0x1d2   :  { %7762 = vst [vmem:[#allocation51_spill] sm:$0xff] %v4860_v45  ;;  %v3995_v45 = vld [vmem:[%s7628_s2 + $0x88] sm:$0xff] }
 0x1d3   :  { %v1474_v0 = vmax.f32 %v4848_v32, 0.0  ;;  %2446 = vmatpush.bf16.msrb.mxu3 %v3995_v45 }
 0x1d5   :  { %v1598_v52 = vpack.c.bf16 %v1474_v0, %v1473_v62  ;;  %v4868_v62 = vpop.f32.mrf.mxu3  ;;  %v4871_v0 = vadd.f32 %v498_v9, %v4411_v36 }
 0x1d6   :  { %v1039_v3 = vpop.f32.mrf.mxu1  ;;  %7763 = vst [vmem:[#allocation52_spill] sm:$0xff] %v4868_v62 }
 0x1d7   :  { %1748 = vmatmul.bf16.gmra.mxu2 %v1598_v52  ;;  %v1040_v47 = vadd.f32 %v1039_v3, %v4723_v54  ;;  %v4877_v3 = vadd.f32 %v500_v37, %v4411_v36 }
 0x1d9   :  { %1078 = vmatmul.bf16.gmra.mxu1 %v893_v14  ;;  %v4874_v52 = vadd.f32 %v1040_v47, %v4570_v21  ;;  %v145_v14 = vld [vmem:[%s7627_s0 + $0x3d8] sm:$0xff]  ;;  %v779_v21 = vmax.f32 %v4871_v0, 0.0  ;;  %v780_v37 = vmax.f32 %v4877_v3, 0.0  ;;  %v505_v28 = vpop.f32.mrf.mxu0  ;;  %v4897_v27 = vpop.f32.mrf.mxu2 }
 0x1da   :  { %v211_v9 = vpack.c.bf16 %v145_v14, %v144_v17  ;;  %7764 = vst [vmem:[#allocation53_spill] sm:$0xff] %v4897_v27  ;;  %v4911_v45 = vadd.f32 %v505_v28, %v4411_v36 }
 0x1db   :  { %v1475_v47 = vmax.f32 %v4874_v52, 0.0  ;;  %v894_v17 = vpack.c.bf16 %v780_v37, %v779_v21  ;;  %v146_v21 = vld [vmem:[%s7627_s0 + $0x3e0] sm:$0xff]  ;;  %v147_v37 = vld [vmem:[%s7627_s0 + $0x3e8] sm:$0xff] }
 0x1dc   :  { %3813 = vmatmul.msk.bf16.gmra.mxu3 %vm231_vm0, %v211_v9  ;;  %v4905_v9 = vadd.f32 %v503_v25, %v4411_v36 }
 0x1de   :  { %v1041_v13 = vpop.f32.mrf.mxu1 }
 0x1df   :  { %v1042_v53 = vadd.f32 %v1041_v13, %v4723_v54 }
 0x1e1   :  { %v4887_v62 = vadd.f32 %v1042_v53, %v4573_v33  ;;  %v4899_v53 = vpop.f32.mrf.mxu3  ;;  %v508_v38 = vpop.f32.mrf.mxu0 }
 0x1e2   :  { %7765 = vst [vmem:[#allocation54_spill] sm:$0xff] %v4899_v53 }
 0x1e3   :  { %v1476_v13 = vmax.f32 %v4887_v62, 0.0 }
 0x1e5   :  { %v1599_v61 = vpack.c.bf16 %v1476_v13, %v1475_v47 }
 0x1e6   :  { %v1044_v33 = vpop.f32.mrf.mxu1 }
 0x1e7   :  { %1753 = vmatmul.bf16.gmra.mxu2 %v1599_v61  ;;  %v1045_v14 = vadd.f32 %v1044_v33, %v4723_v54  ;;  %v4914_v61 = vpop.f32.mrf.mxu2  ;;  %v781_v33 = vmax.f32 %v4905_v9, 0.0 }
 0x1e8   :  { %7767 = vst [vmem:[#allocation56_spill] sm:$0xff] %v4914_v61 }
 0x1e9   :  { %1083 = vmatmul.bf16.gmra.mxu1 %v894_v17  ;;  %v4902_v16 = vpop.f32.mrf.mxu3  ;;  %v4908_v47 = vadd.f32 %v1045_v14, %v4613_v50  ;;  %v212_v50 = vpack.c.bf16 %v147_v37, %v146_v21  ;;  %v510_v61 = vpop.f32.mrf.mxu0  ;;  %v4007_v21 = vld [vmem:[%s7630_s3 + $0x28] sm:$0xff] }
 0x1ea   :  { %7766 = vst [vmem:[#allocation55_spill] sm:$0xff] %v4902_v16  ;;  %3156 = vmatpush.bf16.msrb.mxu0 %v4007_v21 }
 0x1eb   :  { %v1477_v28 = vmax.f32 %v4908_v47, 0.0 }
 0x1ec   :  { %3814 = vmatmul.msk.bf16.gmra.mxu3 %vm231_vm0, %v212_v50  ;;  %v4939_v50 = vadd.f32 %v508_v38, %v4411_v36 }
 0x1ee   :  { %v1046_v10 = vpop.f32.mrf.mxu1 }
 0x1ef   :  { %v1047_v13 = vadd.f32 %v1046_v10, %v4723_v54  ;;  %v782_v10 = vmax.f32 %v4911_v45, 0.0 }
 0x1f1   :  { %v4923_v25 = vadd.f32 %v1047_v13, %v4616_v5  ;;  %v895_v53 = vpack.c.bf16 %v782_v10, %v781_v33  ;;  %v4930_v27 = vpop.f32.mrf.mxu3  ;;  %v4932_v5 = vpop.f32.mrf.mxu2  ;;  %v4945_v33 = vadd.f32 %v510_v61, %v4411_v36  ;;  %v149_v10 = vld [vmem:[%s7627_s0 + $0x3f8] sm:$0xff]  ;;  %v783_v61 = vmax.f32 %v4939_v50, 0.0 }
 0x1f2   :  { %7768 = vst [vmem:[#allocation57_spill] sm:$0xff] %v4930_v27 }
 0x1f3   :  { %v1478_v17 = vmax.f32 %v4923_v25, 0.0  ;;  %7769 = vst [vmem:[#allocation58_spill] sm:$0xff] %v4932_v5  ;;  %v3994_v5 = vld [vmem:[%s7628_s2 + $0x80] sm:$0xff] }
 0x1f4   :  { %7771 = vst [vmem:[#allocation60_spill] sm:$0xff] %v4945_v33  ;;  %2447 = vmatpush.bf16.msrb.mxu3 %v3994_v5 }
 0x1f5   :  { %v1600_v14 = vpack.c.bf16 %v1478_v17, %v1477_v28 }
 0x1f6   :  { %v1049_v16 = vpop.f32.mrf.mxu1 }
 0x1f7   :  { %1758 = vmatmul.bf16.gmra.mxu2 %v1600_v14  ;;  %v1050_v13 = vadd.f32 %v1049_v16, %v4723_v54  ;;  %v148_v16 = vld [vmem:[%s7627_s0 + $0x3f0] sm:$0xff]  ;;  %v513_v14 = vpop.f32.mrf.mxu0 }
 0x1f8   :  { %v213_v38 = vpack.c.bf16 %v149_v10, %v148_v16  ;;  %4016 = vmatpush.bf16.msra.mxu3 %v4787_v34 }
 0x1f9   :  { %1088 = vmatmul.bf16.gmra.mxu1 %v895_v53  ;;  %v4942_v28 = vadd.f32 %v1050_v13, %v4654_v29  ;;  %v4957_v29 = vpop.f32.mrf.mxu3 }
 0x1fa   :  { %7773 = vst [vmem:[#allocation62_spill] sm:$0xff] %v4957_v29 }
 0x1fb   :  { %7770 = vst [vmem:[#allocation59_spill] sm:$0xff] %v4942_v28  ;;  %v1479_v13 = vmax.f32 %v4942_v28, 0.0 }
 0x1fc   :  { %3815 = vmatmul.msk.bf16.gmra.mxu3 %vm231_vm0, %v213_v38 }
 0x1fd   :  { %4017 = vmatpush.bf16.msra.mxu3 %v4865_v43 }
 0x1fe   :  { %v1051_v37 = vpop.f32.mrf.mxu1 }
 0x1ff   :  { %v1052_v53 = vadd.f32 %v1051_v37, %v4723_v54  ;;  %v784_v37 = vmax.f32 %v4945_v33, 0.0 }
 0x201   :  { %v4955_v17 = vadd.f32 %v1052_v53, %v4657_v4  ;;  %v4967_v4 = vpop.f32.mrf.mxu2  ;;  %v896_v10 = vpack.c.bf16 %v784_v37, %v783_v61  ;;  %v4972_v28 = vpop.f32.mrf.mxu3  ;;  %4018 = vmatpush.bf16.msra.mxu3 %v4007_v21 }
 0x202   :  { %7774 = vst [vmem:[#allocation63_spill] sm:$0xff] %v4967_v4 }
 0x203   :  { %7772 = vst [vmem:[#allocation61_spill] sm:$0xff] %v4955_v17  ;;  %v1480_v27 = vmax.f32 %v4955_v17, 0.0  ;;  %v515_v17 = vpop.f32.mrf.mxu0 }
 0x204   :  { %7775 = vst [vmem:[#allocation64_spill] sm:$0xff] %v4972_v28  ;;  %v4983_v34 = vadd.f32 %v515_v17, %v4411_v36  ;;  %v5032_v28 = vadd.f32 %v4206_v63, %v4411_v36 }
 0x205   :  { %v1601_v53 = vpack.c.bf16 %v1480_v27, %v1479_v13  ;;  %v4977_v27 = vadd.f32 %v513_v14, %v4411_v36 }
 0x206   :  { %v1054_v16 = vpop.f32.mrf.mxu1  ;;  %v786_v21 = vmax.f32 %v4983_v34, 0.0 }
 0x207   :  { %1763 = vmatmul.bf16.gmra.mxu2 %v1601_v53  ;;  %v1055_v29 = vadd.f32 %v1054_v16, %v4723_v54  ;;  %v785_v13 = vmax.f32 %v4977_v27, 0.0 }
 0x209   :  { %1093 = vmatmul.bf16.gmra.mxu1 %v896_v10  ;;  %v4974_v33 = vpop.f32.mrf.mxu2  ;;  %v4980_v5 = vadd.f32 %v1055_v29, %v4680_v15  ;;  %v4993_v15 = vpop.f32.mrf.mxu3  ;;  %v897_v17 = vpack.c.bf16 %v786_v21, %v785_v13  ;;  %v5013_v21 = vadd.f32 %v4166_v46, %v4411_v36 }
 0x20a   :  { %7776 = vst [vmem:[#allocation65_spill] sm:$0xff] %v4974_v33 }
 0x20b   :  { %v1481_v37 = vmax.f32 %v4980_v5, 0.0  ;;  %7777 = vst [vmem:[#allocation66_spill] sm:$0xff] %v4993_v15 }
 0x20e   :  { %v1056_v38 = vpop.f32.mrf.mxu1 }
 0x20f   :  { %v1057_v43 = vadd.f32 %v1056_v38, %v4723_v54  ;;  %v5000_v38 = vadd.f32 %v4178_v51, %v4411_v36 }
 0x211   :  { %v4987_v61 = vadd.f32 %v1057_v43, %v4683_v41  ;;  %v4995_v29 = vpop.f32.mrf.mxu2  ;;  %v5009_v13 = vpop.f32.mrf.mxu3 }
 0x212   :  { %7778 = vst [vmem:[#allocation67_spill] sm:$0xff] %v4995_v29 }
 0x213   :  { %v1482_v14 = vmax.f32 %v4987_v61, 0.0  ;;  %7779 = vst [vmem:[#allocation68_spill] sm:$0xff] %v5009_v13 }
 0x215   :  { %v1602_v53 = vpack.c.bf16 %v1482_v14, %v1481_v37  ;;  %v4006_v14 = vld [vmem:[%s7630_s3 + $0x20] sm:$0xff] }
 0x216   :  { %v1059_v16 = vpop.f32.mrf.mxu1  ;;  %3157 = vmatpush.bf16.msrb.mxu0 %v4006_v14  ;;  %4019 = vmatpush.bf16.msra.mxu3 %v4006_v14  ;;  %v5028_v14 = vperm.slane %v4400_v31, 2  ;;  %v790_v31 = vmax.f32 %v5032_v28, 0.0 }
 0x217   :  { %1768 = vmatmul.bf16.gmra.mxu2 %v1602_v53  ;;  %v1060_v41 = vadd.f32 %v1059_v16, %v4723_v54 }
 0x219   :  { %1098 = vmatmul.bf16.gmra.mxu1 %v897_v17  ;;  %v5003_v43 = vadd.f32 %v1060_v41, %v4703_v55  ;;  %v5018_v51 = vpop.f32.mrf.mxu2  ;;  %v788_v55 = vmax.f32 %v5000_v38, 0.0  ;;  %v787_v41 = vmax.f32 %v5013_v21, 0.0 }
 0x21a   :  { %7780 = vst [vmem:[#allocation69_spill] sm:$0xff] %v5018_v51 }
 0x21b   :  { %v1483_v16 = vmax.f32 %v5003_v43, 0.0  ;;  %v898_v46 = vpack.c.bf16 %v788_v55, %v787_v41 }
 0x21e   :  { %v1061_v10 = vpop.f32.mrf.mxu1 }
 0x21f   :  { %v1062_v37 = vadd.f32 %v1061_v10, %v4723_v54 }
 0x221   :  { %v5016_v53 = vadd.f32 %v1062_v37, %v4706_v58  ;;  %v5024_v58 = vpop.f32.mrf.mxu3 }
 0x222   :  { %7781 = vst [vmem:[#allocation70_spill] sm:$0xff] %v5024_v58 }
 0x223   :  { %v1484_v17 = vmax.f32 %v5016_v53, 0.0 }
 0x225   :  { %v1603_v10 = vpack.c.bf16 %v1484_v17, %v1483_v16  ;;  %v5041_v17 = vadd.f32 %v4197_v59, %v4411_v36 }
 0x226   :  { %v1064_v13 = vpop.f32.mrf.mxu1 }
 0x227   :  { %1773 = vmatmul.bf16.gmra.mxu2 %v1603_v10  ;;  %v1065_v37 = vadd.f32 %v1064_v13, %v4723_v54  ;;  %v789_v59 = vmax.f32 %v5041_v17, 0.0 }
 0x229   :  { %1103 = vmatmul.bf16.gmra.mxu1 %v898_v46  ;;  %v5035_v29 = vadd.f32 %v1065_v37, %v4727_v44 }
 0x22a   :  { %v1734_v15 = vpop.f32.mrf.mxu2 }
 0x22b   :  { %v1735_v16 = vadd.f32 %v1734_v15, %v5028_v14  ;;  %v1485_v63 = vmax.f32 %v5035_v29, 0.0 }
 0x22d   :  { %v5049_v10 = vadd.f32 %v1735_v16, %v4730_v8  ;;  %v899_v8 = vpack.c.bf16 %v790_v31, %v789_v59  ;;  %v5078_v59 = vadd.f32 %v4222_v6, %v4411_v36 }
 0x22e   :  { %v1066_v51 = vpop.f32.mrf.mxu1 }
 0x22f   :  { %v1067_v55 = vadd.f32 %v1066_v51, %v4723_v54  ;;  %v5053_v51 = vpop.f32.mrf.mxu3  ;;  %v791_v6 = vmax.f32 %v5078_v59, 0.0 }
 0x230   :  { %7782 = vst [vmem:[#allocation71_spill] sm:$0xff] %v5053_v51  ;;  %v5064_v51 = vadd.f32 %v4234_v11, %v4411_v36 }
 0x231   :  { %v5044_v13 = vadd.f32 %v1067_v55, %v4733_v7  ;;  %v2182_v55 = vmax.f32 %v5049_v10, 0.0 }
 0x232   :  { %v1736_v41 = vpop.f32.mrf.mxu2 }
 0x233   :  { %v1486_v44 = vmax.f32 %v5044_v13, 0.0  ;;  %v1737_v15 = vadd.f32 %v1736_v41, %v5028_v14 }
 0x235   :  { %v5057_v46 = vadd.f32 %v1737_v15, %v4745_v60  ;;  %v1604_v7 = vpack.c.bf16 %v1486_v44, %v1485_v63 }
 0x236   :  { %v1069_v37 = vpop.f32.mrf.mxu1 }
 0x237   :  { %v2183_v58 = vmax.f32 %v5057_v46, 0.0  ;;  %1778 = vmatmul.bf16.gmra.mxu2 %v1604_v7  ;;  %v1070_v41 = vadd.f32 %v1069_v37, %v4723_v54  ;;  %v5066_v15 = vpop.f32.mrf.mxu3 }
 0x238   :  { %7783 = vst [vmem:[#allocation72_spill] sm:$0xff] %v5066_v15 }
 0x239   :  { %1108 = vmatmul.bf16.gmra.mxu1 %v899_v8  ;;  %v2310_v16 = vpack.c.bf16 %v2183_v58, %v2182_v55  ;;  %v5069_v63 = vadd.f32 %v1070_v41, %v4759_v22  ;;  %v4005_v58 = vld [vmem:[%s7630_s3 + $0x18] sm:$0xff]  ;;  %v792_v22 = vmax.f32 %v5064_v51, 0.0 }
 0x23a   :  { %v1739_v33 = vpop.f32.mrf.mxu2  ;;  %3158 = vmatpush.bf16.msrb.mxu0 %v4005_v58  ;;  %4020 = vmatpush.bf16.msra.mxu3 %v4005_v58 }
 0x23b   :  { %2448 = vmatmul.bf16.vlgmr.msrb.gmra.mxu3 %v2310_v16  ;;  %v1740_v44 = vadd.f32 %v1739_v33, %v5028_v14  ;;  %v1487_v33 = vmax.f32 %v5069_v63, 0.0  ;;  %v900_v58 = vpack.c.bf16 %v792_v22, %v791_v6  ;;  %v5110_v6 = vadd.f32 %v4253_v19, %v4411_v36 }
 0x23d   :  { %v5086_v37 = vadd.f32 %v1740_v44, %v4762_v39  ;;  %v793_v19 = vmax.f32 %v5110_v6, 0.0 }
 0x23e   :  { %v1071_v60 = vpop.f32.mrf.mxu1 }
 0x23f   :  { %v1072_v31 = vadd.f32 %v1071_v60, %v4723_v54  ;;  %v2184_v60 = vmax.f32 %v5086_v37, 0.0  ;;  %v5096_v15 = vpop.f32.mrf.mxu3 }
 0x240   :  { %7784 = vst [vmem:[#allocation73_spill] sm:$0xff] %v5096_v15 }
 0x241   :  { %v5081_v11 = vadd.f32 %v1072_v31, %v4765_v56 }
 0x242   :  { %v1741_v7 = vpop.f32.mrf.mxu2 }
 0x243   :  { %v1488_v55 = vmax.f32 %v5081_v11, 0.0  ;;  %v1742_v8 = vadd.f32 %v1741_v7, %v5028_v14 }
 0x245   :  { %v5092_v16 = vadd.f32 %v1742_v8, %v4775_v2  ;;  %v1605_v56 = vpack.c.bf16 %v1488_v55, %v1487_v33  ;;  %v5101_v2 = vadd.f32 %v4262_v23, %v4411_v36 }
 0x246   :  { %v1074_v41 = vpop.f32.mrf.mxu1 }
 0x247   :  { %v2185_v31 = vmax.f32 %v5092_v16, 0.0  ;;  %1783 = vmatmul.bf16.gmra.mxu2 %v1605_v56  ;;  %v1075_v7 = vadd.f32 %v1074_v41, %v4723_v54  ;;  %v794_v41 = vmax.f32 %v5101_v2, 0.0  ;;  %v5116_v23 = vpop.f32.mrf.mxu3 }
 0x248   :  { %7785 = vst [vmem:[#allocation74_spill] sm:$0xff] %v5116_v23 }
 0x249   :  { %1113 = vmatmul.bf16.gmra.mxu1 %v900_v58  ;;  %v2311_v39 = vpack.c.bf16 %v2185_v31, %v2184_v60  ;;  %v5104_v55 = vadd.f32 %v1075_v7, %v4798_v12  ;;  %v901_v23 = vpack.c.bf16 %v794_v41, %v793_v19 }
 0x24a   :  { %v1744_v44 = vpop.f32.mrf.mxu2 }
 0x24b   :  { %2453 = vmatmul.bf16.gmra.mxu3 %v2311_v39  ;;  %v1745_v8 = vadd.f32 %v1744_v44, %v5028_v14  ;;  %v1489_v31 = vmax.f32 %v5104_v55, 0.0 }
 0x24d   :  { %v5120_v12 = vadd.f32 %v1745_v8, %v4801_v24 }
 0x24e   :  { %v1076_v33 = vpop.f32.mrf.mxu1 }
 0x24f   :  { %v1077_v22 = vadd.f32 %v1076_v33, %v4723_v54  ;;  %v2186_v33 = vmax.f32 %v5120_v12, 0.0 }
 0x251   :  { %v5113_v56 = vadd.f32 %v1077_v22, %v4804_v40 }
 0x252   :  { %v1746_v60 = vpop.f32.mrf.mxu2 }
 0x253   :  { %v1490_v58 = vmax.f32 %v5113_v56, 0.0  ;;  %v1747_v39 = vadd.f32 %v1746_v60, %v5028_v14  ;;  %v5131_v60 = vpop.f32.mrf.mxu3 }
 0x254   :  { %7786 = vst [vmem:[#allocation75_spill] sm:$0xff] %v5131_v60 }
 0x255   :  { %v5126_v44 = vadd.f32 %v1747_v39, %v4814_v49  ;;  %v1606_v40 = vpack.c.bf16 %v1490_v58, %v1489_v31  ;;  %v5135_v49 = vadd.f32 %v4290_v35, %v4411_v36 }
 0x256   :  { %v1079_v7 = vpop.f32.mrf.mxu1 }
 0x257   :  { %v2187_v22 = vmax.f32 %v5126_v44, 0.0  ;;  %1788 = vmatmul.bf16.gmra.mxu2 %v1606_v40  ;;  %v1080_v15 = vadd.f32 %v1079_v7, %v4723_v54  ;;  %v796_v40 = vmax.f32 %v5135_v49, 0.0 }
 0x259   :  { %1118 = vmatmul.bf16.gmra.mxu1 %v901_v23  ;;  %v2312_v24 = vpack.c.bf16 %v2187_v22, %v2186_v33  ;;  %v5138_v58 = vadd.f32 %v1080_v15, %v4832_v18  ;;  %v5144_v23 = vadd.f32 %v4278_v30, %v4411_v36  ;;  %v4004_v30 = vld [vmem:[%s7630_s3 + $0x10] sm:$0xff] }
 0x25a   :  { %v1749_v8 = vpop.f32.mrf.mxu2  ;;  %3159 = vmatpush.bf16.msrb.mxu0 %v4004_v30  ;;  %4021 = vmatpush.bf16.msra.mxu3 %v4004_v30 }
 0x25b   :  { %2458 = vmatmul.bf16.gmra.mxu3 %v2312_v24  ;;  %v1750_v39 = vadd.f32 %v1749_v8, %v5028_v14  ;;  %v1491_v35 = vmax.f32 %v5138_v58, 0.0  ;;  %v795_v22 = vmax.f32 %v5144_v23, 0.0 }
 0x25d   :  { %v5152_v33 = vadd.f32 %v1750_v39, %v4835_v20 }
 0x25e   :  { %v1081_v31 = vpop.f32.mrf.mxu1 }
 0x25f   :  { %v1082_v41 = vadd.f32 %v1081_v31, %v4723_v54  ;;  %v5163_v31 = vpop.f32.mrf.mxu3  ;;  %v2188_v20 = vmax.f32 %v5152_v33, 0.0 }
 0x260   :  { %7787 = vst [vmem:[#allocation76_spill] sm:$0xff] %v5163_v31  ;;  %v7793_v31 = vld [vmem:[#allocation3_spill] sm:$0xff] }
 0x261   :  { %v5147_v19 = vadd.f32 %v1082_v41, %v4838_v26  ;;  %v902_v41 = vpack.c.bf16 %v796_v40, %v795_v22  ;;  %v5181_v40 = vadd.f32 %v4306_v42, %v4411_v36 }
 0x262   :  { %v1751_v7 = vpop.f32.mrf.mxu2 }
 0x263   :  { %v1492_v18 = vmax.f32 %v5147_v19, 0.0  ;;  %v1752_v15 = vadd.f32 %v1751_v7, %v5028_v14 }
 0x265   :  { %v5161_v26 = vadd.f32 %v1752_v15, %v4848_v32  ;;  %v1607_v24 = vpack.c.bf16 %v1492_v18, %v1491_v35  ;;  %v5170_v32 = vadd.f32 %v4318_v48, %v4411_v36 }
 0x266   :  { %v1084_v8 = vpop.f32.mrf.mxu1 }
 0x267   :  { %v2189_v39 = vmax.f32 %v5161_v26, 0.0  ;;  %1793 = vmatmul.bf16.gmra.mxu2 %v1607_v24  ;;  %v1085_v4 = vadd.f32 %v1084_v8, %v4723_v54  ;;  %v5177_v24 = vpop.f32.mrf.mxu3  ;;  %v798_v48 = vmax.f32 %v5170_v32, 0.0 }
 0x268   :  { %7788 = vst [vmem:[#allocation77_spill] sm:$0xff] %v5177_v24 }
 0x269   :  { %1123 = vmatmul.bf16.gmra.mxu1 %v902_v41  ;;  %v2313_v7 = vpack.c.bf16 %v2189_v39, %v2188_v20  ;;  %v5173_v18 = vadd.f32 %v1085_v4, %v4871_v0  ;;  %v797_v39 = vmax.f32 %v5181_v40, 0.0 }
 0x26a   :  { %v1754_v60 = vpop.f32.mrf.mxu2 }
 0x26b   :  { %2463 = vmatmul.bf16.gmra.mxu3 %v2313_v7  ;;  %v1755_v15 = vadd.f32 %v1754_v60, %v5028_v14  ;;  %v1493_v20 = vmax.f32 %v5173_v18, 0.0 }
 0x26d   :  { %v5189_v0 = vadd.f32 %v1755_v15, %v4874_v52 }
 0x26e   :  { %v1086_v35 = vpop.f32.mrf.mxu1 }
 0x26f   :  { %v1087_v30 = vadd.f32 %v1086_v35, %v4723_v54  ;;  %v2190_v7 = vmax.f32 %v5189_v0, 0.0  ;;  %v5199_v24 = vpop.f32.mrf.mxu3 }
 0x270   :  { %7789 = vst [vmem:[#allocation78_spill] sm:$0xff] %v5199_v24 }
 0x271   :  { %v5184_v22 = vadd.f32 %v1087_v30, %v4877_v3  ;;  %v903_v30 = vpack.c.bf16 %v798_v48, %v797_v39  ;;  %v5213_v39 = vadd.f32 %v4334_v57, %v4411_v36  ;;  %v4003_v57 = vld [vmem:[%s7630_s3 + $0x8] sm:$0xff] }
 0x272   :  { %v1756_v8 = vpop.f32.mrf.mxu2  ;;  %3160 = vmatpush.bf16.msrb.mxu0 %v4003_v57  ;;  %4022 = vmatpush.bf16.msra.mxu3 %v4003_v57 }
 0x273   :  { %v1494_v4 = vmax.f32 %v5184_v22, 0.0  ;;  %v1757_v60 = vadd.f32 %v1756_v8, %v5028_v14 }
 0x275   :  { %v5195_v42 = vadd.f32 %v1757_v60, %v4887_v62  ;;  %v1608_v41 = vpack.c.bf16 %v1494_v4, %v1493_v20  ;;  %v5204_v62 = vadd.f32 %v4346_v1, %v4411_v36 }
 0x276   :  { %v1089_v3 = vpop.f32.mrf.mxu1 }
 0x277   :  { %v2191_v35 = vmax.f32 %v5195_v42, 0.0  ;;  %1798 = vmatmul.bf16.gmra.mxu2 %v1608_v41  ;;  %v1090_v8 = vadd.f32 %v1089_v3, %v4723_v54  ;;  %v800_v3 = vmax.f32 %v5204_v62, 0.0 }
 0x279   :  { %1128 = vmatmul.bf16.gmra.mxu1 %v903_v30  ;;  %v2314_v52 = vpack.c.bf16 %v2191_v35, %v2190_v7  ;;  %v5207_v4 = vadd.f32 %v1090_v8, %v4905_v9 }
 0x27a   :  { %v1759_v15 = vpop.f32.mrf.mxu2 }
 0x27b   :  { %2468 = vmatmul.bf16.gmra.mxu3 %v2314_v52  ;;  %v1760_v60 = vadd.f32 %v1759_v15, %v5028_v14  ;;  %v1495_v1 = vmax.f32 %v5207_v4, 0.0  ;;  %v5228_v52 = vpop.f32.mrf.mxu3 }
 0x27c   :  { %7791 = vst [vmem:[#allocation80_spill] sm:$0xff] %v5228_v52 }
 0x27d   :  { %v5221_v35 = vadd.f32 %v1760_v60, %v4908_v47 }
 0x27e   :  { %v1091_v20 = vpop.f32.mrf.mxu1 }
 0x27f   :  { %v1092_v48 = vadd.f32 %v1091_v20, %v4723_v54  ;;  %7790 = vst [vmem:[#allocation79_spill] sm:$0xff] %v5221_v35  ;;  %v2192_v20 = vmax.f32 %v5221_v35, 0.0 }
 0x281   :  { %v5216_v41 = vadd.f32 %v1092_v48, %v4911_v45  ;;  %v799_v45 = vmax.f32 %v5213_v39, 0.0 }
 0x282   :  { %v1761_v7 = vpop.f32.mrf.mxu2 }
 0x283   :  { %v1496_v9 = vmax.f32 %v5216_v41, 0.0  ;;  %v1762_v30 = vadd.f32 %v1761_v7, %v5028_v14  ;;  %v904_v48 = vpack.c.bf16 %v800_v3, %v799_v45  ;;  %v7797_v45 = vld [vmem:[#allocation2_spill] sm:$0xff] }
 0x285   :  { %v5232_v15 = vadd.f32 %v1762_v30, %v4923_v25  ;;  %v1609_v8 = vpack.c.bf16 %v1496_v9, %v1495_v1  ;;  %v5239_v25 = vadd.f32 %v7793_v31, %v4411_v36  ;;  %v5241_v1 = vpop.f32.mrf.mxu3 }
 0x286   :  { %v1094_v47 = vpop.f32.mrf.mxu1  ;;  %7795 = vst [vmem:[#allocation82_spill] sm:$0xff] %v5241_v1 }
 0x287   :  { %7792 = vst [vmem:[#allocation81_spill] sm:$0xff] %v5232_v15  ;;  %v2193_v60 = vmax.f32 %v5232_v15, 0.0  ;;  %1803 = vmatmul.bf16.gmra.mxu2 %v1609_v8  ;;  %v1095_v52 = vadd.f32 %v1094_v47, %v4723_v54  ;;  %v5250_v8 = vadd.f32 %v7797_v45, %v4411_v36  ;;  %v7798_v47 = vld [vmem:[#allocation60_spill] sm:$0xff]  ;;  %v802_v31 = vmax.f32 %v5239_v25, 0.0 }
 0x288   :  { %7794 = vst [vmem:[#allocation3_spill] sm:$0xff] %v5239_v25 }
 0x289   :  { %1133 = vmatmul.bf16.gmra.mxu1 %v904_v48  ;;  %v2315_v7 = vpack.c.bf16 %v2193_v60, %v2192_v20  ;;  %v5244_v30 = vadd.f32 %v1095_v52, %v4939_v50  ;;  %v801_v52 = vmax.f32 %v5250_v8, 0.0 }
 0x28a   :  { %v1764_v24 = vpop.f32.mrf.mxu2 }
 0x28b   :  { %2473 = vmatmul.bf16.gmra.mxu3 %v2315_v7  ;;  %7796 = vst [vmem:[#allocation83_spill] sm:$0xff] %v5244_v30  ;;  %v1765_v57 = vadd.f32 %v1764_v24, %v5028_v14  ;;  %v1497_v48 = vmax.f32 %v5244_v30, 0.0  ;;  %v7800_v7 = vld [vmem:[#allocation59_spill] sm:$0xff]  ;;  %v905_v30 = vpack.c.bf16 %v802_v31, %v801_v52  ;;  %v7804_v31 = vld [vmem:[#allocation5_spill] sm:$0xff] }
 0x28d   :  { %v5258_v1 = vadd.f32 %v1765_v57, %v7800_v7  ;;  %v5268_v35 = vpop.f32.mrf.mxu3 }
 0x28e   :  { %v1096_v9 = vpop.f32.mrf.mxu1  ;;  %7802 = vst [vmem:[#allocation60_spill] sm:$0xff] %v5268_v35 }
 0x28f   :  { %v1097_v3 = vadd.f32 %v1096_v9, %v4723_v54  ;;  %v7801_v9 = vld [vmem:[#allocation61_spill] sm:$0xff] }
 0x291   :  { %v5253_v20 = vadd.f32 %v1097_v3, %v7798_v47  ;;  %v2194_v47 = vmax.f32 %v5258_v1, 0.0 }
 0x292   :  { %v1766_v60 = vpop.f32.mrf.mxu2 }
 0x293   :  { %7799 = vst [vmem:[#allocation2_spill] sm:$0xff] %v5253_v20  ;;  %v1498_v50 = vmax.f32 %v5253_v20, 0.0  ;;  %v1767_v24 = vadd.f32 %v1766_v60, %v5028_v14  ;;  %v7803_v20 = vld [vmem:[#allocation7_spill] sm:$0xff] }
 0x295   :  { %v5264_v45 = vadd.f32 %v1767_v24, %v7801_v9  ;;  %v1610_v15 = vpack.c.bf16 %v1498_v50, %v1497_v48  ;;  %v5273_v24 = vadd.f32 %v7803_v20, %v4411_v36 }
 0x296   :  { %v1099_v3 = vpop.f32.mrf.mxu1 }
 0x297   :  { %v2195_v25 = vmax.f32 %v5264_v45, 0.0  ;;  %1808 = vmatmul.bf16.gmra.mxu2 %v1610_v15  ;;  %v1100_v60 = vadd.f32 %v1099_v3, %v4723_v54  ;;  %v804_v52 = vmax.f32 %v5273_v24, 0.0  ;;  %v5288_v3 = vpop.f32.mrf.mxu3 }
 0x298   :  { %7805 = vst [vmem:[#allocation59_spill] sm:$0xff] %v5288_v3 }
 0x299   :  { %1138 = vmatmul.bf16.gmra.mxu1 %v905_v30  ;;  %v2316_v57 = vpack.c.bf16 %v2195_v25, %v2194_v47  ;;  %v5276_v50 = vadd.f32 %v1100_v60, %v4977_v27  ;;  %v5282_v30 = vadd.f32 %v7804_v31, %v4411_v36 }
 0x29a   :  { %v1769_v7 = vpop.f32.mrf.mxu2 }
 0x29b   :  { %2478 = vmatmul.bf16.gmra.mxu3 %v2316_v57  ;;  %v1770_v9 = vadd.f32 %v1769_v7, %v5028_v14  ;;  %v1499_v47 = vmax.f32 %v5276_v50, 0.0  ;;  %v803_v60 = vmax.f32 %v5282_v30, 0.0 }
 0x29d   :  { %v5292_v27 = vadd.f32 %v1770_v9, %v4980_v5  ;;  %v906_v35 = vpack.c.bf16 %v804_v52, %v803_v60  ;;  %v4002_v5 = vld [vmem:[%s7630_s3] sm:$0xff] }
 0x29e   :  { %v1101_v48 = vpop.f32.mrf.mxu1  ;;  %3161 = vmatpush.bf16.msrb.mxu0 %v4002_v5  ;;  %4023 = vmatpush.bf16.msra.mxu3 %v4002_v5 }
 0x29f   :  { %v1102_v15 = vadd.f32 %v1101_v48, %v4723_v54  ;;  %v2196_v31 = vmax.f32 %v5292_v27, 0.0 }
 0x2a1   :  { %v5285_v25 = vadd.f32 %v1102_v15, %v4983_v34 }
 0x2a2   :  { %v1771_v20 = vpop.f32.mrf.mxu2 }
 0x2a3   :  { %v1500_v57 = vmax.f32 %v5285_v25, 0.0  ;;  %v1772_v7 = vadd.f32 %v1771_v20, %v5028_v14 }
 0x2a5   :  { %v5298_v48 = vadd.f32 %v1772_v7, %v4987_v61  ;;  %v1611_v34 = vpack.c.bf16 %v1500_v57, %v1499_v47  ;;  %v5306_v47 = vpop.f32.mrf.mxu3  ;;  %v7807_v57 = vld [vmem:[#allocation11_spill] sm:$0xff] }
 0x2a6   :  { %v1104_v15 = vpop.f32.mrf.mxu1  ;;  %7806 = vst [vmem:[#allocation61_spill] sm:$0xff] %v5306_v47  ;;  %v5310_v7 = vadd.f32 %v7807_v57, %v4411_v36 }
 0x2a7   :  { %v2197_v3 = vmax.f32 %v5298_v48, 0.0  ;;  %1813 = vmatmul.bf16.gmra.mxu2 %v1611_v34  ;;  %v1105_v61 = vadd.f32 %v1104_v15, %v4723_v54 }
 0x2a8   :  { %7808 = vst [vmem:[#allocation7_spill] sm:$0xff] %v5310_v7  ;;  %v806_v5 = vmax.f32 %v5310_v7, 0.0 }
 0x2a9   :  { %1143 = vmatmul.bf16.gmra.mxu1 %v906_v35  ;;  %v2317_v9 = vpack.c.bf16 %v2197_v3, %v2196_v31  ;;  %v5313_v52 = vadd.f32 %v1105_v61, %v5013_v21  ;;  %v7810_v3 = vld [vmem:[#allocation9_spill] sm:$0xff] }
 0x2aa   :  { %v1774_v20 = vpop.f32.mrf.mxu2  ;;  %v5319_v31 = vadd.f32 %v7810_v3, %v4411_v36 }
 0x2ab   :  { %2483 = vmatmul.bf16.gmra.mxu3 %v2317_v9  ;;  %7809 = vst [vmem:[#allocation5_spill] sm:$0xff] %v5313_v52  ;;  %v1775_v60 = vadd.f32 %v1774_v20, %v5028_v14  ;;  %v1501_v57 = vmax.f32 %v5313_v52, 0.0 }
 0x2ac   :  { %7811 = vst [vmem:[#allocation11_spill] sm:$0xff] %v5319_v31  ;;  %v805_v61 = vmax.f32 %v5319_v31, 0.0  ;;  %v7815_v31 = vld [vmem:[#allocation15_spill] sm:$0xff] }
 0x2ad   :  { %v5327_v47 = vadd.f32 %v1775_v60, %v5003_v43 }
 0x2ae   :  { %v1106_v34 = vpop.f32.mrf.mxu1  ;;  %v907_v43 = vpack.c.bf16 %v806_v5, %v805_v61 }
 0x2af   :  { %v1107_v35 = vadd.f32 %v1106_v34, %v4723_v54  ;;  %v2198_v7 = vmax.f32 %v5327_v47, 0.0 }
 0x2b1   :  { %v5322_v15 = vadd.f32 %v1107_v35, %v5000_v38  ;;  %v5335_v38 = vpop.f32.mrf.mxu3 }
 0x2b2   :  { %v1776_v9 = vpop.f32.mrf.mxu2  ;;  %7814 = vst [vmem:[#allocation85_spill] sm:$0xff] %v5335_v38 }
 0x2b3   :  { %7812 = vst [vmem:[#allocation9_spill] sm:$0xff] %v5322_v15  ;;  %v1502_v21 = vmax.f32 %v5322_v15, 0.0  ;;  %v1777_v20 = vadd.f32 %v1776_v9, %v5028_v14 }
 0x2b5   :  { %v5333_v34 = vadd.f32 %v1777_v20, %v5016_v53  ;;  %v1612_v3 = vpack.c.bf16 %v1502_v21, %v1501_v57  ;;  %v5342_v53 = vadd.f32 %v7815_v31, %v4411_v36  ;;  %v7819_v31 = vld [vmem:[#allocation13_spill] sm:$0xff] }
 0x2b6   :  { %v1109_v35 = vpop.f32.mrf.mxu1  ;;  %v5359_v5 = vadd.f32 %v7819_v31, %v4411_v36 }
 0x2b7   :  { %7813 = vst [vmem:[#allocation84_spill] sm:$0xff] %v5333_v34  ;;  %v2199_v52 = vmax.f32 %v5333_v34, 0.0  ;;  %1818 = vmatmul.bf16.gmra.mxu2 %v1612_v3  ;;  %v1110_v15 = vadd.f32 %v1109_v35, %v4723_v54 }
 0x2b8   :  { %7816 = vst [vmem:[#allocation15_spill] sm:$0xff] %v5342_v53  ;;  %v807_v31 = vmax.f32 %v5359_v5, 0.0 }
 0x2b9   :  { %1148 = vmatmul.bf16.gmra.mxu1 %v907_v43  ;;  %v2318_v60 = vpack.c.bf16 %v2199_v52, %v2198_v7  ;;  %v5345_v57 = vadd.f32 %v1110_v15, %v5041_v17  ;;  %v5352_v7 = vld [vmem:[%s7629_s4] sm:$0x1f]  ;;  %v808_v15 = vmax.f32 %v5342_v53, 0.0 }
 0x2ba   :  { %v1779_v9 = vpop.f32.mrf.mxu2  ;;  %7818 = vst [vmem:[#allocation87_spill] sm:$0xff] %v5352_v7  ;;  %v5355_v52 = vperm.slane %v5352_v7, 3 }
 0x2bb   :  { %2488 = vmatmul.bf16.gmra.mxu3 %v2318_v60  ;;  %7817 = vst [vmem:[#allocation86_spill] sm:$0xff] %v5345_v57  ;;  %v1780_v38 = vadd.f32 %v1779_v9, %v5028_v14  ;;  %v1503_v61 = vmax.f32 %v5345_v57, 0.0  ;;  %v908_v34 = vpack.c.bf16 %v808_v15, %v807_v31  ;;  %v7822_v31 = vld [vmem:[#allocation19_spill] sm:$0xff] }
 0x2bd   :  { %v5367_v43 = vadd.f32 %v1780_v38, %v5035_v29 }
 0x2be   :  { %v1111_v21 = vpop.f32.mrf.mxu1  ;;  %v2449_v20 = vpop.f32.mrf.mxu3 }
 0x2bf   :  { %v1112_v3 = vadd.f32 %v1111_v21, %v4723_v54  ;;  %7821 = vst [vmem:[#allocation88_spill] sm:$0xff] %v5367_v43  ;;  %v2450_v9 = vadd.f32 %v2449_v20, %v5355_v52  ;;  %v2200_v57 = vmax.f32 %v5367_v43, 0.0  ;;  %v5384_v43 = vadd.f32 %v7822_v31, %v4411_v36 }
 0x2c1   :  { %v5362_v17 = vadd.f32 %v1112_v3, %v5032_v28  ;;  %v2769_v29 = vadd.f32 %v2450_v9, %v5049_v10 }
 0x2c2   :  { %v1781_v35 = vpop.f32.mrf.mxu2 }
 0x2c3   :  { %7820 = vst [vmem:[#allocation13_spill] sm:$0xff] %v5362_v17  ;;  %v1504_v60 = vmax.f32 %v5362_v17, 0.0  ;;  %v1782_v21 = vadd.f32 %v1781_v35, %v5028_v14 }
 0x2c5   :  { %v5374_v7 = vadd.f32 %v1782_v21, %v5044_v13  ;;  %v1613_v28 = vpack.c.bf16 %v1504_v60, %v1503_v61  ;;  %v2897_v61 = vmax.f32 %v2769_v29, 0.0 }
 0x2c6   :  { %v1114_v3 = vpop.f32.mrf.mxu1  ;;  %v2451_v53 = vpop.f32.mrf.mxu3 }
 0x2c7   :  { %v2201_v38 = vmax.f32 %v5374_v7, 0.0  ;;  %v2452_v17 = vadd.f32 %v2451_v53, %v5355_v52  ;;  %1823 = vmatmul.bf16.gmra.mxu2 %v1613_v28  ;;  %v1115_v13 = vadd.f32 %v1114_v3, %v4723_v54  ;;  %v810_v3 = vmax.f32 %v5384_v43, 0.0 }
 0x2c9   :  { %v2770_v20 = vadd.f32 %v2452_v17, %v5057_v46  ;;  %1153 = vmatmul.bf16.gmra.mxu1 %v908_v34  ;;  %v2319_v35 = vpack.c.bf16 %v2201_v38, %v2200_v57  ;;  %v5387_v10 = vadd.f32 %v1115_v13, %v5078_v59  ;;  %v7823_v57 = vld [vmem:[#allocation17_spill] sm:$0xff] }
 0x2ca   :  { %v1784_v21 = vpop.f32.mrf.mxu2  ;;  %v5393_v17 = vadd.f32 %v7823_v57, %v4411_v36 }
 0x2cb   :  { %v2898_v60 = vmax.f32 %v2770_v20, 0.0  ;;  %2493 = vmatmul.bf16.gmra.mxu3 %v2319_v35  ;;  %v1785_v46 = vadd.f32 %v1784_v21, %v5028_v14  ;;  %v1505_v29 = vmax.f32 %v5387_v10, 0.0 }
 0x2cc   :  { %v809_v21 = vmax.f32 %v5393_v17, 0.0 }
 0x2cd   :  { %v3025_v15 = vpack.c.bf16 %v2898_v60, %v2897_v61  ;;  %v5401_v38 = vadd.f32 %v1785_v46, %v5069_v63 }
 0x2ce   :  { %v1116_v53 = vpop.f32.mrf.mxu1  ;;  %v2454_v9 = vpop.f32.mrf.mxu3  ;;  %v909_v31 = vpack.c.bf16 %v810_v3, %v809_v21 }
 0x2cf   :  { %v1117_v34 = vadd.f32 %v1116_v53, %v4723_v54  ;;  %3162 = vmatmul.bf16.vlgmr.msrb.gmra.mxu0 %v3025_v15  ;;  %v2455_v35 = vadd.f32 %v2454_v9, %v5355_v52  ;;  %v2202_v53 = vmax.f32 %v5401_v38, 0.0 }
 0x2d1   :  { %v5396_v28 = vadd.f32 %v1117_v34, %v5064_v51  ;;  %v2771_v63 = vadd.f32 %v2455_v35, %v5086_v37 }
 0x2d2   :  { %v1786_v59 = vpop.f32.mrf.mxu2 }
 0x2d3   :  { %v1506_v20 = vmax.f32 %v5396_v28, 0.0  ;;  %v1787_v13 = vadd.f32 %v1786_v59, %v5028_v14 }
 0x2d5   :  { %v5408_v61 = vadd.f32 %v1787_v13, %v5081_v11  ;;  %v1614_v51 = vpack.c.bf16 %v1506_v20, %v1505_v29  ;;  %v2899_v29 = vmax.f32 %v2771_v63, 0.0  ;;  %v7824_v13 = vld [vmem:[#allocation23_spill] sm:$0xff] }
 0x2d6   :  { %v1119_v60 = vpop.f32.mrf.mxu1  ;;  %v2456_v15 = vpop.f32.mrf.mxu3  ;;  %v5418_v21 = vadd.f32 %v7824_v13, %v4411_v36 }
 0x2d7   :  { %v2203_v46 = vmax.f32 %v5408_v61, 0.0  ;;  %v2457_v34 = vadd.f32 %v2456_v15, %v5355_v52  ;;  %1828 = vmatmul.bf16.gmra.mxu2 %v1614_v51  ;;  %v1120_v11 = vadd.f32 %v1119_v60, %v4723_v54  ;;  %v7825_v60 = vld [vmem:[#allocation21_spill] sm:$0xff] }
 0x2d8   :  { %v812_v63 = vmax.f32 %v5418_v21, 0.0 }
 0x2d9   :  { %v2772_v9 = vadd.f32 %v2457_v34, %v5092_v16  ;;  %1158 = vmatmul.bf16.gmra.mxu1 %v909_v31  ;;  %v2320_v57 = vpack.c.bf16 %v2203_v46, %v2202_v53  ;;  %v5421_v37 = vadd.f32 %v1120_v11, %v5110_v6  ;;  %v5427_v31 = vadd.f32 %v7825_v60, %v4411_v36 }
 0x2da   :  { %v1789_v59 = vpop.f32.mrf.mxu2 }
 0x2db   :  { %v2900_v20 = vmax.f32 %v2772_v9, 0.0  ;;  %2498 = vmatmul.bf16.gmra.mxu3 %v2320_v57  ;;  %v1790_v16 = vadd.f32 %v1789_v59, %v5028_v14  ;;  %v1507_v46 = vmax.f32 %v5421_v37, 0.0  ;;  %v811_v59 = vmax.f32 %v5427_v31, 0.0 }
 0x2dd   :  { %v3026_v3 = vpack.c.bf16 %v2900_v20, %v2899_v29  ;;  %v5435_v34 = vadd.f32 %v1790_v16, %v5104_v55  ;;  %v910_v13 = vpack.c.bf16 %v812_v63, %v811_v59 }
 0x2de   :  { %v1121_v35 = vpop.f32.mrf.mxu1  ;;  %v2459_v51 = vpop.f32.mrf.mxu3 }
 0x2df   :  { %v1122_v15 = vadd.f32 %v1121_v35, %v4723_v54  ;;  %3167 = vmatmul.bf16.gmra.mxu0 %v3026_v3  ;;  %v2460_v57 = vadd.f32 %v2459_v51, %v5355_v52  ;;  %v2204_v35 = vmax.f32 %v5435_v34, 0.0 }
 0x2e1   :  { %v5430_v53 = vadd.f32 %v1122_v15, %v5101_v2  ;;  %v2773_v55 = vadd.f32 %v2460_v57, %v5120_v12 }
 0x2e2   :  { %v1791_v6 = vpop.f32.mrf.mxu2 }
 0x2e3   :  { %v1508_v9 = vmax.f32 %v5430_v53, 0.0  ;;  %v1792_v11 = vadd.f32 %v1791_v6, %v5028_v14 }
 0x2e5   :  { %v5442_v29 = vadd.f32 %v1792_v11, %v5113_v56  ;;  %v1615_v2 = vpack.c.bf16 %v1508_v9, %v1507_v46  ;;  %v2901_v46 = vmax.f32 %v2773_v55, 0.0  ;;  %v7826_v11 = vld [vmem:[#allocation27_spill] sm:$0xff] }
 0x2e6   :  { %v1124_v20 = vpop.f32.mrf.mxu1  ;;  %v2461_v3 = vpop.f32.mrf.mxu3  ;;  %v5452_v59 = vadd.f32 %v7826_v11, %v4411_v36 }
 0x2e7   :  { %v2205_v16 = vmax.f32 %v5442_v29, 0.0  ;;  %v2462_v15 = vadd.f32 %v2461_v3, %v5355_v52  ;;  %1833 = vmatmul.bf16.gmra.mxu2 %v1615_v2  ;;  %v1125_v56 = vadd.f32 %v1124_v20, %v4723_v54  ;;  %v7827_v20 = vld [vmem:[#allocation25_spill] sm:$0xff] }
 0x2e8   :  { %v814_v55 = vmax.f32 %v5452_v59, 0.0 }
 0x2e9   :  { %v2774_v51 = vadd.f32 %v2462_v15, %v5126_v44  ;;  %1163 = vmatmul.bf16.gmra.mxu1 %v910_v13  ;;  %v2321_v60 = vpack.c.bf16 %v2205_v16, %v2204_v35  ;;  %v5455_v12 = vadd.f32 %v1125_v56, %v5144_v23  ;;  %v5461_v13 = vadd.f32 %v7827_v20, %v4411_v36 }
 0x2ea   :  { %v1794_v6 = vpop.f32.mrf.mxu2 }
 0x2eb   :  { %v2902_v9 = vmax.f32 %v2774_v51, 0.0  ;;  %2503 = vmatmul.bf16.gmra.mxu3 %v2321_v60  ;;  %v1795_v44 = vadd.f32 %v1794_v6, %v5028_v14  ;;  %v1509_v16 = vmax.f32 %v5455_v12, 0.0  ;;  %v813_v6 = vmax.f32 %v5461_v13, 0.0 }
 0x2ed   :  { %v3027_v63 = vpack.c.bf16 %v2902_v9, %v2901_v46  ;;  %v5469_v15 = vadd.f32 %v1795_v44, %v5138_v58  ;;  %v911_v11 = vpack.c.bf16 %v814_v55, %v813_v6 }
 0x2ee   :  { %v1126_v57 = vpop.f32.mrf.mxu1  ;;  %v2464_v2 = vpop.f32.mrf.mxu3 }
 0x2ef   :  { %v1127_v3 = vadd.f32 %v1126_v57, %v4723_v54  ;;  %3172 = vmatmul.bf16.gmra.mxu0 %v3027_v63  ;;  %v2465_v60 = vadd.f32 %v2464_v2, %v5355_v52  ;;  %v2206_v57 = vmax.f32 %v5469_v15, 0.0 }
 0x2f1   :  { %v5464_v35 = vadd.f32 %v1127_v3, %v5135_v49  ;;  %v2775_v58 = vadd.f32 %v2465_v60, %v5152_v33 }
 0x2f2   :  { %v1796_v23 = vpop.f32.mrf.mxu2 }
 0x2f3   :  { %v1510_v51 = vmax.f32 %v5464_v35, 0.0  ;;  %v1797_v56 = vadd.f32 %v1796_v23, %v5028_v14 }
 0x2f5   :  { %v5476_v46 = vadd.f32 %v1797_v56, %v5147_v19  ;;  %v1616_v49 = vpack.c.bf16 %v1510_v51, %v1509_v16  ;;  %v2903_v16 = vmax.f32 %v2775_v58, 0.0  ;;  %v7828_v56 = vld [vmem:[#allocation31_spill] sm:$0xff] }
 0x2f6   :  { %v1129_v9 = vpop.f32.mrf.mxu1  ;;  %v2466_v63 = vpop.f32.mrf.mxu3  ;;  %v5486_v6 = vadd.f32 %v7828_v56, %v4411_v36 }
 0x2f7   :  { %v2207_v44 = vmax.f32 %v5476_v46, 0.0  ;;  %v2467_v3 = vadd.f32 %v2466_v63, %v5355_v52  ;;  %1838 = vmatmul.bf16.gmra.mxu2 %v1616_v49  ;;  %v1130_v19 = vadd.f32 %v1129_v9, %v4723_v54  ;;  %v7829_v9 = vld [vmem:[#allocation29_spill] sm:$0xff] }
 0x2f8   :  { %v816_v58 = vmax.f32 %v5486_v6, 0.0 }
 0x2f9   :  { %v2776_v2 = vadd.f32 %v2467_v3, %v5161_v26  ;;  %1168 = vmatmul.bf16.gmra.mxu1 %v911_v11  ;;  %v2322_v20 = vpack.c.bf16 %v2207_v44, %v2206_v57  ;;  %v5489_v33 = vadd.f32 %v1130_v19, %v5181_v40  ;;  %v5495_v11 = vadd.f32 %v7829_v9, %v4411_v36 }
 0x2fa   :  { %v1799_v23 = vpop.f32.mrf.mxu2 }
 0x2fb   :  { %v2904_v51 = vmax.f32 %v2776_v2, 0.0  ;;  %2508 = vmatmul.bf16.gmra.mxu3 %v2322_v20  ;;  %v1800_v26 = vadd.f32 %v1799_v23, %v5028_v14  ;;  %v1511_v44 = vmax.f32 %v5489_v33, 0.0  ;;  %v815_v23 = vmax.f32 %v5495_v11, 0.0 }
 0x2fd   :  { %v3028_v55 = vpack.c.bf16 %v2904_v51, %v2903_v16  ;;  %v5503_v3 = vadd.f32 %v1800_v26, %v5173_v18  ;;  %v912_v56 = vpack.c.bf16 %v816_v58, %v815_v23 }
 0x2fe   :  { %v1131_v60 = vpop.f32.mrf.mxu1  ;;  %v2469_v49 = vpop.f32.mrf.mxu3 }
 0x2ff   :  { %v1132_v63 = vadd.f32 %v1131_v60, %v4723_v54  ;;  %3177 = vmatmul.bf16.gmra.mxu0 %v3028_v55  ;;  %v2470_v20 = vadd.f32 %v2469_v49, %v5355_v52  ;;  %v2208_v60 = vmax.f32 %v5503_v3, 0.0 }
 0x301   :  { %v5498_v57 = vadd.f32 %v1132_v63, %v5170_v32  ;;  %v2777_v18 = vadd.f32 %v2470_v20, %v5189_v0 }
 0x302   :  { %v1801_v40 = vpop.f32.mrf.mxu2 }
 0x303   :  { %v1512_v2 = vmax.f32 %v5498_v57, 0.0  ;;  %v1802_v19 = vadd.f32 %v1801_v40, %v5028_v14 }
 0x305   :  { %v5510_v16 = vadd.f32 %v1802_v19, %v5184_v22  ;;  %v1617_v32 = vpack.c.bf16 %v1512_v2, %v1511_v44  ;;  %v2905_v44 = vmax.f32 %v2777_v18, 0.0  ;;  %v7830_v19 = vld [vmem:[#allocation34_spill] sm:$0xff] }
 0x306   :  { %v1134_v51 = vpop.f32.mrf.mxu1  ;;  %v2471_v55 = vpop.f32.mrf.mxu3  ;;  %v5520_v23 = vadd.f32 %v7830_v19, %v4411_v36 }
 0x307   :  { %v2209_v26 = vmax.f32 %v5510_v16, 0.0  ;;  %v2472_v63 = vadd.f32 %v2471_v55, %v5355_v52  ;;  %1843 = vmatmul.bf16.gmra.mxu2 %v1617_v32  ;;  %v1135_v22 = vadd.f32 %v1134_v51, %v4723_v54  ;;  %v7831_v51 = vld [vmem:[#allocation32_spill] sm:$0xff] }
 0x308   :  { %v818_v18 = vmax.f32 %v5520_v23, 0.0 }
 0x309   :  { %v2778_v49 = vadd.f32 %v2472_v63, %v5195_v42  ;;  %1173 = vmatmul.bf16.gmra.mxu1 %v912_v56  ;;  %v2323_v9 = vpack.c.bf16 %v2209_v26, %v2208_v60  ;;  %v5523_v0 = vadd.f32 %v1135_v22, %v5213_v39  ;;  %v5529_v56 = vadd.f32 %v7831_v51, %v4411_v36 }
 0x30a   :  { %v1804_v40 = vpop.f32.mrf.mxu2 }
 0x30b   :  { %v2906_v2 = vmax.f32 %v2778_v49, 0.0  ;;  %2513 = vmatmul.bf16.gmra.mxu3 %v2323_v9  ;;  %v1805_v42 = vadd.f32 %v1804_v40, %v5028_v14  ;;  %v1513_v26 = vmax.f32 %v5523_v0, 0.0  ;;  %v817_v40 = vmax.f32 %v5529_v56, 0.0 }
 0x30d   :  { %v3029_v58 = vpack.c.bf16 %v2906_v2, %v2905_v44  ;;  %v5537_v63 = vadd.f32 %v1805_v42, %v5207_v4  ;;  %v913_v19 = vpack.c.bf16 %v818_v18, %v817_v40  ;;  %v7836_v40 = vld [vmem:[#allocation38_spill] sm:$0xff] }
 0x30e   :  { %v1136_v20 = vpop.f32.mrf.mxu1  ;;  %v2474_v32 = vpop.f32.mrf.mxu3 }
 0x30f   :  { %v1137_v55 = vadd.f32 %v1136_v20, %v4723_v54  ;;  %3182 = vmatmul.bf16.gmra.mxu0 %v3029_v58  ;;  %7833 = vst [vmem:[#allocation17_spill] sm:$0xff] %v5537_v63  ;;  %v2475_v9 = vadd.f32 %v2474_v32, %v5355_v52  ;;  %v2210_v20 = vmax.f32 %v5537_v63, 0.0  ;;  %v7835_v32 = vld [vmem:[#allocation81_spill] sm:$0xff]  ;;  %v5554_v63 = vadd.f32 %v7836_v40, %v4411_v36 }
 0x311   :  { %v5532_v60 = vadd.f32 %v1137_v55, %v5204_v62  ;;  %v7834_v55 = vld [vmem:[#allocation79_spill] sm:$0xff] }
 0x312   :  { %v1806_v39 = vpop.f32.mrf.mxu2  ;;  %v2779_v4 = vadd.f32 %v2475_v9, %v7834_v55 }
 0x313   :  { %7832 = vst [vmem:[#allocation19_spill] sm:$0xff] %v5532_v60  ;;  %v1514_v49 = vmax.f32 %v5532_v60, 0.0  ;;  %v1807_v22 = vadd.f32 %v1806_v39, %v5028_v14 }
 0x315   :  { %v5544_v44 = vadd.f32 %v1807_v22, %v5216_v41  ;;  %v1618_v62 = vpack.c.bf16 %v1514_v49, %v1513_v26  ;;  %v2907_v26 = vmax.f32 %v2779_v4, 0.0 }
 0x316   :  { %v1139_v2 = vpop.f32.mrf.mxu1  ;;  %v2476_v58 = vpop.f32.mrf.mxu3 }
 0x317   :  { %v2211_v42 = vmax.f32 %v5544_v44, 0.0  ;;  %v2477_v51 = vadd.f32 %v2476_v58, %v5355_v52  ;;  %1848 = vmatmul.bf16.gmra.mxu2 %v1618_v62  ;;  %v1140_v41 = vadd.f32 %v1139_v2, %v4723_v54  ;;  %v7838_v2 = vld [vmem:[#allocation36_spill] sm:$0xff] }
 0x319   :  { %v2780_v39 = vadd.f32 %v2477_v51, %v7835_v32  ;;  %1178 = vmatmul.bf16.gmra.mxu1 %v913_v19  ;;  %v2324_v60 = vpack.c.bf16 %v2211_v42, %v2210_v20  ;;  %v5557_v9 = vadd.f32 %v1140_v41, %v5250_v8  ;;  %v5563_v20 = vadd.f32 %v7838_v2, %v4411_v36  ;;  %v7841_v32 = vld [vmem:[#allocation83_spill] sm:$0xff] }
 0x31a   :  { %v1809_v22 = vpop.f32.mrf.mxu2  ;;  %v820_v42 = vmax.f32 %v5554_v63, 0.0 }
 0x31b   :  { %v2908_v49 = vmax.f32 %v2780_v39, 0.0  ;;  %2518 = vmatmul.bf16.gmra.mxu3 %v2324_v60  ;;  %7837 = vst [vmem:[#allocation23_spill] sm:$0xff] %v5557_v9  ;;  %v1810_v55 = vadd.f32 %v1809_v22, %v5028_v14  ;;  %v7839_v60 = vld [vmem:[#allocation3_spill] sm:$0xff]  ;;  %v1515_v51 = vmax.f32 %v5557_v9, 0.0 }
 0x31d   :  { %v3030_v18 = vpack.c.bf16 %v2908_v49, %v2907_v26  ;;  %v5571_v39 = vadd.f32 %v1810_v55, %v7841_v32  ;;  %v819_v49 = vmax.f32 %v5563_v20, 0.0 }
 0x31e   :  { %v1141_v58 = vpop.f32.mrf.mxu1  ;;  %v2479_v62 = vpop.f32.mrf.mxu3 }
 0x31f   :  { %v1142_v19 = vadd.f32 %v1141_v58, %v4723_v54  ;;  %3187 = vmatmul.bf16.gmra.mxu0 %v3030_v18  ;;  %7842 = vst [vmem:[#allocation27_spill] sm:$0xff] %v5571_v39  ;;  %v2480_v22 = vadd.f32 %v2479_v62, %v5355_v52  ;;  %v7843_v18 = vld [vmem:[#allocation2_spill] sm:$0xff]  ;;  %v2212_v9 = vmax.f32 %v5571_v39, 0.0 }
 0x321   :  { %v5566_v4 = vadd.f32 %v1142_v19, %v7839_v60  ;;  %v914_v60 = vpack.c.bf16 %v820_v42, %v819_v49  ;;  %v2781_v55 = vadd.f32 %v2480_v22, %v5258_v1  ;;  %v7844_v49 = vld [vmem:[#allocation4_spill] sm:$0xff]  ;;  %v7845_v1 = vld [vmem:[#allocation6_spill] sm:$0xff] }
 0x322   :  { %v1811_v8 = vpop.f32.mrf.mxu2  ;;  %v5588_v39 = vadd.f32 %v7844_v49, %v4411_v36  ;;  %v5592_v22 = vadd.f32 %v7845_v1, %v4411_v36 }
 0x323   :  { %7840 = vst [vmem:[#allocation21_spill] sm:$0xff] %v5566_v4  ;;  %v1516_v41 = vmax.f32 %v5566_v4, 0.0  ;;  %v1812_v26 = vadd.f32 %v1811_v8, %v5028_v14 }
 0x325   :  { %v5578_v40 = vadd.f32 %v1812_v26, %v7843_v18  ;;  %v1619_v58 = vpack.c.bf16 %v1516_v41, %v1515_v51  ;;  %v2909_v51 = vmax.f32 %v2781_v55, 0.0  ;;  %v822_v55 = vmax.f32 %v5592_v22, 0.0 }
 0x326   :  { %v1144_v19 = vpop.f32.mrf.mxu1  ;;  %v2481_v2 = vpop.f32.mrf.mxu3 }
 0x327   :  { %v2213_v32 = vmax.f32 %v5578_v40, 0.0  ;;  %v2482_v4 = vadd.f32 %v2481_v2, %v5355_v52  ;;  %1853 = vmatmul.bf16.gmra.mxu2 %v1619_v58  ;;  %v1145_v26 = vadd.f32 %v1144_v19, %v4723_v54 }
 0x329   :  { %v2782_v62 = vadd.f32 %v2482_v4, %v5264_v45  ;;  %1183 = vmatmul.bf16.gmra.mxu1 %v914_v60  ;;  %v2325_v8 = vpack.c.bf16 %v2213_v32, %v2212_v9  ;;  %v5595_v58 = vadd.f32 %v1145_v26, %v5282_v30  ;;  %v821_v60 = vmax.f32 %v5588_v39, 0.0 }
 0x32a   :  { %v1814_v18 = vpop.f32.mrf.mxu2 }
 0x32b   :  { %v2910_v41 = vmax.f32 %v2782_v62, 0.0  ;;  %2523 = vmatmul.bf16.gmra.mxu3 %v2325_v8  ;;  %v1815_v4 = vadd.f32 %v1814_v18, %v5028_v14  ;;  %v1517_v32 = vmax.f32 %v5595_v58, 0.0  ;;  %v915_v49 = vpack.c.bf16 %v822_v55, %v821_v60  ;;  %v7847_v55 = vld [vmem:[#allocation8_spill] sm:$0xff] }
 0x32d   :  { %v3031_v42 = vpack.c.bf16 %v2910_v41, %v2909_v51  ;;  %v5606_v30 = vadd.f32 %v1815_v4, %v5276_v50 }
 0x32e   :  { %v1146_v45 = vpop.f32.mrf.mxu1  ;;  %v2484_v9 = vpop.f32.mrf.mxu3 }
 0x32f   :  { %v1147_v19 = vadd.f32 %v1146_v45, %v4723_v54  ;;  %3192 = vmatmul.bf16.gmra.mxu0 %v3031_v42  ;;  %v2485_v26 = vadd.f32 %v2484_v9, %v5355_v52  ;;  %v2214_v1 = vmax.f32 %v5606_v30, 0.0 }
 0x331   :  { %v5600_v2 = vadd.f32 %v1147_v19, %v5273_v24  ;;  %v2783_v45 = vadd.f32 %v2485_v26, %v5292_v27  ;;  %v7849_v27 = vld [vmem:[#allocation10_spill] sm:$0xff] }
 0x332   :  { %v1816_v62 = vpop.f32.mrf.mxu2  ;;  %v5626_v26 = vadd.f32 %v7849_v27, %v4411_v36 }
 0x333   :  { %v1518_v8 = vmax.f32 %v5600_v2, 0.0  ;;  %v1817_v18 = vadd.f32 %v1816_v62, %v5028_v14 }
 0x334   :  { %7850 = vst [vmem:[#allocation29_spill] sm:$0xff] %v5626_v26 }
 0x335   :  { %v5612_v51 = vadd.f32 %v1817_v18, %v5285_v25  ;;  %v1620_v24 = vpack.c.bf16 %v1518_v8, %v1517_v32  ;;  %v2911_v32 = vmax.f32 %v2783_v45, 0.0  ;;  %v5622_v18 = vadd.f32 %v7847_v55, %v4411_v36  ;;  %v7853_v45 = vld [vmem:[#allocation7_spill] sm:$0xff] }
 0x336   :  { %v1149_v41 = vpop.f32.mrf.mxu1  ;;  %v2486_v42 = vpop.f32.mrf.mxu3 }
 0x337   :  { %7846 = vst [vmem:[#allocation25_spill] sm:$0xff] %v5612_v51  ;;  %v2215_v50 = vmax.f32 %v5612_v51, 0.0  ;;  %v2487_v4 = vadd.f32 %v2486_v42, %v5355_v52  ;;  %1858 = vmatmul.bf16.gmra.mxu2 %v1620_v24  ;;  %v1150_v25 = vadd.f32 %v1149_v41, %v4723_v54  ;;  %v7851_v24 = vld [vmem:[#allocation11_spill] sm:$0xff] }
 0x338   :  { %7848 = vst [vmem:[#allocation31_spill] sm:$0xff] %v5622_v18  ;;  %v7860_v51 = vld [vmem:[#allocation87_spill] sm:$0xff] }
 0x339   :  { %v2784_v9 = vadd.f32 %v2487_v4, %v5298_v48  ;;  %1188 = vmatmul.bf16.gmra.mxu1 %v915_v49  ;;  %v2326_v19 = vpack.c.bf16 %v2215_v50, %v2214_v1  ;;  %v5629_v42 = vadd.f32 %v1150_v25, %v7851_v24  ;;  %v823_v4 = vmax.f32 %v5622_v18, 0.0 }
 0x33a   :  { %v1819_v62 = vpop.f32.mrf.mxu2 }
 0x33b   :  { %v2912_v8 = vmax.f32 %v2784_v9, 0.0  ;;  %2528 = vmatmul.bf16.gmra.mxu3 %v2326_v19  ;;  %7852 = vst [vmem:[#allocation34_spill] sm:$0xff] %v5629_v42  ;;  %v1820_v41 = vadd.f32 %v1819_v62, %v5028_v14  ;;  %v824_v9 = vmax.f32 %v5626_v26, 0.0  ;;  %v1519_v19 = vmax.f32 %v5629_v42, 0.0 }
 0x33d   :  { %v3032_v60 = vpack.c.bf16 %v2912_v8, %v2911_v32  ;;  %v7855_v8 = vld [vmem:[#allocation5_spill] sm:$0xff]  ;;  %v916_v18 = vpack.c.bf16 %v824_v9, %v823_v4 }
 0x33e   :  { %v1151_v48 = vpop.f32.mrf.mxu1  ;;  %v2489_v49 = vpop.f32.mrf.mxu3  ;;  %v5640_v25 = vadd.f32 %v1820_v41, %v7855_v8 }
 0x33f   :  { %v1152_v1 = vadd.f32 %v1151_v48, %v4723_v54  ;;  %3197 = vmatmul.bf16.gmra.mxu0 %v3032_v60  ;;  %v2490_v62 = vadd.f32 %v2489_v49, %v5355_v52  ;;  %v7857_v60 = vld [vmem:[#allocation9_spill] sm:$0xff] }
 0x340   :  { %7856 = vst [vmem:[#allocation79_spill] sm:$0xff] %v5640_v25  ;;  %v2216_v26 = vmax.f32 %v5640_v25, 0.0 }
 0x341   :  { %v5634_v50 = vadd.f32 %v1152_v1, %v7853_v45  ;;  %v2785_v42 = vadd.f32 %v2490_v62, %v5327_v47 }
 0x342   :  { %v1821_v32 = vpop.f32.mrf.mxu2 }
 0x343   :  { %7854 = vst [vmem:[#allocation32_spill] sm:$0xff] %v5634_v50  ;;  %v1520_v55 = vmax.f32 %v5634_v50, 0.0  ;;  %v1822_v27 = vadd.f32 %v1821_v32, %v5028_v14  ;;  %v7859_v50 = vld [vmem:[#allocation84_spill] sm:$0xff] }
 0x345   :  { %v5646_v24 = vadd.f32 %v1822_v27, %v7857_v60  ;;  %v1621_v48 = vpack.c.bf16 %v1520_v55, %v1519_v19  ;;  %v5654_v27 = vperm.slane %v7860_v51, 4  ;;  %v2913_v55 = vmax.f32 %v2785_v42, 0.0 }
 0x346   :  { %v1154_v1 = vpop.f32.mrf.mxu1  ;;  %v2491_v45 = vpop.f32.mrf.mxu3 }
 0x347   :  { %7858 = vst [vmem:[#allocation81_spill] sm:$0xff] %v5646_v24  ;;  %v2217_v41 = vmax.f32 %v5646_v24, 0.0  ;;  %v2492_v8 = vadd.f32 %v2491_v45, %v5355_v52  ;;  %1863 = vmatmul.bf16.gmra.mxu2 %v1621_v48  ;;  %v1155_v4 = vadd.f32 %v1154_v1, %v4723_v54  ;;  %v7861_v45 = vld [vmem:[#allocation12_spill] sm:$0xff] }
 0x348   :  { %v5660_v48 = vadd.f32 %v7861_v45, %v4411_v36  ;;  %v7870_v24 = vld [vmem:[#allocation88_spill] sm:$0xff] }
 0x349   :  { %v2786_v49 = vadd.f32 %v2492_v8, %v7859_v50  ;;  %1193 = vmatmul.bf16.gmra.mxu1 %v916_v18  ;;  %v2327_v32 = vpack.c.bf16 %v2217_v41, %v2216_v26  ;;  %v7863_v18 = vld [vmem:[#allocation14_spill] sm:$0xff]  ;;  %v5668_v1 = vadd.f32 %v1155_v4, %v5359_v5 }
 0x34a   :  { %v1824_v19 = vpop.f32.mrf.mxu2  ;;  %7862 = vst [vmem:[#allocation38_spill] sm:$0xff] %v5660_v48  ;;  %v5664_v26 = vadd.f32 %v7863_v18, %v4411_v36 }
 0x34b   :  { %v2914_v9 = vmax.f32 %v2786_v49, 0.0  ;;  %2533 = vmatmul.bf16.gmra.mxu3 %v2327_v32  ;;  %v1825_v51 = vadd.f32 %v1824_v19, %v5028_v14  ;;  %7865 = vst [vmem:[#allocation3_spill] sm:$0xff] %v5668_v1  ;;  %v7866_v49 = vld [vmem:[#allocation15_spill] sm:$0xff]  ;;  %v825_v19 = vmax.f32 %v5660_v48, 0.0  ;;  %v1521_v4 = vmax.f32 %v5668_v1, 0.0 }
 0x34c   :  { %v3163_v60 = vpop.f32.mrf.mxu0  ;;  %7864 = vst [vmem:[#allocation36_spill] sm:$0xff] %v5664_v26 }
 0x34d   :  { %v3164_v47 = vadd.f32 %v3163_v60, %v5654_v27  ;;  %v3033_v62 = vpack.c.bf16 %v2914_v9, %v2913_v55  ;;  %v826_v55 = vmax.f32 %v5664_v26, 0.0  ;;  %v7868_v9 = vld [vmem:[#allocation86_spill] sm:$0xff] }
 0x34e   :  { %v1156_v42 = vpop.f32.mrf.mxu1  ;;  %v2494_v50 = vpop.f32.mrf.mxu3  ;;  %v5681_v60 = vadd.f32 %v1825_v51, %v7868_v9 }
 0x34f   :  { %v3483_v41 = vpack.c.bf16 %v3164_v47, %v3164_v47  ;;  %v1157_v8 = vadd.f32 %v1156_v42, %v4723_v54  ;;  %3202 = vmatmul.bf16.gmra.mxu0 %v3033_v62  ;;  %v2495_v62 = vadd.f32 %v2494_v50, %v5355_v52  ;;  %v7869_v42 = vld [vmem:[#allocation13_spill] sm:$0xff]  ;;  %v917_v48 = vpack.c.bf16 %v826_v55, %v825_v19 }
 0x350   :  { %v2218_v26 = vmax.f32 %v5681_v60, 0.0 }
 0x351   :  { %3612 = vst.msk [vmem:[%s7631_s5] sm:$0xf] %vm3611_vm1, %v3483_v41  ;;  %v5676_v32 = vadd.f32 %v1157_v8, %v7866_v49  ;;  %v2787_v1 = vadd.f32 %v2495_v62, %v7870_v24 }
 0x352   :  { %v1826_v5 = vpop.f32.mrf.mxu2 }
 0x353   :  { %7867 = vst [vmem:[#allocation83_spill] sm:$0xff] %v5676_v32  ;;  %v1522_v47 = vmax.f32 %v5676_v32, 0.0  ;;  %v1827_v45 = vadd.f32 %v1826_v5, %v5028_v14 }
 0x354   :  { %v3165_v18 = vpop.f32.mrf.mxu0 }
 0x355   :  { %v5688_v41 = vadd.f32 %v1827_v45, %v7869_v42  ;;  %v3166_v8 = vadd.f32 %v3165_v18, %v5654_v27  ;;  %v1622_v49 = vpack.c.bf16 %v1522_v47, %v1521_v4  ;;  %v2915_v45 = vmax.f32 %v2787_v1, 0.0  ;;  %v7871_v42 = vld [vmem:[#allocation16_spill] sm:$0xff] }
 0x356   :  { %v1159_v51 = vpop.f32.mrf.mxu1  ;;  %v2496_v9 = vpop.f32.mrf.mxu3 }
 0x357   :  { %v2219_v32 = vmax.f32 %v5688_v41, 0.0  ;;  %v3484_v25 = vpack.c.bf16 %v3166_v8, %v3166_v8  ;;  %v2497_v50 = vadd.f32 %v2496_v9, %v5355_v52  ;;  %1868 = vmatmul.bf16.gmra.mxu2 %v1622_v49  ;;  %v1160_v19 = vadd.f32 %v1159_v51, %v4723_v54 }
 0x358   :  { %v5704_v8 = vadd.f32 %v7871_v42, %v4411_v36 }
 0x359   :  { %3613 = vst.msk [vmem:[%s7631_s5 + $0x4] sm:$0xf] %vm3611_vm1, %v3484_v25  ;;  %v2788_v5 = vadd.f32 %v2497_v50, %v5374_v7  ;;  %1198 = vmatmul.bf16.gmra.mxu1 %v917_v48  ;;  %v2328_v4 = vpack.c.bf16 %v2219_v32, %v2218_v26  ;;  %v7872_v25 = vld [vmem:[#allocation18_spill] sm:$0xff]  ;;  %v5712_v1 = vadd.f32 %v1160_v19, %v5393_v17 }
 0x35a   :  { %v1829_v47 = vpop.f32.mrf.mxu2  ;;  %v5708_v49 = vadd.f32 %v7872_v25, %v4411_v36  ;;  %v827_v50 = vmax.f32 %v5704_v8, 0.0 }
 0x35b   :  { %v2916_v24 = vmax.f32 %v2788_v5, 0.0  ;;  %2538 = vmatmul.bf16.gmra.mxu3 %v2328_v4  ;;  %v1830_v7 = vadd.f32 %v1829_v47, %v5028_v14  ;;  %v1523_v47 = vmax.f32 %v5712_v1, 0.0 }
 0x35c   :  { %v3168_v55 = vpop.f32.mrf.mxu0  ;;  %v828_v5 = vmax.f32 %v5708_v49, 0.0 }
 0x35d   :  { %v3169_v62 = vadd.f32 %v3168_v55, %v5654_v27  ;;  %v3034_v18 = vpack.c.bf16 %v2916_v24, %v2915_v45  ;;  %v5725_v4 = vadd.f32 %v1830_v7, %v5387_v10 }
 0x35e   :  { %v1161_v48 = vpop.f32.mrf.mxu1  ;;  %v2499_v26 = vpop.f32.mrf.mxu3  ;;  %v918_v7 = vpack.c.bf16 %v828_v5, %v827_v50 }
 0x35f   :  { %v3485_v32 = vpack.c.bf16 %v3169_v62, %v3169_v62  ;;  %v1162_v51 = vadd.f32 %v1161_v48, %v4723_v54  ;;  %3207 = vmatmul.bf16.gmra.mxu0 %v3034_v18  ;;  %v2500_v19 = vadd.f32 %v2499_v26, %v5355_v52  ;;  %v2220_v42 = vmax.f32 %v5725_v4, 0.0 }
 0x361   :  { %3614 = vst.msk [vmem:[%s7631_s5 + $0x8] sm:$0xf] %vm3611_vm1, %v3485_v32  ;;  %v5720_v9 = vadd.f32 %v1162_v51, %v5384_v43  ;;  %v2789_v48 = vadd.f32 %v2500_v19, %v5401_v38 }
 0x362   :  { %v1831_v17 = vpop.f32.mrf.mxu2 }
 0x363   :  { %v1524_v45 = vmax.f32 %v5720_v9, 0.0  ;;  %v1832_v24 = vadd.f32 %v1831_v17, %v5028_v14 }
 0x364   :  { %v3170_v55 = vpop.f32.mrf.mxu0 }
 0x365   :  { %v5732_v43 = vadd.f32 %v1832_v24, %v5396_v28  ;;  %v3171_v62 = vadd.f32 %v3170_v55, %v5654_v27  ;;  %v1623_v18 = vpack.c.bf16 %v1524_v45, %v1523_v47  ;;  %v2917_v45 = vmax.f32 %v2789_v48, 0.0  ;;  %v7873_v55 = vld [vmem:[#allocation20_spill] sm:$0xff] }
 0x366   :  { %v1164_v10 = vpop.f32.mrf.mxu1  ;;  %v2501_v25 = vpop.f32.mrf.mxu3 }
 0x367   :  { %v2221_v32 = vmax.f32 %v5732_v43, 0.0  ;;  %v3486_v51 = vpack.c.bf16 %v3171_v62, %v3171_v62  ;;  %v2502_v26 = vadd.f32 %v2501_v25, %v5355_v52  ;;  %1873 = vmatmul.bf16.gmra.mxu2 %v1623_v18  ;;  %v1165_v50 = vadd.f32 %v1164_v10, %v4723_v54  ;;  %v7874_v18 = vld [vmem:[#allocation22_spill] sm:$0xff] }
 0x368   :  { %v5748_v62 = vadd.f32 %v7873_v55, %v4411_v36  ;;  %v5752_v25 = vadd.f32 %v7874_v18, %v4411_v36 }
 0x369   :  { %3615 = vst.msk [vmem:[%s7631_s5 + $0xc] sm:$0xf] %vm3611_vm1, %v3486_v51  ;;  %v2790_v28 = vadd.f32 %v2502_v26, %v5408_v61  ;;  %1203 = vmatmul.bf16.gmra.mxu1 %v918_v7  ;;  %v2329_v17 = vpack.c.bf16 %v2221_v32, %v2220_v42  ;;  %v5756_v10 = vadd.f32 %v1165_v50, %v5427_v31 }
 0x36a   :  { %v1834_v47 = vpop.f32.mrf.mxu2  ;;  %v829_v26 = vmax.f32 %v5748_v62, 0.0 }
 0x36b   :  { %v2918_v38 = vmax.f32 %v2790_v28, 0.0  ;;  %2543 = vmatmul.bf16.gmra.mxu3 %v2329_v17  ;;  %v1835_v61 = vadd.f32 %v1834_v47, %v5028_v14  ;;  %v830_v28 = vmax.f32 %v5752_v25, 0.0  ;;  %v1525_v47 = vmax.f32 %v5756_v10, 0.0 }
 0x36c   :  { %v3173_v5 = vpop.f32.mrf.mxu0 }
 0x36d   :  { %v3174_v19 = vadd.f32 %v3173_v5, %v5654_v27  ;;  %v3035_v24 = vpack.c.bf16 %v2918_v38, %v2917_v45  ;;  %v5769_v17 = vadd.f32 %v1835_v61, %v5421_v37  ;;  %v919_v61 = vpack.c.bf16 %v830_v28, %v829_v26 }
 0x36e   :  { %v1166_v42 = vpop.f32.mrf.mxu1  ;;  %v2504_v7 = vpop.f32.mrf.mxu3 }
 0x36f   :  { %v3487_v48 = vpack.c.bf16 %v3174_v19, %v3174_v19  ;;  %v1167_v32 = vadd.f32 %v1166_v42, %v4723_v54  ;;  %3212 = vmatmul.bf16.gmra.mxu0 %v3035_v24  ;;  %v2505_v50 = vadd.f32 %v2504_v7, %v5355_v52  ;;  %v2222_v55 = vmax.f32 %v5769_v17, 0.0 }
 0x371   :  { %3616 = vst.msk [vmem:[%s7631_s5 + $0x10] sm:$0xf] %vm3611_vm1, %v3487_v48  ;;  %v5764_v51 = vadd.f32 %v1167_v32, %v5418_v21  ;;  %v2791_v42 = vadd.f32 %v2505_v50, %v5435_v34 }
 0x372   :  { %v1836_v31 = vpop.f32.mrf.mxu2 }
 0x373   :  { %v1526_v45 = vmax.f32 %v5764_v51, 0.0  ;;  %v1837_v38 = vadd.f32 %v1836_v31, %v5028_v14 }
 0x374   :  { %v3175_v5 = vpop.f32.mrf.mxu0 }
 0x375   :  { %v5776_v21 = vadd.f32 %v1837_v38, %v5430_v53  ;;  %v3176_v19 = vadd.f32 %v3175_v5, %v5654_v27  ;;  %v1624_v24 = vpack.c.bf16 %v1526_v45, %v1525_v47  ;;  %v2919_v45 = vmax.f32 %v2791_v42, 0.0  ;;  %v7875_v5 = vld [vmem:[#allocation24_spill] sm:$0xff] }
 0x376   :  { %v1169_v37 = vpop.f32.mrf.mxu1  ;;  %v2506_v18 = vpop.f32.mrf.mxu3 }
 0x377   :  { %v2223_v48 = vmax.f32 %v5776_v21, 0.0  ;;  %v3488_v32 = vpack.c.bf16 %v3176_v19, %v3176_v19  ;;  %v2507_v7 = vadd.f32 %v2506_v18, %v5355_v52  ;;  %1878 = vmatmul.bf16.gmra.mxu2 %v1624_v24  ;;  %v1170_v26 = vadd.f32 %v1169_v37, %v4723_v54  ;;  %v7876_v24 = vld [vmem:[#allocation26_spill] sm:$0xff] }
 0x378   :  { %v5792_v19 = vadd.f32 %v7875_v5, %v4411_v36  ;;  %v5796_v18 = vadd.f32 %v7876_v24, %v4411_v36 }
 0x379   :  { %3617 = vst.msk [vmem:[%s7631_s5 + $0x14] sm:$0xf] %vm3611_vm1, %v3488_v32  ;;  %v2792_v53 = vadd.f32 %v2507_v7, %v5442_v29  ;;  %1208 = vmatmul.bf16.gmra.mxu1 %v919_v61  ;;  %v2330_v31 = vpack.c.bf16 %v2223_v48, %v2222_v55  ;;  %v5800_v37 = vadd.f32 %v1170_v26, %v5461_v13 }
 0x37a   :  { %v1839_v47 = vpop.f32.mrf.mxu2  ;;  %v831_v7 = vmax.f32 %v5792_v19, 0.0 }
 0x37b   :  { %v2920_v34 = vmax.f32 %v2792_v53, 0.0  ;;  %2548 = vmatmul.bf16.gmra.mxu3 %v2330_v31  ;;  %v1840_v29 = vadd.f32 %v1839_v47, %v5028_v14  ;;  %v832_v53 = vmax.f32 %v5796_v18, 0.0  ;;  %v1527_v47 = vmax.f32 %v5800_v37, 0.0 }
 0x37c   :  { %v3178_v28 = vpop.f32.mrf.mxu0 }
 0x37d   :  { %v3179_v50 = vadd.f32 %v3178_v28, %v5654_v27  ;;  %v3036_v38 = vpack.c.bf16 %v2920_v34, %v2919_v45  ;;  %v5813_v31 = vadd.f32 %v1840_v29, %v5455_v12  ;;  %v920_v29 = vpack.c.bf16 %v832_v53, %v831_v7 }
 0x37e   :  { %v1171_v55 = vpop.f32.mrf.mxu1  ;;  %v2509_v61 = vpop.f32.mrf.mxu3 }
 0x37f   :  { %v3489_v42 = vpack.c.bf16 %v3179_v50, %v3179_v50  ;;  %v1172_v48 = vadd.f32 %v1171_v55, %v4723_v54  ;;  %3217 = vmatmul.bf16.gmra.mxu0 %v3036_v38  ;;  %v2510_v26 = vadd.f32 %v2509_v61, %v5355_v52  ;;  %v2224_v5 = vmax.f32 %v5813_v31, 0.0 }
 0x381   :  { %3618 = vst.msk [vmem:[%s7631_s5 + $0x18] sm:$0xf] %vm3611_vm1, %v3489_v42  ;;  %v5808_v32 = vadd.f32 %v1172_v48, %v5452_v59  ;;  %v2793_v55 = vadd.f32 %v2510_v26, %v5469_v15 }
 0x382   :  { %v1841_v13 = vpop.f32.mrf.mxu2 }
 0x383   :  { %v1528_v45 = vmax.f32 %v5808_v32, 0.0  ;;  %v1842_v34 = vadd.f32 %v1841_v13, %v5028_v14 }
 0x384   :  { %v3180_v28 = vpop.f32.mrf.mxu0 }
 0x385   :  { %v5820_v59 = vadd.f32 %v1842_v34, %v5464_v35  ;;  %v3181_v50 = vadd.f32 %v3180_v28, %v5654_v27  ;;  %v1625_v38 = vpack.c.bf16 %v1528_v45, %v1527_v47  ;;  %v2921_v45 = vmax.f32 %v2793_v55, 0.0  ;;  %v7877_v28 = vld [vmem:[#allocation28_spill] sm:$0xff] }
 0x386   :  { %v1174_v12 = vpop.f32.mrf.mxu1  ;;  %v2511_v24 = vpop.f32.mrf.mxu3 }
 0x387   :  { %v2225_v42 = vmax.f32 %v5820_v59, 0.0  ;;  %v3490_v48 = vpack.c.bf16 %v3181_v50, %v3181_v50  ;;  %v2512_v61 = vadd.f32 %v2511_v24, %v5355_v52  ;;  %1883 = vmatmul.bf16.gmra.mxu2 %v1625_v38  ;;  %v1175_v7 = vadd.f32 %v1174_v12, %v4723_v54  ;;  %v7878_v38 = vld [vmem:[#allocation30_spill] sm:$0xff] }
 0x388   :  { %v5836_v50 = vadd.f32 %v7877_v28, %v4411_v36  ;;  %v5840_v24 = vadd.f32 %v7878_v38, %v4411_v36 }
 0x389   :  { %3619 = vst.msk [vmem:[%s7631_s5 + $0x1c] sm:$0xf] %vm3611_vm1, %v3490_v48  ;;  %v2794_v35 = vadd.f32 %v2512_v61, %v5476_v46  ;;  %1213 = vmatmul.bf16.gmra.mxu1 %v920_v29  ;;  %v2331_v13 = vpack.c.bf16 %v2225_v42, %v2224_v5  ;;  %v5844_v12 = vadd.f32 %v1175_v7, %v5495_v11 }
 0x38a   :  { %v1844_v47 = vpop.f32.mrf.mxu2  ;;  %v833_v61 = vmax.f32 %v5836_v50, 0.0 }
 0x38b   :  { %v2922_v15 = vmax.f32 %v2794_v35, 0.0  ;;  %2553 = vmatmul.bf16.gmra.mxu3 %v2331_v13  ;;  %v1845_v46 = vadd.f32 %v1844_v47, %v5028_v14  ;;  %v834_v35 = vmax.f32 %v5840_v24, 0.0  ;;  %v1529_v47 = vmax.f32 %v5844_v12, 0.0 }
 0x38c   :  { %v3183_v53 = vpop.f32.mrf.mxu0 }
 0x38d   :  { %v3184_v26 = vadd.f32 %v3183_v53, %v5654_v27  ;;  %v3037_v34 = vpack.c.bf16 %v2922_v15, %v2921_v45  ;;  %v5857_v13 = vadd.f32 %v1845_v46, %v5489_v33  ;;  %v921_v46 = vpack.c.bf16 %v834_v35, %v833_v61 }
 0x38e   :  { %v1176_v5 = vpop.f32.mrf.mxu1  ;;  %v2514_v29 = vpop.f32.mrf.mxu3 }
 0x38f   :  { %v3491_v55 = vpack.c.bf16 %v3184_v26, %v3184_v26  ;;  %v1177_v42 = vadd.f32 %v1176_v5, %v4723_v54  ;;  %3222 = vmatmul.bf16.gmra.mxu0 %v3037_v34  ;;  %v2515_v7 = vadd.f32 %v2514_v29, %v5355_v52  ;;  %v2226_v28 = vmax.f32 %v5857_v13, 0.0 }
 0x391   :  { %3620 = vst.msk [vmem:[%s7631_s5 + $0x20] sm:$0xf] %vm3611_vm1, %v3491_v55  ;;  %v5852_v48 = vadd.f32 %v1177_v42, %v5486_v6  ;;  %v2795_v5 = vadd.f32 %v2515_v7, %v5503_v3 }
 0x392   :  { %v1846_v11 = vpop.f32.mrf.mxu2 }
 0x393   :  { %v1530_v45 = vmax.f32 %v5852_v48, 0.0  ;;  %v1847_v15 = vadd.f32 %v1846_v11, %v5028_v14 }
 0x394   :  { %v3185_v53 = vpop.f32.mrf.mxu0 }
 0x395   :  { %v5864_v6 = vadd.f32 %v1847_v15, %v5498_v57  ;;  %v3186_v26 = vadd.f32 %v3185_v53, %v5654_v27  ;;  %v1626_v34 = vpack.c.bf16 %v1530_v45, %v1529_v47  ;;  %v2923_v45 = vmax.f32 %v2795_v5, 0.0  ;;  %v7879_v53 = vld [vmem:[#allocation33_spill] sm:$0xff] }
 0x396   :  { %v1179_v33 = vpop.f32.mrf.mxu1  ;;  %v2516_v38 = vpop.f32.mrf.mxu3 }
 0x397   :  { %v2227_v55 = vmax.f32 %v5864_v6, 0.0  ;;  %v3492_v42 = vpack.c.bf16 %v3186_v26, %v3186_v26  ;;  %v2517_v29 = vadd.f32 %v2516_v38, %v5355_v52  ;;  %1888 = vmatmul.bf16.gmra.mxu2 %v1626_v34  ;;  %v1180_v61 = vadd.f32 %v1179_v33, %v4723_v54  ;;  %v7880_v34 = vld [vmem:[#allocation35_spill] sm:$0xff] }
 0x398   :  { %v5880_v26 = vadd.f32 %v7879_v53, %v4411_v36  ;;  %v5884_v38 = vadd.f32 %v7880_v34, %v4411_v36 }
 0x399   :  { %3621 = vst.msk [vmem:[%s7631_s5 + $0x24] sm:$0xf] %vm3611_vm1, %v3492_v42  ;;  %v2796_v57 = vadd.f32 %v2517_v29, %v5510_v16  ;;  %1218 = vmatmul.bf16.gmra.mxu1 %v921_v46  ;;  %v2332_v11 = vpack.c.bf16 %v2227_v55, %v2226_v28  ;;  %v5888_v33 = vadd.f32 %v1180_v61, %v5529_v56 }
 0x39a   :  { %v1849_v47 = vpop.f32.mrf.mxu2  ;;  %v835_v29 = vmax.f32 %v5880_v26, 0.0 }
 0x39b   :  { %v2924_v3 = vmax.f32 %v2796_v57, 0.0  ;;  %2558 = vmatmul.bf16.gmra.mxu3 %v2332_v11  ;;  %v1850_v16 = vadd.f32 %v1849_v47, %v5028_v14  ;;  %7881 = vst [vmem:[#allocation2_spill] sm:$0xff] %v5888_v33  ;;  %v836_v57 = vmax.f32 %v5884_v38, 0.0  ;;  %v1531_v47 = vmax.f32 %v5888_v33, 0.0 }
 0x39c   :  { %v3188_v35 = vpop.f32.mrf.mxu0 }
 0x39d   :  { %v3189_v7 = vadd.f32 %v3188_v35, %v5654_v27  ;;  %v3038_v15 = vpack.c.bf16 %v2924_v3, %v2923_v45  ;;  %v5901_v11 = vadd.f32 %v1850_v16, %v5523_v0 }
 0x39e   :  { %v1181_v28 = vpop.f32.mrf.mxu1  ;;  %v2519_v46 = vpop.f32.mrf.mxu3 }
 0x39f   :  { %v3493_v5 = vpack.c.bf16 %v3189_v7, %v3189_v7  ;;  %v1182_v55 = vadd.f32 %v1181_v28, %v4723_v54  ;;  %3227 = vmatmul.bf16.gmra.mxu0 %v3038_v15  ;;  %v2520_v61 = vadd.f32 %v2519_v46, %v5355_v52  ;;  %v7883_v7 = vld [vmem:[#allocation19_spill] sm:$0xff]  ;;  %v2228_v34 = vmax.f32 %v5901_v11, 0.0 }
 0x3a0   :  { %v922_v28 = vpack.c.bf16 %v836_v57, %v835_v29 }
 0x3a1   :  { %3622 = vst.msk [vmem:[%s7631_s5 + $0x28] sm:$0xf] %vm3611_vm1, %v3493_v5  ;;  %v5896_v42 = vadd.f32 %v1182_v55, %v5520_v23  ;;  %v7884_v5 = vld [vmem:[#allocation17_spill] sm:$0xff] }
 0x3a2   :  { %v1851_v56 = vpop.f32.mrf.mxu2  ;;  %v2797_v55 = vadd.f32 %v2520_v61, %v7884_v5 }
 0x3a3   :  { %7882 = vst [vmem:[#allocation4_spill] sm:$0xff] %v5896_v42  ;;  %v1532_v45 = vmax.f32 %v5896_v42, 0.0  ;;  %v1852_v3 = vadd.f32 %v1851_v56, %v5028_v14 }
 0x3a4   :  { %v3190_v35 = vpop.f32.mrf.mxu0 }
 0x3a5   :  { %v5908_v23 = vadd.f32 %v1852_v3, %v7883_v7  ;;  %v3191_v15 = vadd.f32 %v3190_v35, %v5654_v27  ;;  %v1627_v53 = vpack.c.bf16 %v1532_v45, %v1531_v47  ;;  %v2925_v3 = vmax.f32 %v2797_v55, 0.0 }
 0x3a6   :  { %v1184_v0 = vpop.f32.mrf.mxu1  ;;  %v2521_v16 = vpop.f32.mrf.mxu3 }
 0x3a7   :  { %v2229_v42 = vmax.f32 %v5908_v23, 0.0  ;;  %v3494_v33 = vpack.c.bf16 %v3191_v15, %v3191_v15  ;;  %v2522_v46 = vadd.f32 %v2521_v16, %v5355_v52  ;;  %1893 = vmatmul.bf16.gmra.mxu2 %v1627_v53  ;;  %v1185_v29 = vadd.f32 %v1184_v0, %v4723_v54  ;;  %v7885_v15 = vld [vmem:[#allocation37_spill] sm:$0xff] }
 0x3a8   :  { %v5924_v53 = vadd.f32 %v7885_v15, %v4411_v36 }
 0x3a9   :  { %3623 = vst.msk [vmem:[%s7631_s5 + $0x2c] sm:$0xf] %vm3611_vm1, %v3494_v33  ;;  %v2798_v56 = vadd.f32 %v2522_v46, %v5544_v44  ;;  %1223 = vmatmul.bf16.gmra.mxu1 %v922_v28  ;;  %v2333_v47 = vpack.c.bf16 %v2229_v42, %v2228_v34  ;;  %v7886_v33 = vld [vmem:[#allocation39_spill] sm:$0xff]  ;;  %v5932_v0 = vadd.f32 %v1185_v29, %v5563_v20 }
 0x3aa   :  { %v1854_v45 = vpop.f32.mrf.mxu2  ;;  %v5928_v16 = vadd.f32 %v7886_v33, %v4411_v36  ;;  %v837_v46 = vmax.f32 %v5924_v53, 0.0 }
 0x3ab   :  { %v2926_v57 = vmax.f32 %v2798_v56, 0.0  ;;  %2563 = vmatmul.bf16.gmra.mxu3 %v2333_v47  ;;  %v1855_v44 = vadd.f32 %v1854_v45, %v5028_v14  ;;  %7888 = vst [vmem:[#allocation8_spill] sm:$0xff] %v5932_v0  ;;  %v7890_v47 = vld [vmem:[#allocation23_spill] sm:$0xff] }
 0x3ac   :  { %v3193_v61 = vpop.f32.mrf.mxu0  ;;  %7887 = vst [vmem:[#allocation6_spill] sm:$0xff] %v5928_v16  ;;  %v838_v56 = vmax.f32 %v5928_v16, 0.0 }
 0x3ad   :  { %v3194_v35 = vadd.f32 %v3193_v61, %v5654_v27  ;;  %v3039_v7 = vpack.c.bf16 %v2926_v57, %v2925_v3  ;;  %v5945_v45 = vadd.f32 %v1855_v44, %v7890_v47  ;;  %v1533_v3 = vmax.f32 %v5932_v0, 0.0  ;;  %v7892_v47 = vld [vmem:[#allocation27_spill] sm:$0xff] }
 0x3ae   :  { %v1186_v42 = vpop.f32.mrf.mxu1  ;;  %v2524_v34 = vpop.f32.mrf.mxu3 }
 0x3af   :  { %v3495_v28 = vpack.c.bf16 %v3194_v35, %v3194_v35  ;;  %v1187_v5 = vadd.f32 %v1186_v42, %v4723_v54  ;;  %3232 = vmatmul.bf16.gmra.mxu0 %v3039_v7  ;;  %v2525_v57 = vadd.f32 %v2524_v34, %v5355_v52  ;;  %v7891_v7 = vld [vmem:[#allocation21_spill] sm:$0xff]  ;;  %v2230_v42 = vmax.f32 %v5945_v45, 0.0 }
 0x3b1   :  { %3624 = vst.msk [vmem:[%s7631_s5 + $0x30] sm:$0xf] %vm3611_vm1, %v3495_v28  ;;  %v5940_v55 = vadd.f32 %v1187_v5, %v5554_v63  ;;  %v923_v5 = vpack.c.bf16 %v838_v56, %v837_v46  ;;  %v2799_v0 = vadd.f32 %v2525_v57, %v7892_v47 }
 0x3b2   :  { %v1856_v20 = vpop.f32.mrf.mxu2 }
 0x3b3   :  { %7889 = vst [vmem:[#allocation10_spill] sm:$0xff] %v5940_v55  ;;  %v1534_v29 = vmax.f32 %v5940_v55, 0.0  ;;  %v1857_v61 = vadd.f32 %v1856_v20, %v5028_v14 }
 0x3b4   :  { %v3195_v35 = vpop.f32.mrf.mxu0 }
 0x3b5   :  { %v5952_v63 = vadd.f32 %v1857_v61, %v7891_v7  ;;  %v3196_v15 = vadd.f32 %v3195_v35, %v5654_v27  ;;  %v1628_v33 = vpack.c.bf16 %v1534_v29, %v1533_v3  ;;  %v2927_v61 = vmax.f32 %v2799_v0, 0.0 }
 0x3b6   :  { %v1189_v44 = vpop.f32.mrf.mxu1  ;;  %v2526_v28 = vpop.f32.mrf.mxu3 }
 0x3b7   :  { %v2231_v55 = vmax.f32 %v5952_v63, 0.0  ;;  %v3496_v16 = vpack.c.bf16 %v3196_v15, %v3196_v15  ;;  %v2527_v34 = vadd.f32 %v2526_v28, %v5355_v52  ;;  %1898 = vmatmul.bf16.gmra.mxu2 %v1628_v33  ;;  %v1190_v46 = vadd.f32 %v1189_v44, %v4723_v54  ;;  %v7893_v15 = vld [vmem:[#allocation40_spill] sm:$0xff] }
 0x3b8   :  { %v5968_v33 = vadd.f32 %v7893_v15, %v4411_v36 }
 0x3b9   :  { %3625 = vst.msk [vmem:[%s7631_s5 + $0x34] sm:$0xf] %vm3611_vm1, %v3496_v16  ;;  %v2800_v20 = vadd.f32 %v2527_v34, %v5578_v40  ;;  %1228 = vmatmul.bf16.gmra.mxu1 %v923_v5  ;;  %v2334_v3 = vpack.c.bf16 %v2231_v55, %v2230_v42  ;;  %v7894_v16 = vld [vmem:[#allocation41_spill] sm:$0xff]  ;;  %v5976_v42 = vadd.f32 %v1190_v46, %v5588_v39 }
 0x3ba   :  { %v1859_v29 = vpop.f32.mrf.mxu2  ;;  %v5972_v28 = vadd.f32 %v7894_v16, %v4411_v36  ;;  %v839_v34 = vmax.f32 %v5968_v33, 0.0 }
 0x3bb   :  { %v2928_v56 = vmax.f32 %v2800_v20, 0.0  ;;  %2568 = vmatmul.bf16.gmra.mxu3 %v2334_v3  ;;  %v1860_v40 = vadd.f32 %v1859_v29, %v5028_v14  ;;  %v1535_v29 = vmax.f32 %v5976_v42, 0.0 }
 0x3bc   :  { %v3198_v57 = vpop.f32.mrf.mxu0  ;;  %v840_v20 = vmax.f32 %v5972_v28, 0.0 }
 0x3bd   :  { %v3199_v35 = vadd.f32 %v3198_v57, %v5654_v27  ;;  %v3040_v7 = vpack.c.bf16 %v2928_v56, %v2927_v61  ;;  %v5989_v3 = vadd.f32 %v1860_v40, %v5595_v58 }
 0x3be   :  { %v1191_v55 = vpop.f32.mrf.mxu1  ;;  %v2529_v0 = vpop.f32.mrf.mxu3  ;;  %v924_v40 = vpack.c.bf16 %v840_v20, %v839_v34 }
 0x3bf   :  { %v3497_v44 = vpack.c.bf16 %v3199_v35, %v3199_v35  ;;  %v1192_v5 = vadd.f32 %v1191_v55, %v4723_v54  ;;  %3237 = vmatmul.bf16.gmra.mxu0 %v3040_v7  ;;  %7895 = vst [vmem:[#allocation11_spill] sm:$0xff] %v5989_v3  ;;  %v2530_v46 = vadd.f32 %v2529_v0, %v5355_v52  ;;  %v2232_v15 = vmax.f32 %v5989_v3, 0.0 }
 0x3c1   :  { %3626 = vst.msk [vmem:[%s7631_s5 + $0x38] sm:$0xf] %vm3611_vm1, %v3497_v44  ;;  %v5984_v47 = vadd.f32 %v1192_v5, %v5592_v22  ;;  %v2801_v55 = vadd.f32 %v2530_v46, %v5606_v30 }
 0x3c2   :  { %v1861_v39 = vpop.f32.mrf.mxu2 }
 0x3c3   :  { %v1536_v61 = vmax.f32 %v5984_v47, 0.0  ;;  %v1862_v56 = vadd.f32 %v1861_v39, %v5028_v14 }
 0x3c4   :  { %v3200_v57 = vpop.f32.mrf.mxu0 }
 0x3c5   :  { %v5996_v22 = vadd.f32 %v1862_v56, %v5600_v2  ;;  %v3201_v35 = vadd.f32 %v3200_v57, %v5654_v27  ;;  %v1629_v7 = vpack.c.bf16 %v1536_v61, %v1535_v29  ;;  %v7897_v2 = vld [vmem:[#allocation25_spill] sm:$0xff]  ;;  %v2929_v56 = vmax.f32 %v2801_v55, 0.0 }
 0x3c6   :  { %v1194_v58 = vpop.f32.mrf.mxu1  ;;  %v2531_v16 = vpop.f32.mrf.mxu3 }
 0x3c7   :  { %7896 = vst [vmem:[#allocation7_spill] sm:$0xff] %v5996_v22  ;;  %v2233_v44 = vmax.f32 %v5996_v22, 0.0  ;;  %v3498_v5 = vpack.c.bf16 %v3201_v35, %v3201_v35  ;;  %v2532_v0 = vadd.f32 %v2531_v16, %v5355_v52  ;;  %1903 = vmatmul.bf16.gmra.mxu2 %v1629_v7  ;;  %v1195_v34 = vadd.f32 %v1194_v58, %v4723_v54  ;;  %v7898_v35 = vld [vmem:[#allocation42_spill] sm:$0xff]  ;;  %v7900_v16 = vld [vmem:[#allocation44_spill] sm:$0xff]  ;;  %v7909_v22 = vld [vmem:[#allocation79_spill] sm:$0xff] }
 0x3c8   :  { %v6012_v7 = vadd.f32 %v7898_v35, %v4411_v36 }
 0x3c9   :  { %3627 = vst.msk [vmem:[%s7631_s5 + $0x3c] sm:$0xf] %vm3611_vm1, %v3498_v5  ;;  %v2802_v39 = vadd.f32 %v2532_v0, %v7897_v2  ;;  %1233 = vmatmul.bf16.gmra.mxu1 %v924_v40  ;;  %v2335_v29 = vpack.c.bf16 %v2233_v44, %v2232_v15  ;;  %v6016_v5 = vadd.f32 %v7900_v16, %v4411_v36  ;;  %v7902_v44 = vld [vmem:[#allocation31_spill] sm:$0xff] }
 0x3ca   :  { %v1864_v61 = vpop.f32.mrf.mxu2  ;;  %7899 = vst [vmem:[#allocation5_spill] sm:$0xff] %v6012_v7  ;;  %v6020_v58 = vadd.f32 %v1195_v34, %v7902_v44  ;;  %v7907_v44 = vld [vmem:[#allocation32_spill] sm:$0xff] }
 0x3cb   :  { %v2930_v30 = vmax.f32 %v2802_v39, 0.0  ;;  %2573 = vmatmul.bf16.gmra.mxu3 %v2335_v29  ;;  %7901 = vst [vmem:[#allocation9_spill] sm:$0xff] %v6016_v5  ;;  %v1865_v15 = vadd.f32 %v1864_v61, %v5028_v14  ;;  %v7904_v39 = vld [vmem:[#allocation29_spill] sm:$0xff]  ;;  %v842_v61 = vmax.f32 %v6016_v5, 0.0 }
 0x3cc   :  { %v3203_v20 = vpop.f32.mrf.mxu0  ;;  %7903 = vst [vmem:[#allocation84_spill] sm:$0xff] %v6020_v58 }
 0x3cd   :  { %v3204_v46 = vadd.f32 %v3203_v20, %v5654_v27  ;;  %v3041_v57 = vpack.c.bf16 %v2930_v30, %v2929_v56  ;;  %v841_v56 = vmax.f32 %v6012_v7, 0.0  ;;  %v7906_v30 = vld [vmem:[#allocation34_spill] sm:$0xff] }
 0x3ce   :  { %v1196_v40 = vpop.f32.mrf.mxu1  ;;  %v2534_v55 = vpop.f32.mrf.mxu3  ;;  %v6033_v20 = vadd.f32 %v1865_v15, %v7906_v30 }
 0x3cf   :  { %v3499_v0 = vpack.c.bf16 %v3204_v46, %v3204_v46  ;;  %v1197_v2 = vadd.f32 %v1196_v40, %v4723_v54  ;;  %3242 = vmatmul.bf16.gmra.mxu0 %v3041_v57  ;;  %v1537_v46 = vmax.f32 %v6020_v58, 0.0  ;;  %v2535_v35 = vadd.f32 %v2534_v55, %v5355_v52 }
 0x3d0   :  { %v2234_v5 = vmax.f32 %v6033_v20, 0.0  ;;  %v925_v7 = vpack.c.bf16 %v842_v61, %v841_v56 }
 0x3d1   :  { %3628 = vst.msk [vmem:[%s7631_s5 + $0x40] sm:$0xf] %vm3611_vm1, %v3499_v0  ;;  %v6028_v29 = vadd.f32 %v1197_v2, %v7904_v39  ;;  %v2803_v58 = vadd.f32 %v2535_v35, %v7909_v22 }
 0x3d2   :  { %v1866_v34 = vpop.f32.mrf.mxu2 }
 0x3d3   :  { %7905 = vst [vmem:[#allocation87_spill] sm:$0xff] %v6028_v29  ;;  %v1538_v57 = vmax.f32 %v6028_v29, 0.0  ;;  %v1867_v16 = vadd.f32 %v1866_v34, %v5028_v14  ;;  %v7910_v34 = vld [vmem:[#allocation81_spill] sm:$0xff] }
 0x3d4   :  { %v3205_v40 = vpop.f32.mrf.mxu0 }
 0x3d5   :  { %v6040_v0 = vadd.f32 %v1867_v16, %v7907_v44  ;;  %v3206_v2 = vadd.f32 %v3205_v40, %v5654_v27  ;;  %v1630_v39 = vpack.c.bf16 %v1538_v57, %v1537_v46  ;;  %v2931_v40 = vmax.f32 %v2803_v58, 0.0 }
 0x3d6   :  { %v1199_v15 = vpop.f32.mrf.mxu1  ;;  %v2536_v30 = vpop.f32.mrf.mxu3 }
 0x3d7   :  { %7908 = vst [vmem:[#allocation12_spill] sm:$0xff] %v6040_v0  ;;  %v2235_v29 = vmax.f32 %v6040_v0, 0.0  ;;  %v3500_v3 = vpack.c.bf16 %v3206_v2, %v3206_v2  ;;  %v2537_v55 = vadd.f32 %v2536_v30, %v5355_v52  ;;  %1908 = vmatmul.bf16.gmra.mxu2 %v1630_v39  ;;  %v1200_v56 = vadd.f32 %v1199_v15, %v4723_v54  ;;  %v7911_v2 = vld [vmem:[#allocation47_spill] sm:$0xff] }
 0x3d8   :  { %v6056_v39 = vadd.f32 %v7911_v2, %v4411_v36 }
 0x3d9   :  { %3629 = vst.msk [vmem:[%s7631_s5 + $0x44] sm:$0xf] %vm3611_vm1, %v3500_v3  ;;  %v2804_v46 = vadd.f32 %v2537_v55, %v7910_v34  ;;  %1238 = vmatmul.bf16.gmra.mxu1 %v925_v7  ;;  %v2336_v57 = vpack.c.bf16 %v2235_v29, %v2234_v5  ;;  %v7913_v3 = vld [vmem:[#allocation49_spill] sm:$0xff]  ;;  %v7915_v29 = vld [vmem:[#allocation38_spill] sm:$0xff] }
 0x3da   :  { %v1869_v16 = vpop.f32.mrf.mxu2  ;;  %7912 = vst [vmem:[#allocation14_spill] sm:$0xff] %v6056_v39  ;;  %v6060_v30 = vadd.f32 %v7913_v3, %v4411_v36  ;;  %v6064_v15 = vadd.f32 %v1200_v56, %v7915_v29  ;;  %v7920_v29 = vld [vmem:[#allocation83_spill] sm:$0xff] }
 0x3db   :  { %v2932_v22 = vmax.f32 %v2804_v46, 0.0  ;;  %2578 = vmatmul.bf16.gmra.mxu3 %v2336_v57  ;;  %v1870_v7 = vadd.f32 %v1869_v16, %v5028_v14  ;;  %v7917_v46 = vld [vmem:[#allocation36_spill] sm:$0xff] }
 0x3dc   :  { %v3208_v61 = vpop.f32.mrf.mxu0  ;;  %7914 = vst [vmem:[#allocation15_spill] sm:$0xff] %v6060_v30  ;;  %v844_v16 = vmax.f32 %v6060_v30, 0.0 }
 0x3dd   :  { %v3209_v35 = vadd.f32 %v3208_v61, %v5654_v27  ;;  %v3042_v44 = vpack.c.bf16 %v2932_v22, %v2931_v40  ;;  %7916 = vst [vmem:[#allocation86_spill] sm:$0xff] %v6064_v15  ;;  %v843_v40 = vmax.f32 %v6056_v39, 0.0  ;;  %v7919_v22 = vld [vmem:[#allocation3_spill] sm:$0xff] }
 0x3de   :  { %v1201_v5 = vpop.f32.mrf.mxu1  ;;  %v2539_v58 = vpop.f32.mrf.mxu3  ;;  %v6077_v61 = vadd.f32 %v1870_v7, %v7919_v22 }
 0x3df   :  { %v3501_v55 = vpack.c.bf16 %v3209_v35, %v3209_v35  ;;  %v1202_v34 = vadd.f32 %v1201_v5, %v4723_v54  ;;  %3247 = vmatmul.bf16.gmra.mxu0 %v3042_v44  ;;  %v1539_v35 = vmax.f32 %v6064_v15, 0.0  ;;  %v2540_v2 = vadd.f32 %v2539_v58, %v5355_v52 }
 0x3e0   :  { %v2236_v30 = vmax.f32 %v6077_v61, 0.0  ;;  %v926_v39 = vpack.c.bf16 %v844_v16, %v843_v40 }
 0x3e1   :  { %3630 = vst.msk [vmem:[%s7631_s5 + $0x48] sm:$0xf] %vm3611_vm1, %v3501_v55  ;;  %v6072_v57 = vadd.f32 %v1202_v34, %v7917_v46  ;;  %v2805_v15 = vadd.f32 %v2540_v2, %v5681_v60 }
 0x3e2   :  { %v1871_v56 = vpop.f32.mrf.mxu2 }
 0x3e3   :  { %7918 = vst [vmem:[#allocation13_spill] sm:$0xff] %v6072_v57  ;;  %v1540_v44 = vmax.f32 %v6072_v57, 0.0  ;;  %v1872_v3 = vadd.f32 %v1871_v56, %v5028_v14 }
 0x3e4   :  { %v3210_v5 = vpop.f32.mrf.mxu0 }
 0x3e5   :  { %v6084_v55 = vadd.f32 %v1872_v3, %v7920_v29  ;;  %v3211_v34 = vadd.f32 %v3210_v5, %v5654_v27  ;;  %v1631_v46 = vpack.c.bf16 %v1540_v44, %v1539_v35  ;;  %v2933_v3 = vmax.f32 %v2805_v15, 0.0  ;;  %v7921_v29 = vld [vmem:[#allocation51_spill] sm:$0xff] }
 0x3e6   :  { %v1204_v7 = vpop.f32.mrf.mxu1  ;;  %v2541_v22 = vpop.f32.mrf.mxu3 }
 0x3e7   :  { %v2237_v57 = vmax.f32 %v6084_v55, 0.0  ;;  %v3502_v0 = vpack.c.bf16 %v3211_v34, %v3211_v34  ;;  %v2542_v58 = vadd.f32 %v2541_v22, %v5355_v52  ;;  %1913 = vmatmul.bf16.gmra.mxu2 %v1631_v46  ;;  %v1205_v40 = vadd.f32 %v1204_v7, %v4723_v54 }
 0x3e8   :  { %v6100_v34 = vadd.f32 %v7921_v29, %v4411_v36 }
 0x3e9   :  { %3631 = vst.msk [vmem:[%s7631_s5 + $0x4c] sm:$0xf] %vm3611_vm1, %v3502_v0  ;;  %v2806_v56 = vadd.f32 %v2542_v58, %v5688_v41  ;;  %1243 = vmatmul.bf16.gmra.mxu1 %v926_v39  ;;  %v2337_v35 = vpack.c.bf16 %v2237_v57, %v2236_v30  ;;  %v7922_v0 = vld [vmem:[#allocation53_spill] sm:$0xff]  ;;  %v6108_v15 = vadd.f32 %v1205_v40, %v5704_v8 }
 0x3ea   :  { %v1874_v44 = vpop.f32.mrf.mxu2  ;;  %v6104_v46 = vadd.f32 %v7922_v0, %v4411_v36  ;;  %v845_v58 = vmax.f32 %v6100_v34, 0.0 }
 0x3eb   :  { %v2934_v60 = vmax.f32 %v2806_v56, 0.0  ;;  %2583 = vmatmul.bf16.gmra.mxu3 %v2337_v35  ;;  %v1875_v41 = vadd.f32 %v1874_v44, %v5028_v14  ;;  %v1541_v44 = vmax.f32 %v6108_v15, 0.0 }
 0x3ec   :  { %v3213_v16 = vpop.f32.mrf.mxu0  ;;  %v846_v56 = vmax.f32 %v6104_v46, 0.0 }
 0x3ed   :  { %v3214_v2 = vadd.f32 %v3213_v16, %v5654_v27  ;;  %v3043_v5 = vpack.c.bf16 %v2934_v60, %v2933_v3  ;;  %v6121_v35 = vadd.f32 %v1875_v41, %v5712_v1 }
 0x3ee   :  { %v1206_v39 = vpop.f32.mrf.mxu1  ;;  %v2544_v30 = vpop.f32.mrf.mxu3  ;;  %v927_v41 = vpack.c.bf16 %v846_v56, %v845_v58 }
 0x3ef   :  { %v3503_v57 = vpack.c.bf16 %v3214_v2, %v3214_v2  ;;  %v1207_v7 = vadd.f32 %v1206_v39, %v4723_v54  ;;  %3252 = vmatmul.bf16.gmra.mxu0 %v3043_v5  ;;  %v2545_v40 = vadd.f32 %v2544_v30, %v5355_v52  ;;  %v2238_v29 = vmax.f32 %v6121_v35, 0.0 }
 0x3f1   :  { %3632 = vst.msk [vmem:[%s7631_s5 + $0x50] sm:$0xf] %vm3611_vm1, %v3503_v57  ;;  %v6116_v22 = vadd.f32 %v1207_v7, %v5708_v49  ;;  %v2807_v39 = vadd.f32 %v2545_v40, %v5725_v4 }
 0x3f2   :  { %v1876_v8 = vpop.f32.mrf.mxu2 }
 0x3f3   :  { %v1542_v3 = vmax.f32 %v6116_v22, 0.0  ;;  %v1877_v60 = vadd.f32 %v1876_v8, %v5028_v14 }
 0x3f4   :  { %v3215_v16 = vpop.f32.mrf.mxu0 }
 0x3f5   :  { %v6128_v49 = vadd.f32 %v1877_v60, %v5720_v9  ;;  %v3216_v2 = vadd.f32 %v3215_v16, %v5654_v27  ;;  %v1632_v5 = vpack.c.bf16 %v1542_v3, %v1541_v44  ;;  %v2935_v3 = vmax.f32 %v2807_v39, 0.0  ;;  %v7923_v16 = vld [vmem:[#allocation56_spill] sm:$0xff] }
 0x3f6   :  { %v1209_v1 = vpop.f32.mrf.mxu1  ;;  %v2546_v0 = vpop.f32.mrf.mxu3 }
 0x3f7   :  { %v2239_v57 = vmax.f32 %v6128_v49, 0.0  ;;  %v3504_v7 = vpack.c.bf16 %v3216_v2, %v3216_v2  ;;  %v2547_v30 = vadd.f32 %v2546_v0, %v5355_v52  ;;  %1918 = vmatmul.bf16.gmra.mxu2 %v1632_v5  ;;  %v1210_v58 = vadd.f32 %v1209_v1, %v4723_v54  ;;  %v7924_v5 = vld [vmem:[#allocation58_spill] sm:$0xff] }
 0x3f8   :  { %v6144_v2 = vadd.f32 %v7923_v16, %v4411_v36  ;;  %v6148_v0 = vadd.f32 %v7924_v5, %v4411_v36 }
 0x3f9   :  { %3633 = vst.msk [vmem:[%s7631_s5 + $0x54] sm:$0xf] %vm3611_vm1, %v3504_v7  ;;  %v2808_v9 = vadd.f32 %v2547_v30, %v5732_v43  ;;  %1248 = vmatmul.bf16.gmra.mxu1 %v927_v41  ;;  %v2338_v8 = vpack.c.bf16 %v2239_v57, %v2238_v29  ;;  %v6152_v1 = vadd.f32 %v1210_v58, %v5748_v62 }
 0x3fa   :  { %v1879_v44 = vpop.f32.mrf.mxu2  ;;  %v847_v30 = vmax.f32 %v6144_v2, 0.0 }
 0x3fb   :  { %v2936_v4 = vmax.f32 %v2808_v9, 0.0  ;;  %2588 = vmatmul.bf16.gmra.mxu3 %v2338_v8  ;;  %v1880_v43 = vadd.f32 %v1879_v44, %v5028_v14  ;;  %v848_v9 = vmax.f32 %v6148_v0, 0.0  ;;  %v1543_v44 = vmax.f32 %v6152_v1, 0.0 }
 0x3fc   :  { %v3218_v56 = vpop.f32.mrf.mxu0 }
 0x3fd   :  { %v3219_v40 = vadd.f32 %v3218_v56, %v5654_v27  ;;  %v3044_v60 = vpack.c.bf16 %v2936_v4, %v2935_v3  ;;  %v6165_v8 = vadd.f32 %v1880_v43, %v5756_v10  ;;  %v928_v43 = vpack.c.bf16 %v848_v9, %v847_v30 }
 0x3fe   :  { %v1211_v29 = vpop.f32.mrf.mxu1  ;;  %v2549_v41 = vpop.f32.mrf.mxu3 }
 0x3ff   :  { %v3505_v39 = vpack.c.bf16 %v3219_v40, %v3219_v40  ;;  %v1212_v57 = vadd.f32 %v1211_v29, %v4723_v54  ;;  %3257 = vmatmul.bf16.gmra.mxu0 %v3044_v60  ;;  %v2550_v58 = vadd.f32 %v2549_v41, %v5355_v52  ;;  %v2240_v16 = vmax.f32 %v6165_v8, 0.0 }
 0x401   :  { %3634 = vst.msk [vmem:[%s7631_s5 + $0x58] sm:$0xf] %vm3611_vm1, %v3505_v39  ;;  %v6160_v7 = vadd.f32 %v1212_v57, %v5752_v25  ;;  %v2809_v29 = vadd.f32 %v2550_v58, %v5769_v17 }
 0x402   :  { %v1881_v62 = vpop.f32.mrf.mxu2 }
 0x403   :  { %v1544_v3 = vmax.f32 %v6160_v7, 0.0  ;;  %v1882_v4 = vadd.f32 %v1881_v62, %v5028_v14 }
 0x404   :  { %v3220_v56 = vpop.f32.mrf.mxu0 }
 0x405   :  { %v6172_v25 = vadd.f32 %v1882_v4, %v5764_v51  ;;  %v3221_v40 = vadd.f32 %v3220_v56, %v5654_v27  ;;  %v1633_v60 = vpack.c.bf16 %v1544_v3, %v1543_v44  ;;  %v2937_v3 = vmax.f32 %v2809_v29, 0.0  ;;  %v7925_v56 = vld [vmem:[#allocation63_spill] sm:$0xff] }
 0x406   :  { %v1214_v10 = vpop.f32.mrf.mxu1  ;;  %v2551_v5 = vpop.f32.mrf.mxu3 }
 0x407   :  { %v2241_v39 = vmax.f32 %v6172_v25, 0.0  ;;  %v3506_v57 = vpack.c.bf16 %v3221_v40, %v3221_v40  ;;  %v2552_v41 = vadd.f32 %v2551_v5, %v5355_v52  ;;  %1923 = vmatmul.bf16.gmra.mxu2 %v1633_v60  ;;  %v1215_v30 = vadd.f32 %v1214_v10, %v4723_v54  ;;  %v7926_v60 = vld [vmem:[#allocation65_spill] sm:$0xff] }
 0x408   :  { %v6188_v40 = vadd.f32 %v7925_v56, %v4411_v36  ;;  %v6192_v5 = vadd.f32 %v7926_v60, %v4411_v36 }
 0x409   :  { %3635 = vst.msk [vmem:[%s7631_s5 + $0x5c] sm:$0xf] %vm3611_vm1, %v3506_v57  ;;  %v2810_v51 = vadd.f32 %v2552_v41, %v5776_v21  ;;  %1253 = vmatmul.bf16.gmra.mxu1 %v928_v43  ;;  %v2339_v62 = vpack.c.bf16 %v2241_v39, %v2240_v16  ;;  %v6196_v10 = vadd.f32 %v1215_v30, %v5792_v19 }
 0x40a   :  { %v1884_v44 = vpop.f32.mrf.mxu2  ;;  %v849_v41 = vmax.f32 %v6188_v40, 0.0 }
 0x40b   :  { %v2938_v17 = vmax.f32 %v2810_v51, 0.0  ;;  %2593 = vmatmul.bf16.gmra.mxu3 %v2339_v62  ;;  %v1885_v21 = vadd.f32 %v1884_v44, %v5028_v14  ;;  %v850_v51 = vmax.f32 %v6192_v5, 0.0  ;;  %v1545_v44 = vmax.f32 %v6196_v10, 0.0 }
 0x40c   :  { %v3223_v9 = vpop.f32.mrf.mxu0 }
 0x40d   :  { %v3224_v58 = vadd.f32 %v3223_v9, %v5654_v27  ;;  %v3045_v4 = vpack.c.bf16 %v2938_v17, %v2937_v3  ;;  %v6209_v62 = vadd.f32 %v1885_v21, %v5800_v37  ;;  %v929_v21 = vpack.c.bf16 %v850_v51, %v849_v41 }
 0x40e   :  { %v1216_v16 = vpop.f32.mrf.mxu1  ;;  %v2554_v43 = vpop.f32.mrf.mxu3 }
 0x40f   :  { %v3507_v29 = vpack.c.bf16 %v3224_v58, %v3224_v58  ;;  %v1217_v39 = vadd.f32 %v1216_v16, %v4723_v54  ;;  %3262 = vmatmul.bf16.gmra.mxu0 %v3045_v4  ;;  %v2555_v30 = vadd.f32 %v2554_v43, %v5355_v52  ;;  %v2242_v56 = vmax.f32 %v6209_v62, 0.0 }
 0x411   :  { %3636 = vst.msk [vmem:[%s7631_s5 + $0x60] sm:$0xf] %vm3611_vm1, %v3507_v29  ;;  %v6204_v57 = vadd.f32 %v1217_v39, %v5796_v18  ;;  %v2811_v16 = vadd.f32 %v2555_v30, %v5813_v31 }
 0x412   :  { %v1886_v19 = vpop.f32.mrf.mxu2 }
 0x413   :  { %v1546_v3 = vmax.f32 %v6204_v57, 0.0  ;;  %v1887_v17 = vadd.f32 %v1886_v19, %v5028_v14 }
 0x414   :  { %v3225_v9 = vpop.f32.mrf.mxu0 }
 0x415   :  { %v6216_v18 = vadd.f32 %v1887_v17, %v5808_v32  ;;  %v3226_v58 = vadd.f32 %v3225_v9, %v5654_v27  ;;  %v1634_v4 = vpack.c.bf16 %v1546_v3, %v1545_v44  ;;  %v2939_v3 = vmax.f32 %v2811_v16, 0.0  ;;  %v7927_v9 = vld [vmem:[#allocation67_spill] sm:$0xff] }
 0x416   :  { %v1219_v37 = vpop.f32.mrf.mxu1  ;;  %v2556_v60 = vpop.f32.mrf.mxu3 }
 0x417   :  { %v2243_v29 = vmax.f32 %v6216_v18, 0.0  ;;  %v3508_v39 = vpack.c.bf16 %v3226_v58, %v3226_v58  ;;  %v2557_v43 = vadd.f32 %v2556_v60, %v5355_v52  ;;  %1928 = vmatmul.bf16.gmra.mxu2 %v1634_v4  ;;  %v1220_v41 = vadd.f32 %v1219_v37, %v4723_v54  ;;  %v7928_v4 = vld [vmem:[#allocation69_spill] sm:$0xff] }
 0x418   :  { %v6232_v58 = vadd.f32 %v7927_v9, %v4411_v36  ;;  %v6236_v60 = vadd.f32 %v7928_v4, %v4411_v36 }
 0x419   :  { %3637 = vst.msk [vmem:[%s7631_s5 + $0x64] sm:$0xf] %vm3611_vm1, %v3508_v39  ;;  %v2812_v32 = vadd.f32 %v2557_v43, %v5820_v59  ;;  %1258 = vmatmul.bf16.gmra.mxu1 %v929_v21  ;;  %v2340_v19 = vpack.c.bf16 %v2243_v29, %v2242_v56  ;;  %v6240_v37 = vadd.f32 %v1220_v41, %v5836_v50 }
 0x41a   :  { %v1889_v44 = vpop.f32.mrf.mxu2  ;;  %v851_v43 = vmax.f32 %v6232_v58, 0.0 }
 0x41b   :  { %v2940_v31 = vmax.f32 %v2812_v32, 0.0  ;;  %2598 = vmatmul.bf16.gmra.mxu3 %v2340_v19  ;;  %v1890_v59 = vadd.f32 %v1889_v44, %v5028_v14  ;;  %v852_v32 = vmax.f32 %v6236_v60, 0.0  ;;  %v1547_v44 = vmax.f32 %v6240_v37, 0.0 }
 0x41c   :  { %v3228_v51 = vpop.f32.mrf.mxu0 }
 0x41d   :  { %v3229_v30 = vadd.f32 %v3228_v51, %v5654_v27  ;;  %v3046_v17 = vpack.c.bf16 %v2940_v31, %v2939_v3  ;;  %v6253_v19 = vadd.f32 %v1890_v59, %v5844_v12  ;;  %v930_v59 = vpack.c.bf16 %v852_v32, %v851_v43 }
 0x41e   :  { %v1221_v56 = vpop.f32.mrf.mxu1  ;;  %v2559_v21 = vpop.f32.mrf.mxu3 }
 0x41f   :  { %v3509_v16 = vpack.c.bf16 %v3229_v30, %v3229_v30  ;;  %v1222_v29 = vadd.f32 %v1221_v56, %v4723_v54  ;;  %3267 = vmatmul.bf16.gmra.mxu0 %v3046_v17  ;;  %v2560_v41 = vadd.f32 %v2559_v21, %v5355_v52  ;;  %v2244_v9 = vmax.f32 %v6253_v19, 0.0 }
 0x421   :  { %3638 = vst.msk [vmem:[%s7631_s5 + $0x68] sm:$0xf] %vm3611_vm1, %v3509_v16  ;;  %v6248_v39 = vadd.f32 %v1222_v29, %v5840_v24  ;;  %v2813_v56 = vadd.f32 %v2560_v41, %v5857_v13 }
 0x422   :  { %v1891_v50 = vpop.f32.mrf.mxu2 }
 0x423   :  { %v1548_v3 = vmax.f32 %v6248_v39, 0.0  ;;  %v1892_v31 = vadd.f32 %v1891_v50, %v5028_v14 }
 0x424   :  { %v3230_v51 = vpop.f32.mrf.mxu0 }
 0x425   :  { %v6260_v24 = vadd.f32 %v1892_v31, %v5852_v48  ;;  %v3231_v30 = vadd.f32 %v3230_v51, %v5654_v27  ;;  %v1635_v17 = vpack.c.bf16 %v1548_v3, %v1547_v44  ;;  %v2941_v3 = vmax.f32 %v2813_v56, 0.0  ;;  %v7929_v51 = vld [vmem:[#allocation43_spill] sm:$0xff] }
 0x426   :  { %v1224_v12 = vpop.f32.mrf.mxu1  ;;  %v2561_v4 = vpop.f32.mrf.mxu3 }
 0x427   :  { %v2245_v16 = vmax.f32 %v6260_v24, 0.0  ;;  %v3510_v29 = vpack.c.bf16 %v3231_v30, %v3231_v30  ;;  %v2562_v21 = vadd.f32 %v2561_v4, %v5355_v52  ;;  %1933 = vmatmul.bf16.gmra.mxu2 %v1635_v17  ;;  %v1225_v43 = vadd.f32 %v1224_v12, %v4723_v54  ;;  %v7930_v17 = vld [vmem:[#allocation45_spill] sm:$0xff] }
 0x428   :  { %v6276_v30 = vadd.f32 %v7929_v51, %v4411_v36  ;;  %v6280_v4 = vadd.f32 %v7930_v17, %v4411_v36 }
 0x429   :  { %3639 = vst.msk [vmem:[%s7631_s5 + $0x6c] sm:$0xf] %vm3611_vm1, %v3510_v29  ;;  %v2814_v48 = vadd.f32 %v2562_v21, %v5864_v6  ;;  %1263 = vmatmul.bf16.gmra.mxu1 %v930_v59  ;;  %v2341_v50 = vpack.c.bf16 %v2245_v16, %v2244_v9  ;;  %v6284_v12 = vadd.f32 %v1225_v43, %v5880_v26 }
 0x42a   :  { %v1894_v44 = vpop.f32.mrf.mxu2  ;;  %v853_v21 = vmax.f32 %v6276_v30, 0.0 }
 0x42b   :  { %v2942_v13 = vmax.f32 %v2814_v48, 0.0  ;;  %2603 = vmatmul.bf16.gmra.mxu3 %v2341_v50  ;;  %v1895_v6 = vadd.f32 %v1894_v44, %v5028_v14  ;;  %7931 = vst [vmem:[#allocation88_spill] sm:$0xff] %v6284_v12  ;;  %v854_v48 = vmax.f32 %v6280_v4, 0.0  ;;  %v7933_v50 = vld [vmem:[#allocation2_spill] sm:$0xff] }
 0x42c   :  { %v3233_v32 = vpop.f32.mrf.mxu0 }
 0x42d   :  { %v3234_v41 = vadd.f32 %v3233_v32, %v5654_v27  ;;  %v3047_v31 = vpack.c.bf16 %v2942_v13, %v2941_v3  ;;  %v6297_v44 = vadd.f32 %v1895_v6, %v7933_v50  ;;  %v1549_v3 = vmax.f32 %v6284_v12, 0.0 }
 0x42e   :  { %v1226_v9 = vpop.f32.mrf.mxu1  ;;  %v2564_v59 = vpop.f32.mrf.mxu3 }
 0x42f   :  { %v3511_v56 = vpack.c.bf16 %v3234_v41, %v3234_v41  ;;  %v1227_v16 = vadd.f32 %v1226_v9, %v4723_v54  ;;  %3272 = vmatmul.bf16.gmra.mxu0 %v3047_v31  ;;  %v2565_v13 = vadd.f32 %v2564_v59, %v5355_v52  ;;  %v7934_v31 = vld [vmem:[#allocation4_spill] sm:$0xff]  ;;  %v2246_v9 = vmax.f32 %v6297_v44, 0.0 }
 0x431   :  { %3640 = vst.msk [vmem:[%s7631_s5 + $0x70] sm:$0xf] %vm3611_vm1, %v3511_v56  ;;  %v6292_v29 = vadd.f32 %v1227_v16, %v5884_v38  ;;  %v931_v16 = vpack.c.bf16 %v854_v48, %v853_v21  ;;  %v2815_v50 = vadd.f32 %v2565_v13, %v5901_v11 }
 0x432   :  { %v1896_v26 = vpop.f32.mrf.mxu2 }
 0x433   :  { %7932 = vst [vmem:[#allocation16_spill] sm:$0xff] %v6292_v29  ;;  %v1550_v43 = vmax.f32 %v6292_v29, 0.0  ;;  %v1897_v32 = vadd.f32 %v1896_v26, %v5028_v14 }
 0x434   :  { %v3235_v41 = vpop.f32.mrf.mxu0 }
 0x435   :  { %v6304_v38 = vadd.f32 %v1897_v32, %v7934_v31  ;;  %v3236_v51 = vadd.f32 %v3235_v41, %v5654_v27  ;;  %v1636_v17 = vpack.c.bf16 %v1550_v43, %v1549_v3  ;;  %v2943_v32 = vmax.f32 %v2815_v50, 0.0  ;;  %v7935_v31 = vld [vmem:[#allocation46_spill] sm:$0xff] }
 0x436   :  { %v1229_v6 = vpop.f32.mrf.mxu1  ;;  %v2566_v56 = vpop.f32.mrf.mxu3  ;;  %v7939_v50 = vld [vmem:[#allocation6_spill] sm:$0xff] }
 0x437   :  { %v2247_v29 = vmax.f32 %v6304_v38, 0.0  ;;  %v3512_v12 = vpack.c.bf16 %v3236_v51, %v3236_v51  ;;  %v2567_v59 = vadd.f32 %v2566_v56, %v5355_v52  ;;  %1938 = vmatmul.bf16.gmra.mxu2 %v1636_v17  ;;  %v1230_v21 = vadd.f32 %v1229_v6, %v4723_v54 }
 0x438   :  { %v6320_v51 = vadd.f32 %v7935_v31, %v4411_v36  ;;  %v7942_v31 = vld [vmem:[#allocation10_spill] sm:$0xff] }
 0x439   :  { %3641 = vst.msk [vmem:[%s7631_s5 + $0x74] sm:$0xf] %vm3611_vm1, %v3512_v12  ;;  %v2816_v26 = vadd.f32 %v2567_v59, %v5908_v23  ;;  %1268 = vmatmul.bf16.gmra.mxu1 %v931_v16  ;;  %v2342_v3 = vpack.c.bf16 %v2247_v29, %v2246_v9  ;;  %v7936_v12 = vld [vmem:[#allocation48_spill] sm:$0xff]  ;;  %v6328_v6 = vadd.f32 %v1230_v21, %v5924_v53 }
 0x43a   :  { %v1899_v43 = vpop.f32.mrf.mxu2  ;;  %v6324_v17 = vadd.f32 %v7936_v12, %v4411_v36 }
 0x43b   :  { %v2944_v11 = vmax.f32 %v2816_v26, 0.0  ;;  %2608 = vmatmul.bf16.gmra.mxu3 %v2342_v3  ;;  %v1900_v23 = vadd.f32 %v1899_v43, %v5028_v14  ;;  %7938 = vst [vmem:[#allocation20_spill] sm:$0xff] %v6328_v6  ;;  %v855_v26 = vmax.f32 %v6320_v51, 0.0  ;;  %v7941_v43 = vld [vmem:[#allocation8_spill] sm:$0xff]  ;;  %v1551_v21 = vmax.f32 %v6328_v6, 0.0 }
 0x43c   :  { %v3238_v48 = vpop.f32.mrf.mxu0  ;;  %7937 = vst [vmem:[#allocation18_spill] sm:$0xff] %v6324_v17  ;;  %v856_v3 = vmax.f32 %v6324_v17, 0.0 }
 0x43d   :  { %v3239_v13 = vadd.f32 %v3238_v48, %v5654_v27  ;;  %v3048_v41 = vpack.c.bf16 %v2944_v11, %v2943_v32  ;;  %v6341_v32 = vadd.f32 %v1900_v23, %v7941_v43 }
 0x43e   :  { %v1231_v29 = vpop.f32.mrf.mxu1  ;;  %v2569_v9 = vpop.f32.mrf.mxu3  ;;  %v932_v43 = vpack.c.bf16 %v856_v3, %v855_v26 }
 0x43f   :  { %v3513_v56 = vpack.c.bf16 %v3239_v13, %v3239_v13  ;;  %v1232_v16 = vadd.f32 %v1231_v29, %v4723_v54  ;;  %3277 = vmatmul.bf16.gmra.mxu0 %v3048_v41  ;;  %v2570_v48 = vadd.f32 %v2569_v9, %v5355_v52 }
 0x441   :  { %3642 = vst.msk [vmem:[%s7631_s5 + $0x78] sm:$0xf] %vm3611_vm1, %v3513_v56  ;;  %v6336_v59 = vadd.f32 %v1232_v16, %v7939_v50  ;;  %v2248_v16 = vmax.f32 %v6341_v32, 0.0  ;;  %v2817_v6 = vadd.f32 %v2570_v48, %v5945_v45 }
 0x442   :  { %v1901_v53 = vpop.f32.mrf.mxu2 }
 0x443   :  { %7940 = vst [vmem:[#allocation22_spill] sm:$0xff] %v6336_v59  ;;  %v1552_v11 = vmax.f32 %v6336_v59, 0.0  ;;  %v1902_v13 = vadd.f32 %v1901_v53, %v5028_v14 }
 0x444   :  { %v3240_v41 = vpop.f32.mrf.mxu0 }
 0x445   :  { %v6348_v12 = vadd.f32 %v1902_v13, %v7942_v31  ;;  %v3241_v29 = vadd.f32 %v3240_v41, %v5654_v27  ;;  %v1637_v56 = vpack.c.bf16 %v1552_v11, %v1551_v21  ;;  %v2945_v13 = vmax.f32 %v2817_v6, 0.0  ;;  %v7943_v31 = vld [vmem:[#allocation50_spill] sm:$0xff] }
 0x446   :  { %v1234_v23 = vpop.f32.mrf.mxu1  ;;  %v2571_v50 = vpop.f32.mrf.mxu3 }
 0x447   :  { %v2249_v59 = vmax.f32 %v6348_v12, 0.0  ;;  %v3514_v17 = vpack.c.bf16 %v3241_v29, %v3241_v29  ;;  %v2572_v9 = vadd.f32 %v2571_v50, %v5355_v52  ;;  %1943 = vmatmul.bf16.gmra.mxu2 %v1637_v56  ;;  %v1235_v26 = vadd.f32 %v1234_v23, %v4723_v54 }
 0x448   :  { %v6364_v29 = vadd.f32 %v7943_v31, %v4411_v36 }
 0x449   :  { %3643 = vst.msk [vmem:[%s7631_s5 + $0x7c] sm:$0xf] %vm3611_vm1, %v3514_v17  ;;  %v2818_v53 = vadd.f32 %v2572_v9, %v5952_v63  ;;  %1273 = vmatmul.bf16.gmra.mxu1 %v932_v43  ;;  %v2343_v21 = vpack.c.bf16 %v2249_v59, %v2248_v16  ;;  %v7944_v17 = vld [vmem:[#allocation52_spill] sm:$0xff]  ;;  %v6372_v16 = vadd.f32 %v1235_v26, %v5968_v33 }
 0x44a   :  { %v1904_v11 = vpop.f32.mrf.mxu2  ;;  %v6368_v56 = vadd.f32 %v7944_v17, %v4411_v36  ;;  %v857_v9 = vmax.f32 %v6364_v29, 0.0 }
 0x44b   :  { %v2946_v45 = vmax.f32 %v2818_v53, 0.0  ;;  %2613 = vmatmul.bf16.gmra.mxu3 %v2343_v21  ;;  %v1905_v63 = vadd.f32 %v1904_v11, %v5028_v14  ;;  %v1553_v11 = vmax.f32 %v6372_v16, 0.0 }
 0x44c   :  { %v3243_v3 = vpop.f32.mrf.mxu0  ;;  %v858_v53 = vmax.f32 %v6368_v56, 0.0 }
 0x44d   :  { %v3244_v48 = vadd.f32 %v3243_v3, %v5654_v27  ;;  %v3049_v41 = vpack.c.bf16 %v2946_v45, %v2945_v13  ;;  %v6385_v21 = vadd.f32 %v1905_v63, %v5976_v42 }
 0x44e   :  { %v1236_v59 = vpop.f32.mrf.mxu1  ;;  %v2574_v6 = vpop.f32.mrf.mxu3  ;;  %v933_v63 = vpack.c.bf16 %v858_v53, %v857_v9 }
 0x44f   :  { %v3515_v23 = vpack.c.bf16 %v3244_v48, %v3244_v48  ;;  %v1237_v50 = vadd.f32 %v1236_v59, %v4723_v54  ;;  %3282 = vmatmul.bf16.gmra.mxu0 %v3049_v41  ;;  %v2575_v26 = vadd.f32 %v2574_v6, %v5355_v52  ;;  %v2250_v31 = vmax.f32 %v6385_v21, 0.0  ;;  %v7947_v59 = vld [vmem:[#allocation11_spill] sm:$0xff] }
 0x451   :  { %3644 = vst.msk [vmem:[%s7631_s5 + $0x80] sm:$0xf] %vm3611_vm1, %v3515_v23  ;;  %v6380_v43 = vadd.f32 %v1237_v50, %v5972_v28  ;;  %v2819_v23 = vadd.f32 %v2575_v26, %v7947_v59 }
 0x452   :  { %v1906_v33 = vpop.f32.mrf.mxu2 }
 0x453   :  { %7945 = vst [vmem:[#allocation24_spill] sm:$0xff] %v6380_v43  ;;  %v1554_v13 = vmax.f32 %v6380_v43, 0.0  ;;  %v1907_v45 = vadd.f32 %v1906_v33, %v5028_v14 }
 0x454   :  { %v3245_v3 = vpop.f32.mrf.mxu0 }
 0x455   :  { %v6392_v28 = vadd.f32 %v1907_v45, %v5984_v47  ;;  %v3246_v48 = vadd.f32 %v3245_v3, %v5654_v27  ;;  %v1638_v41 = vpack.c.bf16 %v1554_v13, %v1553_v11  ;;  %v7948_v47 = vld [vmem:[#allocation7_spill] sm:$0xff]  ;;  %v2947_v45 = vmax.f32 %v2819_v23, 0.0 }
 0x456   :  { %v1239_v42 = vpop.f32.mrf.mxu1  ;;  %v2576_v17 = vpop.f32.mrf.mxu3 }
 0x457   :  { %7946 = vst [vmem:[#allocation26_spill] sm:$0xff] %v6392_v28  ;;  %v2251_v50 = vmax.f32 %v6392_v28, 0.0  ;;  %v3516_v43 = vpack.c.bf16 %v3246_v48, %v3246_v48  ;;  %v2577_v6 = vadd.f32 %v2576_v17, %v5355_v52  ;;  %1948 = vmatmul.bf16.gmra.mxu2 %v1638_v41  ;;  %v1240_v9 = vadd.f32 %v1239_v42, %v4723_v54  ;;  %v7949_v41 = vld [vmem:[#allocation54_spill] sm:$0xff] }
 0x458   :  { %v6408_v17 = vadd.f32 %v7949_v41, %v4411_v36 }
 0x459   :  { %3645 = vst.msk [vmem:[%s7631_s5 + $0x84] sm:$0xf] %vm3611_vm1, %v3516_v43  ;;  %v2820_v33 = vadd.f32 %v2577_v6, %v7948_v47  ;;  %1278 = vmatmul.bf16.gmra.mxu1 %v933_v63  ;;  %v2344_v11 = vpack.c.bf16 %v2251_v50, %v2250_v31  ;;  %v7951_v43 = vld [vmem:[#allocation55_spill] sm:$0xff]  ;;  %v7953_v50 = vld [vmem:[#allocation5_spill] sm:$0xff] }
 0x45a   :  { %v1909_v13 = vpop.f32.mrf.mxu2  ;;  %7950 = vst [vmem:[#allocation28_spill] sm:$0xff] %v6408_v17  ;;  %v6412_v59 = vadd.f32 %v7951_v43, %v4411_v36  ;;  %v6416_v42 = vadd.f32 %v1240_v9, %v7953_v50  ;;  %v7958_v50 = vld [vmem:[#allocation87_spill] sm:$0xff] }
 0x45b   :  { %v2948_v53 = vmax.f32 %v2820_v33, 0.0  ;;  %2618 = vmatmul.bf16.gmra.mxu3 %v2344_v11  ;;  %v1910_v31 = vadd.f32 %v1909_v13, %v5028_v14  ;;  %v7955_v33 = vld [vmem:[#allocation9_spill] sm:$0xff] }
 0x45c   :  { %v3248_v26 = vpop.f32.mrf.mxu0  ;;  %7952 = vst [vmem:[#allocation30_spill] sm:$0xff] %v6412_v59  ;;  %v860_v13 = vmax.f32 %v6412_v59, 0.0 }
 0x45d   :  { %v3249_v3 = vadd.f32 %v3248_v26, %v5654_v27  ;;  %v3050_v48 = vpack.c.bf16 %v2948_v53, %v2947_v45  ;;  %7954 = vst [vmem:[#allocation33_spill] sm:$0xff] %v6416_v42  ;;  %v859_v45 = vmax.f32 %v6408_v17, 0.0  ;;  %v7957_v53 = vld [vmem:[#allocation84_spill] sm:$0xff] }
 0x45e   :  { %v1241_v63 = vpop.f32.mrf.mxu1  ;;  %v2579_v23 = vpop.f32.mrf.mxu3  ;;  %v6429_v26 = vadd.f32 %v1910_v31, %v7957_v53 }
 0x45f   :  { %v3517_v6 = vpack.c.bf16 %v3249_v3, %v3249_v3  ;;  %v1242_v47 = vadd.f32 %v1241_v63, %v4723_v54  ;;  %3287 = vmatmul.bf16.gmra.mxu0 %v3050_v48  ;;  %v1555_v3 = vmax.f32 %v6416_v42, 0.0  ;;  %v2580_v41 = vadd.f32 %v2579_v23, %v5355_v52 }
 0x460   :  { %v2252_v59 = vmax.f32 %v6429_v26, 0.0  ;;  %v934_v17 = vpack.c.bf16 %v860_v13, %v859_v45 }
 0x461   :  { %3646 = vst.msk [vmem:[%s7631_s5 + $0x88] sm:$0xf] %vm3611_vm1, %v3517_v6  ;;  %v6424_v11 = vadd.f32 %v1242_v47, %v7955_v33  ;;  %v2821_v42 = vadd.f32 %v2580_v41, %v6033_v20 }
 0x462   :  { %v1911_v9 = vpop.f32.mrf.mxu2 }
 0x463   :  { %7956 = vst [vmem:[#allocation35_spill] sm:$0xff] %v6424_v11  ;;  %v1556_v48 = vmax.f32 %v6424_v11, 0.0  ;;  %v1912_v43 = vadd.f32 %v1911_v9, %v5028_v14  ;;  %v7960_v9 = vld [vmem:[#allocation12_spill] sm:$0xff] }
 0x464   :  { %v3250_v63 = vpop.f32.mrf.mxu0 }
 0x465   :  { %v6436_v6 = vadd.f32 %v1912_v43, %v7958_v50  ;;  %v3251_v47 = vadd.f32 %v3250_v63, %v5654_v27  ;;  %v1639_v33 = vpack.c.bf16 %v1556_v48, %v1555_v3  ;;  %v2949_v63 = vmax.f32 %v2821_v42, 0.0 }
 0x466   :  { %v1244_v31 = vpop.f32.mrf.mxu1  ;;  %v2581_v53 = vpop.f32.mrf.mxu3 }
 0x467   :  { %7959 = vst [vmem:[#allocation19_spill] sm:$0xff] %v6436_v6  ;;  %v2253_v11 = vmax.f32 %v6436_v6, 0.0  ;;  %v3518_v28 = vpack.c.bf16 %v3251_v47, %v3251_v47  ;;  %v2582_v23 = vadd.f32 %v2581_v53, %v5355_v52  ;;  %1953 = vmatmul.bf16.gmra.mxu2 %v1639_v33  ;;  %v1245_v45 = vadd.f32 %v1244_v31, %v4723_v54  ;;  %v7961_v47 = vld [vmem:[#allocation57_spill] sm:$0xff] }
 0x468   :  { %v6452_v33 = vadd.f32 %v7961_v47, %v4411_v36 }
 0x469   :  { %3647 = vst.msk [vmem:[%s7631_s5 + $0x8c] sm:$0xf] %vm3611_vm1, %v3518_v28  ;;  %v2822_v3 = vadd.f32 %v2582_v23, %v7960_v9  ;;  %1283 = vmatmul.bf16.gmra.mxu1 %v934_v17  ;;  %v2345_v48 = vpack.c.bf16 %v2253_v11, %v2252_v59  ;;  %v7963_v28 = vld [vmem:[#allocation62_spill] sm:$0xff] }
 0x46a   :  { %v1914_v43 = vpop.f32.mrf.mxu2  ;;  %7962 = vst [vmem:[#allocation17_spill] sm:$0xff] %v6452_v33  ;;  %v6456_v53 = vadd.f32 %v7963_v28, %v4411_v36  ;;  %v7965_v11 = vld [vmem:[#allocation14_spill] sm:$0xff] }
 0x46b   :  { %v2950_v20 = vmax.f32 %v2822_v3, 0.0  ;;  %2623 = vmatmul.bf16.gmra.mxu3 %v2345_v48  ;;  %v1915_v17 = vadd.f32 %v1914_v43, %v5028_v14  ;;  %v6460_v31 = vadd.f32 %v1245_v45, %v7965_v11  ;;  %v7967_v3 = vld [vmem:[#allocation15_spill] sm:$0xff]  ;;  %v7970_v11 = vld [vmem:[#allocation13_spill] sm:$0xff] }
 0x46c   :  { %v3253_v13 = vpop.f32.mrf.mxu0  ;;  %7964 = vst [vmem:[#allocation37_spill] sm:$0xff] %v6456_v53  ;;  %v862_v43 = vmax.f32 %v6456_v53, 0.0 }
 0x46d   :  { %v3254_v41 = vadd.f32 %v3253_v13, %v5654_v27  ;;  %v3051_v50 = vpack.c.bf16 %v2950_v20, %v2949_v63  ;;  %7966 = vst [vmem:[#allocation39_spill] sm:$0xff] %v6460_v31  ;;  %v861_v63 = vmax.f32 %v6452_v33, 0.0  ;;  %v7969_v20 = vld [vmem:[#allocation86_spill] sm:$0xff] }
 0x46e   :  { %v1246_v59 = vpop.f32.mrf.mxu1  ;;  %v2584_v42 = vpop.f32.mrf.mxu3  ;;  %v6473_v13 = vadd.f32 %v1915_v17, %v7969_v20 }
 0x46f   :  { %v3519_v23 = vpack.c.bf16 %v3254_v41, %v3254_v41  ;;  %v1247_v9 = vadd.f32 %v1246_v59, %v4723_v54  ;;  %3292 = vmatmul.bf16.gmra.mxu0 %v3051_v50  ;;  %v1557_v41 = vmax.f32 %v6460_v31, 0.0  ;;  %v2585_v47 = vadd.f32 %v2584_v42, %v5355_v52 }
 0x470   :  { %v2254_v53 = vmax.f32 %v6473_v13, 0.0  ;;  %v935_v33 = vpack.c.bf16 %v862_v43, %v861_v63 }
 0x471   :  { %3648 = vst.msk [vmem:[%s7631_s5 + $0x90] sm:$0xf] %vm3611_vm1, %v3519_v23  ;;  %v6468_v48 = vadd.f32 %v1247_v9, %v7967_v3  ;;  %v2823_v31 = vadd.f32 %v2585_v47, %v6077_v61 }
 0x472   :  { %v1916_v45 = vpop.f32.mrf.mxu2 }
 0x473   :  { %7968 = vst [vmem:[#allocation23_spill] sm:$0xff] %v6468_v48  ;;  %v1558_v50 = vmax.f32 %v6468_v48, 0.0  ;;  %v1917_v28 = vadd.f32 %v1916_v45, %v5028_v14 }
 0x474   :  { %v3255_v59 = vpop.f32.mrf.mxu0 }
 0x475   :  { %v6480_v23 = vadd.f32 %v1917_v28, %v7970_v11  ;;  %v3256_v9 = vadd.f32 %v3255_v59, %v5654_v27  ;;  %v1640_v3 = vpack.c.bf16 %v1558_v50, %v1557_v41  ;;  %v2951_v28 = vmax.f32 %v2823_v31, 0.0  ;;  %v7971_v11 = vld [vmem:[#allocation64_spill] sm:$0xff] }
 0x476   :  { %v1249_v17 = vpop.f32.mrf.mxu1  ;;  %v2586_v20 = vpop.f32.mrf.mxu3 }
 0x477   :  { %v2255_v48 = vmax.f32 %v6480_v23, 0.0  ;;  %v3520_v6 = vpack.c.bf16 %v3256_v9, %v3256_v9  ;;  %v2587_v42 = vadd.f32 %v2586_v20, %v5355_v52  ;;  %1958 = vmatmul.bf16.gmra.mxu2 %v1640_v3  ;;  %v1250_v63 = vadd.f32 %v1249_v17, %v4723_v54 }
 0x478   :  { %v6496_v9 = vadd.f32 %v7971_v11, %v4411_v36 }
 0x479   :  { %3649 = vst.msk [vmem:[%s7631_s5 + $0x94] sm:$0xf] %vm3611_vm1, %v3520_v6  ;;  %v2824_v45 = vadd.f32 %v2587_v42, %v6084_v55  ;;  %1288 = vmatmul.bf16.gmra.mxu1 %v935_v33  ;;  %v2346_v41 = vpack.c.bf16 %v2255_v48, %v2254_v53  ;;  %v7972_v6 = vld [vmem:[#allocation66_spill] sm:$0xff]  ;;  %v6504_v31 = vadd.f32 %v1250_v63, %v6100_v34 }
 0x47a   :  { %v1919_v50 = vpop.f32.mrf.mxu2  ;;  %v6500_v3 = vadd.f32 %v7972_v6, %v4411_v36  ;;  %v863_v42 = vmax.f32 %v6496_v9, 0.0 }
 0x47b   :  { %v2952_v61 = vmax.f32 %v2824_v45, 0.0  ;;  %2628 = vmatmul.bf16.gmra.mxu3 %v2346_v41  ;;  %v1920_v55 = vadd.f32 %v1919_v50, %v5028_v14  ;;  %v1559_v50 = vmax.f32 %v6504_v31, 0.0 }
 0x47c   :  { %v3258_v43 = vpop.f32.mrf.mxu0  ;;  %v864_v45 = vmax.f32 %v6500_v3, 0.0 }
 0x47d   :  { %v3259_v47 = vadd.f32 %v3258_v43, %v5654_v27  ;;  %v3052_v59 = vpack.c.bf16 %v2952_v61, %v2951_v28  ;;  %v6517_v41 = vadd.f32 %v1920_v55, %v6108_v15 }
 0x47e   :  { %v1251_v33 = vpop.f32.mrf.mxu1  ;;  %v2589_v53 = vpop.f32.mrf.mxu3  ;;  %v936_v55 = vpack.c.bf16 %v864_v45, %v863_v42 }
 0x47f   :  { %v3521_v48 = vpack.c.bf16 %v3259_v47, %v3259_v47  ;;  %v1252_v17 = vadd.f32 %v1251_v33, %v4723_v54  ;;  %3297 = vmatmul.bf16.gmra.mxu0 %v3052_v59  ;;  %v2590_v63 = vadd.f32 %v2589_v53, %v5355_v52  ;;  %v2256_v11 = vmax.f32 %v6517_v41, 0.0 }
 0x481   :  { %3650 = vst.msk [vmem:[%s7631_s5 + $0x98] sm:$0xf] %vm3611_vm1, %v3521_v48  ;;  %v6512_v20 = vadd.f32 %v1252_v17, %v6104_v46  ;;  %v2825_v33 = vadd.f32 %v2590_v63, %v6121_v35 }
 0x482   :  { %v1921_v34 = vpop.f32.mrf.mxu2 }
 0x483   :  { %v1560_v28 = vmax.f32 %v6512_v20, 0.0  ;;  %v1922_v61 = vadd.f32 %v1921_v34, %v5028_v14 }
 0x484   :  { %v3260_v43 = vpop.f32.mrf.mxu0 }
 0x485   :  { %v6524_v46 = vadd.f32 %v1922_v61, %v6116_v22  ;;  %v3261_v47 = vadd.f32 %v3260_v43, %v5654_v27  ;;  %v1641_v59 = vpack.c.bf16 %v1560_v28, %v1559_v50  ;;  %v2953_v28 = vmax.f32 %v2825_v33, 0.0  ;;  %v7973_v43 = vld [vmem:[#allocation68_spill] sm:$0xff] }
 0x486   :  { %v1254_v15 = vpop.f32.mrf.mxu1  ;;  %v2591_v6 = vpop.f32.mrf.mxu3 }
 0x487   :  { %v2257_v48 = vmax.f32 %v6524_v46, 0.0  ;;  %v3522_v17 = vpack.c.bf16 %v3261_v47, %v3261_v47  ;;  %v2592_v53 = vadd.f32 %v2591_v6, %v5355_v52  ;;  %1963 = vmatmul.bf16.gmra.mxu2 %v1641_v59  ;;  %v1255_v42 = vadd.f32 %v1254_v15, %v4723_v54  ;;  %v7974_v59 = vld [vmem:[#allocation70_spill] sm:$0xff] }
 0x488   :  { %v6540_v47 = vadd.f32 %v7973_v43, %v4411_v36  ;;  %v6544_v6 = vadd.f32 %v7974_v59, %v4411_v36 }
 0x489   :  { %3651 = vst.msk [vmem:[%s7631_s5 + $0x9c] sm:$0xf] %vm3611_vm1, %v3522_v17  ;;  %v2826_v22 = vadd.f32 %v2592_v53, %v6128_v49  ;;  %1293 = vmatmul.bf16.gmra.mxu1 %v936_v55  ;;  %v2347_v34 = vpack.c.bf16 %v2257_v48, %v2256_v11  ;;  %v6548_v15 = vadd.f32 %v1255_v42, %v6144_v2 }
 0x48a   :  { %v1924_v50 = vpop.f32.mrf.mxu2  ;;  %v865_v53 = vmax.f32 %v6540_v47, 0.0 }
 0x48b   :  { %v2954_v35 = vmax.f32 %v2826_v22, 0.0  ;;  %2633 = vmatmul.bf16.gmra.mxu3 %v2347_v34  ;;  %v1925_v49 = vadd.f32 %v1924_v50, %v5028_v14  ;;  %v866_v22 = vmax.f32 %v6544_v6, 0.0  ;;  %v1561_v50 = vmax.f32 %v6548_v15, 0.0 }
 0x48c   :  { %v3263_v45 = vpop.f32.mrf.mxu0 }
 0x48d   :  { %v3264_v63 = vadd.f32 %v3263_v45, %v5654_v27  ;;  %v3053_v61 = vpack.c.bf16 %v2954_v35, %v2953_v28  ;;  %v6561_v34 = vadd.f32 %v1925_v49, %v6152_v1  ;;  %v937_v49 = vpack.c.bf16 %v866_v22, %v865_v53 }
 0x48e   :  { %v1256_v11 = vpop.f32.mrf.mxu1  ;;  %v2594_v55 = vpop.f32.mrf.mxu3 }
 0x48f   :  { %v3523_v33 = vpack.c.bf16 %v3264_v63, %v3264_v63  ;;  %v1257_v48 = vadd.f32 %v1256_v11, %v4723_v54  ;;  %3302 = vmatmul.bf16.gmra.mxu0 %v3053_v61  ;;  %v2595_v42 = vadd.f32 %v2594_v55, %v5355_v52  ;;  %v2258_v43 = vmax.f32 %v6561_v34, 0.0 }
 0x491   :  { %3652 = vst.msk [vmem:[%s7631_s5 + $0xa0] sm:$0xf] %vm3611_vm1, %v3523_v33  ;;  %v6556_v17 = vadd.f32 %v1257_v48, %v6148_v0  ;;  %v2827_v11 = vadd.f32 %v2595_v42, %v6165_v8 }
 0x492   :  { %v1926_v2 = vpop.f32.mrf.mxu2 }
 0x493   :  { %v1562_v28 = vmax.f32 %v6556_v17, 0.0  ;;  %v1927_v35 = vadd.f32 %v1926_v2, %v5028_v14 }
 0x494   :  { %v3265_v45 = vpop.f32.mrf.mxu0 }
 0x495   :  { %v6568_v0 = vadd.f32 %v1927_v35, %v6160_v7  ;;  %v3266_v63 = vadd.f32 %v3265_v45, %v5654_v27  ;;  %v1642_v61 = vpack.c.bf16 %v1562_v28, %v1561_v50  ;;  %v2955_v28 = vmax.f32 %v2827_v11, 0.0  ;;  %v7975_v45 = vld [vmem:[#allocation71_spill] sm:$0xff] }
 0x496   :  { %v1259_v1 = vpop.f32.mrf.mxu1  ;;  %v2596_v59 = vpop.f32.mrf.mxu3 }
 0x497   :  { %v2259_v33 = vmax.f32 %v6568_v0, 0.0  ;;  %v3524_v48 = vpack.c.bf16 %v3266_v63, %v3266_v63  ;;  %v2597_v55 = vadd.f32 %v2596_v59, %v5355_v52  ;;  %1968 = vmatmul.bf16.gmra.mxu2 %v1642_v61  ;;  %v1260_v53 = vadd.f32 %v1259_v1, %v4723_v54  ;;  %v7976_v61 = vld [vmem:[#allocation72_spill] sm:$0xff] }
 0x498   :  { %v6584_v63 = vadd.f32 %v7975_v45, %v4411_v36  ;;  %v6588_v59 = vadd.f32 %v7976_v61, %v4411_v36 }
 0x499   :  { %3653 = vst.msk [vmem:[%s7631_s5 + $0xa4] sm:$0xf] %vm3611_vm1, %v3524_v48  ;;  %v2828_v7 = vadd.f32 %v2597_v55, %v6172_v25  ;;  %1298 = vmatmul.bf16.gmra.mxu1 %v937_v49  ;;  %v2348_v2 = vpack.c.bf16 %v2259_v33, %v2258_v43  ;;  %v6592_v1 = vadd.f32 %v1260_v53, %v6188_v40 }
 0x49a   :  { %v1929_v50 = vpop.f32.mrf.mxu2  ;;  %v867_v55 = vmax.f32 %v6584_v63, 0.0 }
 0x49b   :  { %v2956_v8 = vmax.f32 %v2828_v7, 0.0  ;;  %2638 = vmatmul.bf16.gmra.mxu3 %v2348_v2  ;;  %v1930_v25 = vadd.f32 %v1929_v50, %v5028_v14  ;;  %v868_v7 = vmax.f32 %v6588_v59, 0.0  ;;  %v1563_v50 = vmax.f32 %v6592_v1, 0.0 }
 0x49c   :  { %v3268_v22 = vpop.f32.mrf.mxu0 }
 0x49d   :  { %v3269_v42 = vadd.f32 %v3268_v22, %v5654_v27  ;;  %v3054_v35 = vpack.c.bf16 %v2956_v8, %v2955_v28  ;;  %v6605_v2 = vadd.f32 %v1930_v25, %v6196_v10  ;;  %v938_v25 = vpack.c.bf16 %v868_v7, %v867_v55 }
 0x49e   :  { %v1261_v43 = vpop.f32.mrf.mxu1  ;;  %v2599_v49 = vpop.f32.mrf.mxu3 }
 0x49f   :  { %v3525_v11 = vpack.c.bf16 %v3269_v42, %v3269_v42  ;;  %v1262_v33 = vadd.f32 %v1261_v43, %v4723_v54  ;;  %3307 = vmatmul.bf16.gmra.mxu0 %v3054_v35  ;;  %v2600_v53 = vadd.f32 %v2599_v49, %v5355_v52  ;;  %v2260_v45 = vmax.f32 %v6605_v2, 0.0 }
 0x4a1   :  { %3654 = vst.msk [vmem:[%s7631_s5 + $0xa8] sm:$0xf] %vm3611_vm1, %v3525_v11  ;;  %v6600_v48 = vadd.f32 %v1262_v33, %v6192_v5  ;;  %v2829_v43 = vadd.f32 %v2600_v53, %v6209_v62 }
 0x4a2   :  { %v1931_v40 = vpop.f32.mrf.mxu2 }
 0x4a3   :  { %v1564_v28 = vmax.f32 %v6600_v48, 0.0  ;;  %v1932_v8 = vadd.f32 %v1931_v40, %v5028_v14 }
 0x4a4   :  { %v3270_v22 = vpop.f32.mrf.mxu0 }
 0x4a5   :  { %v6612_v5 = vadd.f32 %v1932_v8, %v6204_v57  ;;  %v3271_v42 = vadd.f32 %v3270_v22, %v5654_v27  ;;  %v1643_v35 = vpack.c.bf16 %v1564_v28, %v1563_v50  ;;  %v2957_v28 = vmax.f32 %v2829_v43, 0.0  ;;  %v7977_v22 = vld [vmem:[#allocation73_spill] sm:$0xff] }
 0x4a6   :  { %v1264_v10 = vpop.f32.mrf.mxu1  ;;  %v2601_v61 = vpop.f32.mrf.mxu3 }
 0x4a7   :  { %v2261_v11 = vmax.f32 %v6612_v5, 0.0  ;;  %v3526_v33 = vpack.c.bf16 %v3271_v42, %v3271_v42  ;;  %v2602_v49 = vadd.f32 %v2601_v61, %v5355_v52  ;;  %1973 = vmatmul.bf16.gmra.mxu2 %v1643_v35  ;;  %v1265_v55 = vadd.f32 %v1264_v10, %v4723_v54  ;;  %v7978_v35 = vld [vmem:[#allocation74_spill] sm:$0xff] }
 0x4a8   :  { %v6628_v42 = vadd.f32 %v7977_v22, %v4411_v36  ;;  %v6632_v61 = vadd.f32 %v7978_v35, %v4411_v36 }
 0x4a9   :  { %3655 = vst.msk [vmem:[%s7631_s5 + $0xac] sm:$0xf] %vm3611_vm1, %v3526_v33  ;;  %v2830_v57 = vadd.f32 %v2602_v49, %v6216_v18  ;;  %1303 = vmatmul.bf16.gmra.mxu1 %v938_v25  ;;  %v2349_v40 = vpack.c.bf16 %v2261_v11, %v2260_v45  ;;  %v6636_v10 = vadd.f32 %v1265_v55, %v6232_v58 }
 0x4aa   :  { %v1934_v50 = vpop.f32.mrf.mxu2  ;;  %v869_v49 = vmax.f32 %v6628_v42, 0.0 }
 0x4ab   :  { %v2958_v62 = vmax.f32 %v2830_v57, 0.0  ;;  %2643 = vmatmul.bf16.gmra.mxu3 %v2349_v40  ;;  %v1935_v18 = vadd.f32 %v1934_v50, %v5028_v14  ;;  %v870_v57 = vmax.f32 %v6632_v61, 0.0  ;;  %v1565_v50 = vmax.f32 %v6636_v10, 0.0 }
 0x4ac   :  { %v3273_v7 = vpop.f32.mrf.mxu0 }
 0x4ad   :  { %v3274_v53 = vadd.f32 %v3273_v7, %v5654_v27  ;;  %v3055_v8 = vpack.c.bf16 %v2958_v62, %v2957_v28  ;;  %v6649_v40 = vadd.f32 %v1935_v18, %v6240_v37  ;;  %v939_v18 = vpack.c.bf16 %v870_v57, %v869_v49 }
 0x4ae   :  { %v1266_v45 = vpop.f32.mrf.mxu1  ;;  %v2604_v25 = vpop.f32.mrf.mxu3 }
 0x4af   :  { %v3527_v43 = vpack.c.bf16 %v3274_v53, %v3274_v53  ;;  %v1267_v11 = vadd.f32 %v1266_v45, %v4723_v54  ;;  %3312 = vmatmul.bf16.gmra.mxu0 %v3055_v8  ;;  %v2605_v55 = vadd.f32 %v2604_v25, %v5355_v52  ;;  %v2262_v22 = vmax.f32 %v6649_v40, 0.0 }
 0x4b1   :  { %3656 = vst.msk [vmem:[%s7631_s5 + $0xb0] sm:$0xf] %vm3611_vm1, %v3527_v43  ;;  %v6644_v33 = vadd.f32 %v1267_v11, %v6236_v60  ;;  %v2831_v45 = vadd.f32 %v2605_v55, %v6253_v19 }
 0x4b2   :  { %v1936_v58 = vpop.f32.mrf.mxu2 }
 0x4b3   :  { %v1566_v28 = vmax.f32 %v6644_v33, 0.0  ;;  %v1937_v62 = vadd.f32 %v1936_v58, %v5028_v14 }
 0x4b4   :  { %v3275_v7 = vpop.f32.mrf.mxu0 }
 0x4b5   :  { %v6656_v60 = vadd.f32 %v1937_v62, %v6248_v39  ;;  %v3276_v53 = vadd.f32 %v3275_v7, %v5654_v27  ;;  %v1644_v8 = vpack.c.bf16 %v1566_v28, %v1565_v50  ;;  %v2959_v28 = vmax.f32 %v2831_v45, 0.0  ;;  %v7979_v7 = vld [vmem:[#allocation75_spill] sm:$0xff] }
 0x4b6   :  { %v1269_v37 = vpop.f32.mrf.mxu1  ;;  %v2606_v35 = vpop.f32.mrf.mxu3 }
 0x4b7   :  { %v2263_v43 = vmax.f32 %v6656_v60, 0.0  ;;  %v3528_v11 = vpack.c.bf16 %v3276_v53, %v3276_v53  ;;  %v2607_v25 = vadd.f32 %v2606_v35, %v5355_v52  ;;  %1978 = vmatmul.bf16.gmra.mxu2 %v1644_v8  ;;  %v1270_v49 = vadd.f32 %v1269_v37, %v4723_v54  ;;  %v7980_v8 = vld [vmem:[#allocation76_spill] sm:$0xff] }
 0x4b8   :  { %v6672_v53 = vadd.f32 %v7979_v7, %v4411_v36  ;;  %v6676_v35 = vadd.f32 %v7980_v8, %v4411_v36 }
 0x4b9   :  { %3657 = vst.msk [vmem:[%s7631_s5 + $0xb4] sm:$0xf] %vm3611_vm1, %v3528_v11  ;;  %v2832_v39 = vadd.f32 %v2607_v25, %v6260_v24  ;;  %1308 = vmatmul.bf16.gmra.mxu1 %v939_v18  ;;  %v2350_v58 = vpack.c.bf16 %v2263_v43, %v2262_v22  ;;  %v6680_v37 = vadd.f32 %v1270_v49, %v6276_v30 }
 0x4ba   :  { %v1939_v50 = vpop.f32.mrf.mxu2  ;;  %v871_v25 = vmax.f32 %v6672_v53, 0.0 }
 0x4bb   :  { %v2960_v19 = vmax.f32 %v2832_v39, 0.0  ;;  %2648 = vmatmul.bf16.gmra.mxu3 %v2350_v58  ;;  %v1940_v24 = vadd.f32 %v1939_v50, %v5028_v14  ;;  %7981 = vst [vmem:[#allocation21_spill] sm:$0xff] %v6680_v37  ;;  %v872_v39 = vmax.f32 %v6676_v35, 0.0  ;;  %v7983_v58 = vld [vmem:[#allocation88_spill] sm:$0xff] }
 0x4bc   :  { %v3278_v57 = vpop.f32.mrf.mxu0 }
 0x4bd   :  { %v3279_v55 = vadd.f32 %v3278_v57, %v5654_v27  ;;  %v3056_v62 = vpack.c.bf16 %v2960_v19, %v2959_v28  ;;  %v6693_v50 = vadd.f32 %v1940_v24, %v7983_v58  ;;  %v1567_v28 = vmax.f32 %v6680_v37, 0.0 }
 0x4be   :  { %v1271_v22 = vpop.f32.mrf.mxu1  ;;  %v2609_v18 = vpop.f32.mrf.mxu3 }
 0x4bf   :  { %v3529_v45 = vpack.c.bf16 %v3279_v55, %v3279_v55  ;;  %v1272_v43 = vadd.f32 %v1271_v22, %v4723_v54  ;;  %3317 = vmatmul.bf16.gmra.mxu0 %v3056_v62  ;;  %v2610_v19 = vadd.f32 %v2609_v18, %v5355_v52  ;;  %v7984_v62 = vld [vmem:[#allocation16_spill] sm:$0xff]  ;;  %v2264_v22 = vmax.f32 %v6693_v50, 0.0 }
 0x4c1   :  { %3658 = vst.msk [vmem:[%s7631_s5 + $0xb8] sm:$0xf] %vm3611_vm1, %v3529_v45  ;;  %v6688_v11 = vadd.f32 %v1272_v43, %v6280_v4  ;;  %v940_v43 = vpack.c.bf16 %v872_v39, %v871_v25  ;;  %v2833_v58 = vadd.f32 %v2610_v19, %v6297_v44 }
 0x4c2   :  { %v1941_v30 = vpop.f32.mrf.mxu2 }
 0x4c3   :  { %7982 = vst [vmem:[#allocation27_spill] sm:$0xff] %v6688_v11  ;;  %v1568_v49 = vmax.f32 %v6688_v11, 0.0  ;;  %v1942_v57 = vadd.f32 %v1941_v30, %v5028_v14 }
 0x4c4   :  { %v3280_v55 = vpop.f32.mrf.mxu0 }
 0x4c5   :  { %v6700_v4 = vadd.f32 %v1942_v57, %v7984_v62  ;;  %v3281_v7 = vadd.f32 %v3280_v55, %v5654_v27  ;;  %v1645_v8 = vpack.c.bf16 %v1568_v49, %v1567_v28  ;;  %v2961_v57 = vmax.f32 %v2833_v58, 0.0  ;;  %v7985_v62 = vld [vmem:[#allocation77_spill] sm:$0xff]  ;;  %v7989_v58 = vld [vmem:[#allocation18_spill] sm:$0xff] }
 0x4c6   :  { %v1274_v24 = vpop.f32.mrf.mxu1  ;;  %v2611_v45 = vpop.f32.mrf.mxu3 }
 0x4c7   :  { %v2265_v11 = vmax.f32 %v6700_v4, 0.0  ;;  %v3530_v37 = vpack.c.bf16 %v3281_v7, %v3281_v7  ;;  %v2612_v18 = vadd.f32 %v2611_v45, %v5355_v52  ;;  %1983 = vmatmul.bf16.gmra.mxu2 %v1645_v8  ;;  %v1275_v25 = vadd.f32 %v1274_v24, %v4723_v54 }
 0x4c8   :  { %v6716_v7 = vadd.f32 %v7985_v62, %v4411_v36  ;;  %v7992_v62 = vld [vmem:[#allocation22_spill] sm:$0xff] }
 0x4c9   :  { %3659 = vst.msk [vmem:[%s7631_s5 + $0xbc] sm:$0xf] %vm3611_vm1, %v3530_v37  ;;  %v2834_v30 = vadd.f32 %v2612_v18, %v6304_v38  ;;  %1313 = vmatmul.bf16.gmra.mxu1 %v940_v43  ;;  %v2351_v28 = vpack.c.bf16 %v2265_v11, %v2264_v22  ;;  %v7986_v37 = vld [vmem:[#allocation78_spill] sm:$0xff]  ;;  %v6724_v24 = vadd.f32 %v1275_v25, %v6320_v51 }
 0x4ca   :  { %v1944_v49 = vpop.f32.mrf.mxu2  ;;  %v6720_v8 = vadd.f32 %v7986_v37, %v4411_v36 }
 0x4cb   :  { %v2962_v44 = vmax.f32 %v2834_v30, 0.0  ;;  %2653 = vmatmul.bf16.gmra.mxu3 %v2351_v28  ;;  %v1945_v38 = vadd.f32 %v1944_v49, %v5028_v14  ;;  %7988 = vst [vmem:[#allocation41_spill] sm:$0xff] %v6724_v24  ;;  %v873_v30 = vmax.f32 %v6716_v7, 0.0  ;;  %v7991_v49 = vld [vmem:[#allocation20_spill] sm:$0xff]  ;;  %v1569_v25 = vmax.f32 %v6724_v24, 0.0 }
 0x4cc   :  { %v3283_v39 = vpop.f32.mrf.mxu0  ;;  %7987 = vst [vmem:[#allocation40_spill] sm:$0xff] %v6720_v8  ;;  %v874_v28 = vmax.f32 %v6720_v8, 0.0 }
 0x4cd   :  { %v3284_v19 = vadd.f32 %v3283_v39, %v5654_v27  ;;  %v3057_v55 = vpack.c.bf16 %v2962_v44, %v2961_v57  ;;  %v6737_v57 = vadd.f32 %v1945_v38, %v7991_v49 }
 0x4ce   :  { %v1276_v11 = vpop.f32.mrf.mxu1  ;;  %v2614_v22 = vpop.f32.mrf.mxu3  ;;  %v941_v49 = vpack.c.bf16 %v874_v28, %v873_v30 }
 0x4cf   :  { %v3531_v45 = vpack.c.bf16 %v3284_v19, %v3284_v19  ;;  %v1277_v43 = vadd.f32 %v1276_v11, %v4723_v54  ;;  %3322 = vmatmul.bf16.gmra.mxu0 %v3057_v55  ;;  %v2615_v39 = vadd.f32 %v2614_v22, %v5355_v52 }
 0x4d1   :  { %3660 = vst.msk [vmem:[%s7631_s5 + $0xc0] sm:$0xf] %vm3611_vm1, %v3531_v45  ;;  %v6732_v18 = vadd.f32 %v1277_v43, %v7989_v58  ;;  %v2266_v43 = vmax.f32 %v6737_v57, 0.0  ;;  %v2835_v24 = vadd.f32 %v2615_v39, %v6341_v32 }
 0x4d2   :  { %v1946_v51 = vpop.f32.mrf.mxu2 }
 0x4d3   :  { %7990 = vst [vmem:[#allocation25_spill] sm:$0xff] %v6732_v18  ;;  %v1570_v44 = vmax.f32 %v6732_v18, 0.0  ;;  %v1947_v19 = vadd.f32 %v1946_v51, %v5028_v14 }
 0x4d4   :  { %v3285_v55 = vpop.f32.mrf.mxu0 }
 0x4d5   :  { %v6744_v37 = vadd.f32 %v1947_v19, %v7992_v62  ;;  %v3286_v11 = vadd.f32 %v3285_v55, %v5654_v27  ;;  %v1646_v45 = vpack.c.bf16 %v1570_v44, %v1569_v25  ;;  %v2963_v19 = vmax.f32 %v2835_v24, 0.0  ;;  %v7993_v62 = vld [vmem:[#allocation80_spill] sm:$0xff] }
 0x4d6   :  { %v1279_v38 = vpop.f32.mrf.mxu1  ;;  %v2616_v58 = vpop.f32.mrf.mxu3 }
 0x4d7   :  { %v2267_v18 = vmax.f32 %v6744_v37, 0.0  ;;  %v3532_v8 = vpack.c.bf16 %v3286_v11, %v3286_v11  ;;  %v2617_v22 = vadd.f32 %v2616_v58, %v5355_v52  ;;  %1988 = vmatmul.bf16.gmra.mxu2 %v1646_v45  ;;  %v1280_v30 = vadd.f32 %v1279_v38, %v4723_v54 }
 0x4d8   :  { %v6760_v11 = vadd.f32 %v7993_v62, %v4411_v36 }
 0x4d9   :  { %3661 = vst.msk [vmem:[%s7631_s5 + $0xc4] sm:$0xf] %vm3611_vm1, %v3532_v8  ;;  %v2836_v51 = vadd.f32 %v2617_v22, %v6348_v12  ;;  %1318 = vmatmul.bf16.gmra.mxu1 %v941_v49  ;;  %v2352_v25 = vpack.c.bf16 %v2267_v18, %v2266_v43  ;;  %v7994_v8 = vld [vmem:[#allocation82_spill] sm:$0xff]  ;;  %v6768_v43 = vadd.f32 %v1280_v30, %v6364_v29 }
 0x4da   :  { %v1949_v44 = vpop.f32.mrf.mxu2  ;;  %v6764_v45 = vadd.f32 %v7994_v8, %v4411_v36  ;;  %v875_v22 = vmax.f32 %v6760_v11, 0.0 }
 0x4db   :  { %v2964_v32 = vmax.f32 %v2836_v51, 0.0  ;;  %2658 = vmatmul.bf16.gmra.mxu3 %v2352_v25  ;;  %v1950_v12 = vadd.f32 %v1949_v44, %v5028_v14  ;;  %v1571_v44 = vmax.f32 %v6768_v43, 0.0 }
 0x4dc   :  { %v3288_v28 = vpop.f32.mrf.mxu0  ;;  %v876_v51 = vmax.f32 %v6764_v45, 0.0 }
 0x4dd   :  { %v3289_v39 = vadd.f32 %v3288_v28, %v5654_v27  ;;  %v3058_v55 = vpack.c.bf16 %v2964_v32, %v2963_v19  ;;  %v6781_v25 = vadd.f32 %v1950_v12, %v6372_v16 }
 0x4de   :  { %v1281_v18 = vpop.f32.mrf.mxu1  ;;  %v2619_v24 = vpop.f32.mrf.mxu3 }
 0x4df   :  { %v3533_v38 = vpack.c.bf16 %v3289_v39, %v3289_v39  ;;  %v1282_v58 = vadd.f32 %v1281_v18, %v4723_v54  ;;  %3327 = vmatmul.bf16.gmra.mxu0 %v3058_v55  ;;  %v2620_v30 = vadd.f32 %v2619_v24, %v5355_v52  ;;  %v7996_v39 = vld [vmem:[#allocation24_spill] sm:$0xff]  ;;  %v2268_v8 = vmax.f32 %v6781_v25, 0.0 }
 0x4e0   :  { %v942_v18 = vpack.c.bf16 %v876_v51, %v875_v22 }
 0x4e1   :  { %3662 = vst.msk [vmem:[%s7631_s5 + $0xc8] sm:$0xf] %vm3611_vm1, %v3533_v38  ;;  %v6776_v49 = vadd.f32 %v1282_v58, %v6368_v56  ;;  %v2837_v38 = vadd.f32 %v2620_v30, %v6385_v21 }
 0x4e2   :  { %v1951_v29 = vpop.f32.mrf.mxu2 }
 0x4e3   :  { %7995 = vst [vmem:[#allocation42_spill] sm:$0xff] %v6776_v49  ;;  %v1572_v19 = vmax.f32 %v6776_v49, 0.0  ;;  %v1952_v32 = vadd.f32 %v1951_v29, %v5028_v14  ;;  %v7998_v29 = vld [vmem:[#allocation26_spill] sm:$0xff] }
 0x4e4   :  { %v3290_v28 = vpop.f32.mrf.mxu0 }
 0x4e5   :  { %v6788_v56 = vadd.f32 %v1952_v32, %v7996_v39  ;;  %v3291_v55 = vadd.f32 %v3290_v28, %v5654_v27  ;;  %v1647_v62 = vpack.c.bf16 %v1572_v19, %v1571_v44  ;;  %v2965_v28 = vmax.f32 %v2837_v38, 0.0 }
 0x4e6   :  { %v1284_v16 = vpop.f32.mrf.mxu1  ;;  %v2621_v12 = vpop.f32.mrf.mxu3 }
 0x4e7   :  { %7997 = vst [vmem:[#allocation44_spill] sm:$0xff] %v6788_v56  ;;  %v2269_v58 = vmax.f32 %v6788_v56, 0.0  ;;  %v3534_v49 = vpack.c.bf16 %v3291_v55, %v3291_v55  ;;  %v2622_v24 = vadd.f32 %v2621_v12, %v5355_v52  ;;  %1993 = vmatmul.bf16.gmra.mxu2 %v1647_v62  ;;  %v1285_v22 = vadd.f32 %v1284_v16, %v4723_v54  ;;  %v7999_v55 = vld [vmem:[#allocation60_spill] sm:$0xff] }
 0x4e8   :  { %v6804_v62 = vadd.f32 %v7999_v55, %v4411_v36 }
 0x4e9   :  { %3663 = vst.msk [vmem:[%s7631_s5 + $0xcc] sm:$0xf] %vm3611_vm1, %v3534_v49  ;;  %v2838_v44 = vadd.f32 %v2622_v24, %v7998_v29  ;;  %1323 = vmatmul.bf16.gmra.mxu1 %v942_v18  ;;  %v2353_v19 = vpack.c.bf16 %v2269_v58, %v2268_v8  ;;  %v8001_v49 = vld [vmem:[#allocation59_spill] sm:$0xff]  ;;  %v8003_v58 = vld [vmem:[#allocation28_spill] sm:$0xff] }
 0x4ea   :  { %v1954_v32 = vpop.f32.mrf.mxu2  ;;  %8000 = vst [vmem:[#allocation31_spill] sm:$0xff] %v6804_v62  ;;  %v6808_v12 = vadd.f32 %v8001_v49, %v4411_v36  ;;  %v6812_v16 = vadd.f32 %v1285_v22, %v8003_v58  ;;  %v8008_v58 = vld [vmem:[#allocation35_spill] sm:$0xff] }
 0x4eb   :  { %v2966_v21 = vmax.f32 %v2838_v44, 0.0  ;;  %2663 = vmatmul.bf16.gmra.mxu3 %v2353_v19  ;;  %v1955_v8 = vadd.f32 %v1954_v32, %v5028_v14  ;;  %v8005_v44 = vld [vmem:[#allocation30_spill] sm:$0xff] }
 0x4ec   :  { %v3293_v51 = vpop.f32.mrf.mxu0  ;;  %8002 = vst [vmem:[#allocation29_spill] sm:$0xff] %v6808_v12  ;;  %v878_v32 = vmax.f32 %v6808_v12, 0.0 }
 0x4ed   :  { %v3294_v30 = vadd.f32 %v3293_v51, %v5654_v27  ;;  %v3059_v39 = vpack.c.bf16 %v2966_v21, %v2965_v28  ;;  %8004 = vst [vmem:[#allocation34_spill] sm:$0xff] %v6812_v16  ;;  %v877_v28 = vmax.f32 %v6804_v62, 0.0  ;;  %v8007_v21 = vld [vmem:[#allocation33_spill] sm:$0xff] }
 0x4ee   :  { %v1286_v18 = vpop.f32.mrf.mxu1  ;;  %v2624_v38 = vpop.f32.mrf.mxu3  ;;  %v6825_v51 = vadd.f32 %v1955_v8, %v8007_v21 }
 0x4ef   :  { %v3535_v24 = vpack.c.bf16 %v3294_v30, %v3294_v30  ;;  %v1287_v29 = vadd.f32 %v1286_v18, %v4723_v54  ;;  %3332 = vmatmul.bf16.gmra.mxu0 %v3059_v39  ;;  %v1573_v30 = vmax.f32 %v6812_v16, 0.0  ;;  %v2625_v55 = vadd.f32 %v2624_v38, %v5355_v52 }
 0x4f0   :  { %v2270_v12 = vmax.f32 %v6825_v51, 0.0  ;;  %v943_v62 = vpack.c.bf16 %v878_v32, %v877_v28 }
 0x4f1   :  { %3664 = vst.msk [vmem:[%s7631_s5 + $0xd0] sm:$0xf] %vm3611_vm1, %v3535_v24  ;;  %v6820_v19 = vadd.f32 %v1287_v29, %v8005_v44  ;;  %v2839_v16 = vadd.f32 %v2625_v55, %v6429_v26 }
 0x4f2   :  { %v1956_v22 = vpop.f32.mrf.mxu2 }
 0x4f3   :  { %8006 = vst [vmem:[#allocation32_spill] sm:$0xff] %v6820_v19  ;;  %v1574_v39 = vmax.f32 %v6820_v19, 0.0  ;;  %v1957_v49 = vadd.f32 %v1956_v22, %v5028_v14  ;;  %v8009_v22 = vld [vmem:[#allocation19_spill] sm:$0xff] }
 0x4f4   :  { %v3295_v18 = vpop.f32.mrf.mxu0 }
 0x4f5   :  { %v6832_v24 = vadd.f32 %v1957_v49, %v8008_v58  ;;  %v3296_v29 = vadd.f32 %v3295_v18, %v5654_v27  ;;  %v1648_v44 = vpack.c.bf16 %v1574_v39, %v1573_v30  ;;  %v2967_v18 = vmax.f32 %v2839_v16, 0.0 }
 0x4f6   :  { %v1289_v8 = vpop.f32.mrf.mxu1  ;;  %v2626_v21 = vpop.f32.mrf.mxu3 }
 0x4f7   :  { %v2271_v19 = vmax.f32 %v6832_v24, 0.0  ;;  %v3536_v56 = vpack.c.bf16 %v3296_v29, %v3296_v29  ;;  %v2627_v38 = vadd.f32 %v2626_v21, %v5355_v52  ;;  %1998 = vmatmul.bf16.gmra.mxu2 %v1648_v44  ;;  %v1290_v28 = vadd.f32 %v1289_v8, %v4723_v54  ;;  %v8010_v29 = vld [vmem:[#allocation61_spill] sm:$0xff] }
 0x4f8   :  { %v6848_v44 = vadd.f32 %v8010_v29, %v4411_v36 }
 0x4f9   :  { %3665 = vst.msk [vmem:[%s7631_s5 + $0xd4] sm:$0xf] %vm3611_vm1, %v3536_v56  ;;  %v2840_v30 = vadd.f32 %v2627_v38, %v8009_v22  ;;  %1328 = vmatmul.bf16.gmra.mxu1 %v943_v62  ;;  %v2354_v39 = vpack.c.bf16 %v2271_v19, %v2270_v12  ;;  %v8012_v56 = vld [vmem:[#allocation85_spill] sm:$0xff] }
 0x4fa   :  { %v1959_v49 = vpop.f32.mrf.mxu2  ;;  %8011 = vst [vmem:[#allocation79_spill] sm:$0xff] %v6848_v44  ;;  %v6852_v21 = vadd.f32 %v8012_v56, %v4411_v36  ;;  %v8014_v19 = vld [vmem:[#allocation17_spill] sm:$0xff]  ;;  %v879_v36 = vmax.f32 %v6848_v44, 0.0 }
 0x4fb   :  { %v2968_v26 = vmax.f32 %v2840_v30, 0.0  ;;  %2668 = vmatmul.bf16.gmra.mxu3 %v2354_v39  ;;  %v1960_v62 = vadd.f32 %v1959_v49, %v5028_v14  ;;  %v6856_v8 = vadd.f32 %v1290_v28, %v8014_v19  ;;  %v8016_v30 = vld [vmem:[#allocation37_spill] sm:$0xff] }
 0x4fc   :  { %v3298_v32 = vpop.f32.mrf.mxu0  ;;  %8013 = vst [vmem:[#allocation81_spill] sm:$0xff] %v6852_v21  ;;  %v880_v49 = vmax.f32 %v6852_v21, 0.0 }
 0x4fd   :  { %v3299_v55 = vadd.f32 %v3298_v32, %v5654_v27  ;;  %v3060_v58 = vpack.c.bf16 %v2968_v26, %v2967_v18  ;;  %8015 = vst [vmem:[#allocation47_spill] sm:$0xff] %v6856_v8  ;;  %v8018_v18 = vld [vmem:[#allocation39_spill] sm:$0xff]  ;;  %v1575_v32 = vmax.f32 %v6856_v8, 0.0 }
 0x4fe   :  { %v1291_v12 = vpop.f32.mrf.mxu1  ;;  %v2629_v16 = vpop.f32.mrf.mxu3  ;;  %v6869_v26 = vadd.f32 %v1960_v62, %v8018_v18  ;;  %v944_v21 = vpack.c.bf16 %v880_v49, %v879_v36 }
 0x4ff   :  { %v3537_v38 = vpack.c.bf16 %v3299_v55, %v3299_v55  ;;  %v1292_v22 = vadd.f32 %v1291_v12, %v4723_v54  ;;  %3337 = vmatmul.bf16.gmra.mxu0 %v3060_v58  ;;  %v2630_v58 = vadd.f32 %v2629_v16, %v5355_v52  ;;  %v8019_v12 = vld [vmem:[#allocation23_spill] sm:$0xff] }
 0x501   :  { %3666 = vst.msk [vmem:[%s7631_s5 + $0xd8] sm:$0xf] %vm3611_vm1, %v3537_v38  ;;  %v6864_v39 = vadd.f32 %v1292_v22, %v8016_v30  ;;  %v2272_v30 = vmax.f32 %v6869_v26, 0.0  ;;  %v2841_v8 = vadd.f32 %v2630_v58, %v6473_v13 }
 0x502   :  { %v1961_v28 = vpop.f32.mrf.mxu2 }
 0x503   :  { %8017 = vst [vmem:[#allocation49_spill] sm:$0xff] %v6864_v39  ;;  %v1576_v55 = vmax.f32 %v6864_v39, 0.0  ;;  %v1962_v29 = vadd.f32 %v1961_v28, %v5028_v14 }
 0x504   :  { %v3300_v56 = vpop.f32.mrf.mxu0 }
 0x505   :  { %v6876_v19 = vadd.f32 %v1962_v29, %v8019_v12  ;;  %v3301_v38 = vadd.f32 %v3300_v56, %v5654_v27  ;;  %v1649_v22 = vpack.c.bf16 %v1576_v55, %v1575_v32  ;;  %v2969_v29 = vmax.f32 %v2841_v8, 0.0 }
 0x506   :  { %v1294_v62 = vpop.f32.mrf.mxu1  ;;  %v2631_v18 = vpop.f32.mrf.mxu3 }
 0x507   :  { %v2273_v39 = vmax.f32 %v6876_v19, 0.0  ;;  %v3538_v44 = vpack.c.bf16 %v3301_v38, %v3301_v38  ;;  %v2632_v16 = vadd.f32 %v2631_v18, %v5355_v52  ;;  %2003 = vmatmul.bf16.gmra.mxu2 %v1649_v22  ;;  %v1295_v36 = vadd.f32 %v1294_v62, %v4723_v54 }
 0x509   :  { %3667 = vst.msk [vmem:[%s7631_s5 + $0xdc] sm:$0xf] %vm3611_vm1, %v3538_v44  ;;  %v2842_v28 = vadd.f32 %v2632_v16, %v6480_v23  ;;  %1333 = vmatmul.bf16.gmra.mxu1 %v944_v21  ;;  %v2355_v32 = vpack.c.bf16 %v2273_v39, %v2272_v30  ;;  %v6892_v44 = vadd.f32 %v1295_v36, %v6496_v9 }
 0x50a   :  { %v1964_v55 = vpop.f32.mrf.mxu2 }
 0x50b   :  { %v2970_v13 = vmax.f32 %v2842_v28, 0.0  ;;  %2673 = vmatmul.bf16.gmra.mxu3 %v2355_v32  ;;  %v1965_v12 = vadd.f32 %v1964_v55, %v5028_v14  ;;  %v1577_v62 = vmax.f32 %v6892_v44, 0.0 }
 0x50c   :  { %v3303_v49 = vpop.f32.mrf.mxu0 }
 0x50d   :  { %v3304_v58 = vadd.f32 %v3303_v49, %v5654_v27  ;;  %v3061_v56 = vpack.c.bf16 %v2970_v13, %v2969_v29  ;;  %v6903_v39 = vadd.f32 %v1965_v12, %v6504_v31 }
 0x50e   :  { %v1296_v38 = vpop.f32.mrf.mxu1  ;;  %v2634_v22 = vpop.f32.mrf.mxu3 }
 0x50f   :  { %v3539_v23 = vpack.c.bf16 %v3304_v58, %v3304_v58  ;;  %v1297_v21 = vadd.f32 %v1296_v38, %v4723_v54  ;;  %3342 = vmatmul.bf16.gmra.mxu0 %v3061_v56  ;;  %v2635_v18 = vadd.f32 %v2634_v22, %v5355_v52  ;;  %v2274_v29 = vmax.f32 %v6903_v39, 0.0 }
 0x511   :  { %3668 = vst.msk [vmem:[%s7631_s5 + $0xe0] sm:$0xf] %vm3611_vm1, %v3539_v23  ;;  %v6900_v8 = vadd.f32 %v1297_v21, %v6500_v3  ;;  %v2843_v13 = vadd.f32 %v2635_v18, %v6517_v41 }
 0x512   :  { %v1966_v30 = vpop.f32.mrf.mxu2 }
 0x513   :  { %v1578_v9 = vmax.f32 %v6900_v8, 0.0  ;;  %v1967_v16 = vadd.f32 %v1966_v30, %v5028_v14  ;;  %v2971_v22 = vmax.f32 %v2843_v13, 0.0 }
 0x514   :  { %v3305_v28 = vpop.f32.mrf.mxu0 }
 0x515   :  { %v6910_v32 = vadd.f32 %v1967_v16, %v6512_v20  ;;  %v3306_v55 = vadd.f32 %v3305_v28, %v5654_v27  ;;  %v1650_v3 = vpack.c.bf16 %v1578_v9, %v1577_v62 }
 0x516   :  { %v1299_v31 = vpop.f32.mrf.mxu1  ;;  %v2636_v36 = vpop.f32.mrf.mxu3 }
 0x517   :  { %v2275_v49 = vmax.f32 %v6910_v32, 0.0  ;;  %v3540_v58 = vpack.c.bf16 %v3306_v55, %v3306_v55  ;;  %v2637_v56 = vadd.f32 %v2636_v36, %v5355_v52  ;;  %2008 = vmatmul.bf16.gmra.mxu2 %v1650_v3  ;;  %v1300_v23 = vadd.f32 %v1299_v31, %v4723_v54 }
 0x519   :  { %3669 = vst.msk [vmem:[%s7631_s5 + $0xe4] sm:$0xf] %vm3611_vm1, %v3540_v58  ;;  %v2844_v20 = vadd.f32 %v2637_v56, %v6524_v46  ;;  %v2356_v12 = vpack.c.bf16 %v2275_v49, %v2274_v29  ;;  %v6926_v28 = vadd.f32 %v1300_v23, %v6540_v47 }
 0x51a   :  { %v1969_v38 = vpop.f32.mrf.mxu2 }
 0x51b   :  { %v2972_v21 = vmax.f32 %v2844_v20, 0.0  ;;  %2678 = vmatmul.bf16.gmra.mxu3 %v2356_v12  ;;  %v1970_v9 = vadd.f32 %v1969_v38, %v5028_v14  ;;  %v1579_v36 = vmax.f32 %v6926_v28, 0.0 }
 0x51c   :  { %v3308_v41 = vpop.f32.mrf.mxu0 }
 0x51d   :  { %v3309_v30 = vadd.f32 %v3308_v41, %v5654_v27  ;;  %v3062_v62 = vpack.c.bf16 %v2972_v21, %v2971_v22  ;;  %v6937_v29 = vadd.f32 %v1970_v9, %v6548_v15 }
 0x51e   :  { %v1301_v18 = vpop.f32.mrf.mxu1  ;;  %v2639_v16 = vpop.f32.mrf.mxu3 }
 0x51f   :  { %v3541_v55 = vpack.c.bf16 %v3309_v30, %v3309_v30  ;;  %v1302_v46 = vadd.f32 %v1301_v18, %v4723_v54  ;;  %3347 = vmatmul.bf16.gmra.mxu0 %v3062_v62  ;;  %v2640_v13 = vadd.f32 %v2639_v16, %v5355_v52  ;;  %v2276_v12 = vmax.f32 %v6937_v29, 0.0 }
 0x521   :  { %3670 = vst.msk [vmem:[%s7631_s5 + $0xe8] sm:$0xf] %vm3611_vm1, %v3541_v55  ;;  %v6934_v3 = vadd.f32 %v1302_v46, %v6544_v6  ;;  %v2845_v22 = vadd.f32 %v2640_v13, %v6561_v34 }
 0x522   :  { %v1971_v31 = vpop.f32.mrf.mxu2 }
 0x523   :  { %v1580_v47 = vmax.f32 %v6934_v3, 0.0  ;;  %v1972_v49 = vadd.f32 %v1971_v31, %v5028_v14  ;;  %v2973_v9 = vmax.f32 %v2845_v22, 0.0 }
 0x524   :  { %v3310_v58 = vpop.f32.mrf.mxu0 }
 0x525   :  { %v6944_v56 = vadd.f32 %v1972_v49, %v6556_v17  ;;  %v3311_v20 = vadd.f32 %v3310_v58, %v5654_v27  ;;  %v1651_v6 = vpack.c.bf16 %v1580_v47, %v1579_v36 }
 0x526   :  { %v1304_v15 = vpop.f32.mrf.mxu1  ;;  %v2641_v38 = vpop.f32.mrf.mxu3 }
 0x527   :  { %v2277_v23 = vmax.f32 %v6944_v56, 0.0  ;;  %v3542_v21 = vpack.c.bf16 %v3311_v20, %v3311_v20  ;;  %v2642_v41 = vadd.f32 %v2641_v38, %v5355_v52  ;;  %2013 = vmatmul.bf16.gmra.mxu2 %v1651_v6  ;;  %v1305_v18 = vadd.f32 %v1304_v15, %v4723_v54 }
 0x529   :  { %3671 = vst.msk [vmem:[%s7631_s5 + $0xec] sm:$0xf] %vm3611_vm1, %v3542_v21  ;;  %v2846_v17 = vadd.f32 %v2642_v41, %v6568_v0  ;;  %v2357_v30 = vpack.c.bf16 %v2277_v23, %v2276_v12  ;;  %v6960_v13 = vadd.f32 %v1305_v18, %v6584_v63 }
 0x52a   :  { %v1974_v62 = vpop.f32.mrf.mxu2 }
 0x52b   :  { %v2974_v16 = vmax.f32 %v2846_v17, 0.0  ;;  %2683 = vmatmul.bf16.gmra.mxu3 %v2357_v30  ;;  %v1975_v31 = vadd.f32 %v1974_v62, %v5028_v14  ;;  %v1581_v12 = vmax.f32 %v6960_v13, 0.0 }
 0x52c   :  { %v3313_v34 = vpop.f32.mrf.mxu0 }
 0x52d   :  { %v3314_v55 = vadd.f32 %v3313_v34, %v5654_v27  ;;  %v3063_v46 = vpack.c.bf16 %v2974_v16, %v2973_v9  ;;  %v6971_v20 = vadd.f32 %v1975_v31, %v6592_v1 }
 0x52e   :  { %v1306_v36 = vpop.f32.mrf.mxu1  ;;  %v2644_v47 = vpop.f32.mrf.mxu3 }
 0x52f   :  { %v3543_v49 = vpack.c.bf16 %v3314_v55, %v3314_v55  ;;  %v1307_v0 = vadd.f32 %v1306_v36, %v4723_v54  ;;  %3352 = vmatmul.bf16.gmra.mxu0 %v3063_v46  ;;  %v2645_v15 = vadd.f32 %v2644_v47, %v5355_v52  ;;  %v2278_v41 = vmax.f32 %v6971_v20, 0.0 }
 0x531   :  { %3672 = vst.msk [vmem:[%s7631_s5 + $0xf0] sm:$0xf] %vm3611_vm1, %v3543_v49  ;;  %v6968_v58 = vadd.f32 %v1307_v0, %v6588_v59  ;;  %v2847_v30 = vadd.f32 %v2645_v15, %v6605_v2 }
 0x532   :  { %v1976_v6 = vpop.f32.mrf.mxu2 }
 0x533   :  { %v1582_v63 = vmax.f32 %v6968_v58, 0.0  ;;  %v1977_v38 = vadd.f32 %v1976_v6, %v5028_v14  ;;  %v2975_v55 = vmax.f32 %v2847_v30, 0.0 }
 0x534   :  { %v3315_v22 = vpop.f32.mrf.mxu0 }
 0x535   :  { %v6978_v23 = vadd.f32 %v1977_v38, %v6600_v48  ;;  %v3316_v21 = vadd.f32 %v3315_v22, %v5654_v27  ;;  %v1652_v59 = vpack.c.bf16 %v1582_v63, %v1581_v12 }
 0x536   :  { %v1309_v1 = vpop.f32.mrf.mxu1  ;;  %v2646_v17 = vpop.f32.mrf.mxu3 }
 0x537   :  { %v2279_v62 = vmax.f32 %v6978_v23, 0.0  ;;  %v3544_v9 = vpack.c.bf16 %v3316_v21, %v3316_v21  ;;  %v2647_v18 = vadd.f32 %v2646_v17, %v5355_v52  ;;  %2018 = vmatmul.bf16.gmra.mxu2 %v1652_v59  ;;  %v1310_v46 = vadd.f32 %v1309_v1, %v4723_v54 }
 0x539   :  { %3673 = vst.msk [vmem:[%s7631_s5 + $0xf4] sm:$0xf] %vm3611_vm1, %v3544_v9  ;;  %v2848_v48 = vadd.f32 %v2647_v18, %v6612_v5  ;;  %v2358_v16 = vpack.c.bf16 %v2279_v62, %v2278_v41  ;;  %v6994_v12 = vadd.f32 %v1310_v46, %v6628_v42 }
 0x53a   :  { %v1979_v34 = vpop.f32.mrf.mxu2 }
 0x53b   :  { %v2976_v31 = vmax.f32 %v2848_v48, 0.0  ;;  %2688 = vmatmul.bf16.gmra.mxu3 %v2358_v16  ;;  %v1980_v49 = vadd.f32 %v1979_v34, %v5028_v14  ;;  %v1583_v21 = vmax.f32 %v6994_v12, 0.0 }
 0x53c   :  { %v3318_v2 = vpop.f32.mrf.mxu0 }
 0x53d   :  { %v3319_v36 = vadd.f32 %v3318_v2, %v5654_v27  ;;  %v3064_v47 = vpack.c.bf16 %v2976_v31, %v2975_v55  ;;  %v7005_v38 = vadd.f32 %v1980_v49, %v6636_v10 }
 0x53e   :  { %v1311_v0 = vpop.f32.mrf.mxu1  ;;  %v2649_v6 = vpop.f32.mrf.mxu3 }
 0x53f   :  { %v3545_v63 = vpack.c.bf16 %v3319_v36, %v3319_v36  ;;  %v1312_v5 = vadd.f32 %v1311_v0, %v4723_v54  ;;  %3357 = vmatmul.bf16.gmra.mxu0 %v3064_v47  ;;  %v2650_v59 = vadd.f32 %v2649_v6, %v5355_v52  ;;  %v2280_v62 = vmax.f32 %v7005_v38, 0.0 }
 0x541   :  { %3674 = vst.msk [vmem:[%s7631_s5 + $0xf8] sm:$0xf] %vm3611_vm1, %v3545_v63  ;;  %v7002_v15 = vadd.f32 %v1312_v5, %v6632_v61  ;;  %v2849_v18 = vadd.f32 %v2650_v59, %v6649_v40 }
 0x542   :  { %v1981_v22 = vpop.f32.mrf.mxu2 }
 0x543   :  { %v1584_v42 = vmax.f32 %v7002_v15, 0.0  ;;  %v1982_v41 = vadd.f32 %v1981_v22, %v5028_v14  ;;  %v2977_v31 = vmax.f32 %v2849_v18, 0.0 }
 0x544   :  { %v3320_v1 = vpop.f32.mrf.mxu0 }
 0x545   :  { %v7012_v17 = vadd.f32 %v1982_v41, %v6644_v33  ;;  %v3321_v30 = vadd.f32 %v3320_v1, %v5654_v27  ;;  %v1653_v61 = vpack.c.bf16 %v1584_v42, %v1583_v21  ;;  %v8020_v42 = vld [vmem:[#allocation21_spill] sm:$0xff] }
 0x546   :  { %v1314_v10 = vpop.f32.mrf.mxu1  ;;  %v2651_v9 = vpop.f32.mrf.mxu3 }
 0x547   :  { %v2281_v48 = vmax.f32 %v7012_v17, 0.0  ;;  %v3546_v16 = vpack.c.bf16 %v3321_v30, %v3321_v30  ;;  %v2652_v34 = vadd.f32 %v2651_v9, %v5355_v52  ;;  %2023 = vmatmul.bf16.gmra.mxu2 %v1653_v61  ;;  %v1315_v2 = vadd.f32 %v1314_v10, %v4723_v54  ;;  %v8021_v10 = vld [vmem:[#allocation27_spill] sm:$0xff] }
 0x549   :  { %3675 = vst.msk [vmem:[%s7631_s5 + $0xfc] sm:$0xf] %vm3611_vm1, %v3546_v16  ;;  %v2850_v33 = vadd.f32 %v2652_v34, %v6656_v60  ;;  %v2359_v55 = vpack.c.bf16 %v2281_v48, %v2280_v62  ;;  %v7028_v5 = vadd.f32 %v1315_v2, %v6672_v53 }
 0x54a   :  { %v1984_v46 = vpop.f32.mrf.mxu2 }
 0x54b   :  { %v2978_v36 = vmax.f32 %v2850_v33, 0.0  ;;  %2693 = vmatmul.bf16.gmra.mxu3 %v2359_v55  ;;  %v1985_v0 = vadd.f32 %v1984_v46, %v5028_v14  ;;  %v1585_v1 = vmax.f32 %v7028_v5, 0.0 }
 0x54c   :  { %v3323_v40 = vpop.f32.mrf.mxu0 }
 0x54d   :  { %v3324_v47 = vadd.f32 %v3323_v40, %v5654_v27  ;;  %v3065_v49 = vpack.c.bf16 %v2978_v36, %v2977_v31  ;;  %v7039_v59 = vadd.f32 %v1985_v0, %v8020_v42 }
 0x54e   :  { %v1316_v6 = vpop.f32.mrf.mxu1  ;;  %v2654_v63 = vpop.f32.mrf.mxu3 }
 0x54f   :  { %v3547_v22 = vpack.c.bf16 %v3324_v47, %v3324_v47  ;;  %v1317_v60 = vadd.f32 %v1316_v6, %v4723_v54  ;;  %3362 = vmatmul.bf16.gmra.mxu0 %v3065_v49  ;;  %v2655_v30 = vadd.f32 %v2654_v63, %v5355_v52  ;;  %v2282_v48 = vmax.f32 %v7039_v59, 0.0 }
 0x551   :  { %3676 = vst.msk [vmem:[%s7631_s5 + $0x100] sm:$0xf] %vm3611_vm1, %v3547_v22  ;;  %v7036_v21 = vadd.f32 %v1317_v60, %v6676_v35  ;;  %v2851_v33 = vadd.f32 %v2655_v30, %v6693_v50 }
 0x552   :  { %v1986_v41 = vpop.f32.mrf.mxu2 }
 0x553   :  { %v1586_v53 = vmax.f32 %v7036_v21, 0.0  ;;  %v1987_v61 = vadd.f32 %v1986_v41, %v5028_v14  ;;  %v2979_v47 = vmax.f32 %v2851_v33, 0.0 }
 0x554   :  { %v3325_v62 = vpop.f32.mrf.mxu0 }
 0x555   :  { %v7046_v9 = vadd.f32 %v1987_v61, %v8021_v10  ;;  %v3326_v18 = vadd.f32 %v3325_v62, %v5654_v27  ;;  %v1654_v35 = vpack.c.bf16 %v1586_v53, %v1585_v1  ;;  %v8022_v53 = vld [vmem:[#allocation40_spill] sm:$0xff]  ;;  %v8023_v61 = vld [vmem:[#allocation41_spill] sm:$0xff] }
 0x556   :  { %v1319_v16 = vpop.f32.mrf.mxu1  ;;  %v2656_v34 = vpop.f32.mrf.mxu3 }
 0x557   :  { %v2283_v55 = vmax.f32 %v7046_v9, 0.0  ;;  %v3548_v46 = vpack.c.bf16 %v3326_v18, %v3326_v18  ;;  %v2657_v31 = vadd.f32 %v2656_v34, %v5355_v52  ;;  %2028 = vmatmul.bf16.gmra.mxu2 %v1654_v35  ;;  %v1320_v49 = vadd.f32 %v1319_v16, %v4723_v54  ;;  %v8024_v34 = vld [vmem:[#allocation25_spill] sm:$0xff] }
 0x559   :  { %3677 = vst.msk [vmem:[%s7631_s5 + $0x104] sm:$0xf] %vm3611_vm1, %v3548_v46  ;;  %v2852_v2 = vadd.f32 %v2657_v31, %v6700_v4  ;;  %v2360_v36 = vpack.c.bf16 %v2283_v55, %v2282_v48  ;;  %v7062_v41 = vadd.f32 %v1320_v49, %v6716_v7 }
 0x55a   :  { %v1989_v40 = vpop.f32.mrf.mxu2 }
 0x55b   :  { %v2980_v0 = vmax.f32 %v2852_v2, 0.0  ;;  %2698 = vmatmul.bf16.gmra.mxu3 %v2360_v36  ;;  %v1990_v22 = vadd.f32 %v1989_v40, %v5028_v14  ;;  %v1587_v18 = vmax.f32 %v7062_v41, 0.0 }
 0x55c   :  { %v3328_v50 = vpop.f32.mrf.mxu0 }
 0x55d   :  { %v3329_v6 = vadd.f32 %v3328_v50, %v5654_v27  ;;  %v3066_v63 = vpack.c.bf16 %v2980_v0, %v2979_v47  ;;  %v7073_v62 = vadd.f32 %v1990_v22, %v8023_v61 }
 0x55e   :  { %v1321_v60 = vpop.f32.mrf.mxu1  ;;  %v2659_v42 = vpop.f32.mrf.mxu3 }
 0x55f   :  { %v3549_v1 = vpack.c.bf16 %v3329_v6, %v3329_v6  ;;  %v1322_v4 = vadd.f32 %v1321_v60, %v4723_v54  ;;  %3367 = vmatmul.bf16.gmra.mxu0 %v3066_v63  ;;  %v2660_v35 = vadd.f32 %v2659_v42, %v5355_v52  ;;  %v2284_v31 = vmax.f32 %v7073_v62, 0.0 }
 0x561   :  { %3678 = vst.msk [vmem:[%s7631_s5 + $0x108] sm:$0xf] %vm3611_vm1, %v3549_v1  ;;  %v7070_v30 = vadd.f32 %v1322_v4, %v8022_v53  ;;  %v2853_v40 = vadd.f32 %v2660_v35, %v6737_v57 }
 0x562   :  { %v1991_v10 = vpop.f32.mrf.mxu2 }
 0x563   :  { %v1588_v7 = vmax.f32 %v7070_v30, 0.0  ;;  %v1992_v48 = vadd.f32 %v1991_v10, %v5028_v14  ;;  %v2981_v22 = vmax.f32 %v2853_v40, 0.0 }
 0x564   :  { %v3330_v16 = vpop.f32.mrf.mxu0 }
 0x565   :  { %v7080_v33 = vadd.f32 %v1992_v48, %v8024_v34  ;;  %v3331_v55 = vadd.f32 %v3330_v16, %v5654_v27  ;;  %v1655_v46 = vpack.c.bf16 %v1588_v7, %v1587_v18 }
 0x566   :  { %v1324_v2 = vpop.f32.mrf.mxu1  ;;  %v2661_v36 = vpop.f32.mrf.mxu3 }
 0x567   :  { %v2285_v47 = vmax.f32 %v7080_v33, 0.0  ;;  %v3550_v49 = vpack.c.bf16 %v3331_v55, %v3331_v55  ;;  %v2662_v0 = vadd.f32 %v2661_v36, %v5355_v52  ;;  %2033 = vmatmul.bf16.gmra.mxu2 %v1655_v46  ;;  %v1325_v60 = vadd.f32 %v1324_v2, %v4723_v54  ;;  %v8025_v2 = vld [vmem:[#allocation42_spill] sm:$0xff] }
 0x569   :  { %3679 = vst.msk [vmem:[%s7631_s5 + $0x10c] sm:$0xf] %vm3611_vm1, %v3550_v49  ;;  %v2854_v50 = vadd.f32 %v2662_v0, %v6744_v37  ;;  %v2361_v6 = vpack.c.bf16 %v2285_v47, %v2284_v31  ;;  %v7096_v18 = vadd.f32 %v1325_v60, %v6760_v11 }
 0x56a   :  { %v1994_v63 = vpop.f32.mrf.mxu2 }
 0x56b   :  { %v2982_v42 = vmax.f32 %v2854_v50, 0.0  ;;  %2703 = vmatmul.bf16.gmra.mxu3 %v2361_v6  ;;  %v1995_v53 = vadd.f32 %v1994_v63, %v5028_v14  ;;  %v1589_v34 = vmax.f32 %v7096_v18, 0.0 }
 0x56c   :  { %v3333_v57 = vpop.f32.mrf.mxu0 }
 0x56d   :  { %v3334_v1 = vadd.f32 %v3333_v57, %v5654_v27  ;;  %v3067_v4 = vpack.c.bf16 %v2982_v42, %v2981_v22  ;;  %v7107_v48 = vadd.f32 %v1995_v53, %v6768_v43  ;;  %v8026_v22 = vld [vmem:[#allocation44_spill] sm:$0xff] }
 0x56e   :  { %v1326_v61 = vpop.f32.mrf.mxu1  ;;  %v2664_v10 = vpop.f32.mrf.mxu3 }
 0x56f   :  { %v3551_v7 = vpack.c.bf16 %v3334_v1, %v3334_v1  ;;  %v1327_v37 = vadd.f32 %v1326_v61, %v4723_v54  ;;  %3372 = vmatmul.bf16.gmra.mxu0 %v3067_v4  ;;  %v2665_v55 = vadd.f32 %v2664_v10, %v5355_v52  ;;  %v2286_v47 = vmax.f32 %v7107_v48, 0.0 }
 0x571   :  { %3680 = vst.msk [vmem:[%s7631_s5 + $0x110] sm:$0xf] %vm3611_vm1, %v3551_v7  ;;  %v7104_v35 = vadd.f32 %v1327_v37, %v6764_v45  ;;  %v2855_v0 = vadd.f32 %v2665_v55, %v6781_v25 }
 0x572   :  { %v1996_v16 = vpop.f32.mrf.mxu2 }
 0x573   :  { %v1590_v11 = vmax.f32 %v7104_v35, 0.0  ;;  %v1997_v46 = vadd.f32 %v1996_v16, %v5028_v14  ;;  %v2983_v1 = vmax.f32 %v2855_v0, 0.0 }
 0x574   :  { %v3335_v31 = vpop.f32.mrf.mxu0 }
 0x575   :  { %v7114_v36 = vadd.f32 %v1997_v46, %v8025_v2  ;;  %v3336_v40 = vadd.f32 %v3335_v31, %v5654_v27  ;;  %v1656_v45 = vpack.c.bf16 %v1590_v11, %v1589_v34  ;;  %v8027_v34 = vld [vmem:[#allocation31_spill] sm:$0xff]  ;;  %v8028_v31 = vld [vmem:[#allocation29_spill] sm:$0xff] }
 0x576   :  { %v1329_v43 = vpop.f32.mrf.mxu1  ;;  %v2666_v49 = vpop.f32.mrf.mxu3 }
 0x577   :  { %v2287_v50 = vmax.f32 %v7114_v36, 0.0  ;;  %v3552_v6 = vpack.c.bf16 %v3336_v40, %v3336_v40  ;;  %v2667_v63 = vadd.f32 %v2666_v49, %v5355_v52  ;;  %2038 = vmatmul.bf16.gmra.mxu2 %v1656_v45  ;;  %v1330_v4 = vadd.f32 %v1329_v43, %v4723_v54  ;;  %v8029_v40 = vld [vmem:[#allocation34_spill] sm:$0xff] }
 0x579   :  { %3681 = vst.msk [vmem:[%s7631_s5 + $0x114] sm:$0xf] %vm3611_vm1, %v3552_v6  ;;  %v2856_v60 = vadd.f32 %v2667_v63, %v8026_v22  ;;  %v2362_v42 = vpack.c.bf16 %v2287_v50, %v2286_v47  ;;  %v7130_v11 = vadd.f32 %v1330_v4, %v8027_v34  ;;  %v8030_v63 = vld [vmem:[#allocation32_spill] sm:$0xff] }
 0x57a   :  { %v1999_v57 = vpop.f32.mrf.mxu2 }
 0x57b   :  { %v2984_v53 = vmax.f32 %v2856_v60, 0.0  ;;  %2708 = vmatmul.bf16.gmra.mxu3 %v2362_v42  ;;  %v2000_v7 = vadd.f32 %v1999_v57, %v5028_v14  ;;  %v1591_v43 = vmax.f32 %v7130_v11, 0.0 }
 0x57c   :  { %v3338_v25 = vpop.f32.mrf.mxu0 }
 0x57d   :  { %v3339_v61 = vadd.f32 %v3338_v25, %v5654_v27  ;;  %v3068_v10 = vpack.c.bf16 %v2984_v53, %v2983_v1  ;;  %v7141_v45 = vadd.f32 %v2000_v7, %v8029_v40 }
 0x57e   :  { %v1331_v37 = vpop.f32.mrf.mxu1  ;;  %v2669_v16 = vpop.f32.mrf.mxu3 }
 0x57f   :  { %v3553_v55 = vpack.c.bf16 %v3339_v61, %v3339_v61  ;;  %v1332_v46 = vadd.f32 %v1331_v37, %v4723_v54  ;;  %3377 = vmatmul.bf16.gmra.mxu0 %v3068_v10  ;;  %v2670_v0 = vadd.f32 %v2669_v16, %v5355_v52  ;;  %v2288_v57 = vmax.f32 %v7141_v45, 0.0 }
 0x581   :  { %3682 = vst.msk [vmem:[%s7631_s5 + $0x118] sm:$0xf] %vm3611_vm1, %v3553_v55  ;;  %v7138_v2 = vadd.f32 %v1332_v46, %v8028_v31  ;;  %v2857_v53 = vadd.f32 %v2670_v0, %v6825_v51  ;;  %v8031_v0 = vld [vmem:[#allocation79_spill] sm:$0xff] }
 0x582   :  { %v2001_v47 = vpop.f32.mrf.mxu2 }
 0x583   :  { %v1592_v49 = vmax.f32 %v7138_v2, 0.0  ;;  %v2002_v50 = vadd.f32 %v2001_v47, %v5028_v14  ;;  %v2985_v34 = vmax.f32 %v2857_v53, 0.0 }
 0x584   :  { %v3340_v6 = vpop.f32.mrf.mxu0 }
 0x585   :  { %v7148_v22 = vadd.f32 %v2002_v50, %v8030_v63  ;;  %v3341_v60 = vadd.f32 %v3340_v6, %v5654_v27  ;;  %v1657_v42 = vpack.c.bf16 %v1592_v49, %v1591_v43  ;;  %v8032_v63 = vld [vmem:[#allocation81_spill] sm:$0xff] }
 0x586   :  { %v1334_v1 = vpop.f32.mrf.mxu1  ;;  %v2671_v4 = vpop.f32.mrf.mxu3 }
 0x587   :  { %v2289_v25 = vmax.f32 %v7148_v22, 0.0  ;;  %v3554_v61 = vpack.c.bf16 %v3341_v60, %v3341_v60  ;;  %v2672_v10 = vadd.f32 %v2671_v4, %v5355_v52  ;;  %2043 = vmatmul.bf16.gmra.mxu2 %v1657_v42  ;;  %v1335_v55 = vadd.f32 %v1334_v1, %v4723_v54  ;;  %v8033_v42 = vld [vmem:[#allocation47_spill] sm:$0xff] }
 0x589   :  { %3683 = vst.msk [vmem:[%s7631_s5 + $0x11c] sm:$0xf] %vm3611_vm1, %v3554_v61  ;;  %v2858_v7 = vadd.f32 %v2672_v10, %v6832_v24  ;;  %v2363_v37 = vpack.c.bf16 %v2289_v25, %v2288_v57  ;;  %v7164_v50 = vadd.f32 %v1335_v55, %v8031_v0  ;;  %v8034_v10 = vld [vmem:[#allocation49_spill] sm:$0xff] }
 0x58a   :  { %v2004_v16 = vpop.f32.mrf.mxu2 }
 0x58b   :  { %v2986_v46 = vmax.f32 %v2858_v7, 0.0  ;;  %2713 = vmatmul.bf16.gmra.mxu3 %v2363_v37  ;;  %v2005_v47 = vadd.f32 %v2004_v16, %v5028_v14  ;;  %v1593_v4 = vmax.f32 %v7164_v50, 0.0 }
 0x58c   :  { %v3343_v51 = vpop.f32.mrf.mxu0 }
 0x58d   :  { %v3344_v31 = vadd.f32 %v3343_v51, %v5654_v27  ;;  %v3069_v40 = vpack.c.bf16 %v2986_v46, %v2985_v34  ;;  %v7175_v57 = vadd.f32 %v2005_v47, %v8033_v42 }
 0x58e   :  { %v1336_v43 = vpop.f32.mrf.mxu1  ;;  %v2674_v49 = vpop.f32.mrf.mxu3 }
 0x58f   :  { %v3555_v6 = vpack.c.bf16 %v3344_v31, %v3344_v31  ;;  %v1337_v24 = vadd.f32 %v1336_v43, %v4723_v54  ;;  %3382 = vmatmul.bf16.gmra.mxu0 %v3069_v40  ;;  %v2675_v25 = vadd.f32 %v2674_v49, %v5355_v52  ;;  %v2290_v34 = vmax.f32 %v7175_v57, 0.0 }
 0x591   :  { %3684 = vst.msk [vmem:[%s7631_s5 + $0x120] sm:$0xf] %vm3611_vm1, %v3555_v6  ;;  %v7172_v60 = vadd.f32 %v1337_v24, %v8032_v63  ;;  %v2859_v46 = vadd.f32 %v2675_v25, %v6869_v26 }
 0x592   :  { %v2006_v1 = vpop.f32.mrf.mxu2 }
 0x593   :  { %v1594_v53 = vmax.f32 %v7172_v60, 0.0  ;;  %v2007_v54 = vadd.f32 %v2006_v1, %v5028_v14  ;;  %v2987_v0 = vmax.f32 %v2859_v46, 0.0 }
 0x594   :  { %v3345_v61 = vpop.f32.mrf.mxu0 }
 0x595   :  { %v7182_v7 = vadd.f32 %v2007_v54, %v8034_v10  ;;  %v3346_v37 = vadd.f32 %v3345_v61, %v5654_v27  ;;  %v1658_v16 = vpack.c.bf16 %v1594_v53, %v1593_v4 }
 0x596   :  { %v2676_v55 = vpop.f32.mrf.mxu3 }
 0x597   :  { %v2291_v51 = vmax.f32 %v7182_v7, 0.0  ;;  %v3556_v31 = vpack.c.bf16 %v3346_v37, %v3346_v37  ;;  %v2677_v40 = vadd.f32 %v2676_v55, %v5355_v52  ;;  %2048 = vmatmul.bf16.gmra.mxu2 %v1658_v16 }
 0x599   :  { %3685 = vst.msk [vmem:[%s7631_s5 + $0x124] sm:$0xf] %vm3611_vm1, %v3556_v31  ;;  %v2860_v47 = vadd.f32 %v2677_v40, %v6876_v19  ;;  %v2364_v43 = vpack.c.bf16 %v2291_v51, %v2290_v34 }
 0x59a   :  { %v2009_v49 = vpop.f32.mrf.mxu2 }
 0x59b   :  { %v2988_v6 = vmax.f32 %v2860_v47, 0.0  ;;  %2718 = vmatmul.bf16.gmra.mxu3 %v2364_v43  ;;  %v2010_v42 = vadd.f32 %v2009_v49, %v5028_v14 }
 0x59c   :  { %v3348_v24 = vpop.f32.mrf.mxu0 }
 0x59d   :  { %v3349_v26 = vadd.f32 %v3348_v24, %v5654_v27  ;;  %v3070_v63 = vpack.c.bf16 %v2988_v6, %v2987_v0  ;;  %v7201_v19 = vadd.f32 %v2010_v42, %v6892_v44 }
 0x59e   :  { %v2679_v1 = vpop.f32.mrf.mxu3 }
 0x59f   :  { %v3557_v4 = vpack.c.bf16 %v3349_v26, %v3349_v26  ;;  %3387 = vmatmul.bf16.gmra.mxu0 %v3070_v63  ;;  %v2680_v25 = vadd.f32 %v2679_v1, %v5355_v52  ;;  %v2292_v16 = vmax.f32 %v7201_v19, 0.0 }
 0x5a1   :  { %3686 = vst.msk [vmem:[%s7631_s5 + $0x128] sm:$0xf] %vm3611_vm1, %v3557_v4  ;;  %v2861_v55 = vadd.f32 %v2680_v25, %v6903_v39 }
 0x5a2   :  { %v2011_v53 = vpop.f32.mrf.mxu2 }
 0x5a3   :  { %v2012_v54 = vadd.f32 %v2011_v53, %v5028_v14  ;;  %v2989_v47 = vmax.f32 %v2861_v55, 0.0 }
 0x5a4   :  { %v3350_v61 = vpop.f32.mrf.mxu0 }
 0x5a5   :  { %v7206_v10 = vadd.f32 %v2012_v54, %v6900_v8  ;;  %v3351_v37 = vadd.f32 %v3350_v61, %v5654_v27 }
 0x5a6   :  { %v2681_v34 = vpop.f32.mrf.mxu3 }
 0x5a7   :  { %v2293_v46 = vmax.f32 %v7206_v10, 0.0  ;;  %v3558_v44 = vpack.c.bf16 %v3351_v37, %v3351_v37  ;;  %v2682_v51 = vadd.f32 %v2681_v34, %v5355_v52 }
 0x5a9   :  { %3687 = vst.msk [vmem:[%s7631_s5 + $0x12c] sm:$0xf] %vm3611_vm1, %v3558_v44  ;;  %v2862_v8 = vadd.f32 %v2682_v51, %v6910_v32  ;;  %v2365_v31 = vpack.c.bf16 %v2293_v46, %v2292_v16 }
 0x5aa   :  { %v2014_v40 = vpop.f32.mrf.mxu2 }
 0x5ab   :  { %v2990_v43 = vmax.f32 %v2862_v8, 0.0  ;;  %2723 = vmatmul.bf16.gmra.mxu3 %v2365_v31  ;;  %v2015_v6 = vadd.f32 %v2014_v40, %v5028_v14 }
 0x5ac   :  { %v3353_v49 = vpop.f32.mrf.mxu0 }
 0x5ad   :  { %v3354_v39 = vadd.f32 %v3353_v49, %v5654_v27  ;;  %v3071_v0 = vpack.c.bf16 %v2990_v43, %v2989_v47  ;;  %v7225_v32 = vadd.f32 %v2015_v6, %v6926_v28 }
 0x5ae   :  { %v2684_v24 = vpop.f32.mrf.mxu3 }
 0x5af   :  { %v3559_v26 = vpack.c.bf16 %v3354_v39, %v3354_v39  ;;  %3392 = vmatmul.bf16.gmra.mxu0 %v3071_v0  ;;  %v2685_v42 = vadd.f32 %v2684_v24, %v5355_v52  ;;  %v2294_v54 = vmax.f32 %v7225_v32, 0.0 }
 0x5b1   :  { %3688 = vst.msk [vmem:[%s7631_s5 + $0x130] sm:$0xf] %vm3611_vm1, %v3559_v26  ;;  %v2863_v37 = vadd.f32 %v2685_v42, %v6937_v29 }
 0x5b2   :  { %v2016_v63 = vpop.f32.mrf.mxu2 }
 0x5b3   :  { %v2017_v1 = vadd.f32 %v2016_v63, %v5028_v14  ;;  %v2991_v44 = vmax.f32 %v2863_v37, 0.0 }
 0x5b4   :  { %v3355_v4 = vpop.f32.mrf.mxu0 }
 0x5b5   :  { %v7230_v53 = vadd.f32 %v2017_v1, %v6934_v3  ;;  %v3356_v25 = vadd.f32 %v3355_v4, %v5654_v27 }
 0x5b6   :  { %v2686_v61 = vpop.f32.mrf.mxu3 }
 0x5b7   :  { %v2295_v16 = vmax.f32 %v7230_v53, 0.0  ;;  %v3560_v28 = vpack.c.bf16 %v3356_v25, %v3356_v25  ;;  %v2687_v34 = vadd.f32 %v2686_v61, %v5355_v52 }
 0x5b9   :  { %3689 = vst.msk [vmem:[%s7631_s5 + $0x134] sm:$0xf] %vm3611_vm1, %v3560_v28  ;;  %v2864_v3 = vadd.f32 %v2687_v34, %v6944_v56  ;;  %v2366_v55 = vpack.c.bf16 %v2295_v16, %v2294_v54 }
 0x5ba   :  { %v2019_v46 = vpop.f32.mrf.mxu2 }
 0x5bb   :  { %v2992_v51 = vmax.f32 %v2864_v3, 0.0  ;;  %2728 = vmatmul.bf16.gmra.mxu3 %v2366_v55  ;;  %v2020_v40 = vadd.f32 %v2019_v46, %v5028_v14 }
 0x5bc   :  { %v3358_v8 = vpop.f32.mrf.mxu0 }
 0x5bd   :  { %v3359_v29 = vadd.f32 %v3358_v8, %v5654_v27  ;;  %v3072_v31 = vpack.c.bf16 %v2992_v51, %v2991_v44  ;;  %v7249_v56 = vadd.f32 %v2020_v40, %v6960_v13 }
 0x5be   :  { %v2689_v47 = vpop.f32.mrf.mxu3 }
 0x5bf   :  { %v3561_v43 = vpack.c.bf16 %v3359_v29, %v3359_v29  ;;  %3397 = vmatmul.bf16.gmra.mxu0 %v3072_v31  ;;  %v2690_v39 = vadd.f32 %v2689_v47, %v5355_v52  ;;  %v2296_v63 = vmax.f32 %v7249_v56, 0.0 }
 0x5c1   :  { %3690 = vst.msk [vmem:[%s7631_s5 + $0x138] sm:$0xf] %vm3611_vm1, %v3561_v43  ;;  %v2865_v1 = vadd.f32 %v2690_v39, %v6971_v20 }
 0x5c2   :  { %v2021_v49 = vpop.f32.mrf.mxu2 }
 0x5c3   :  { %v2022_v0 = vadd.f32 %v2021_v49, %v5028_v14  ;;  %v2993_v37 = vmax.f32 %v2865_v1, 0.0 }
 0x5c4   :  { %v3360_v6 = vpop.f32.mrf.mxu0 }
 0x5c5   :  { %v7254_v24 = vadd.f32 %v2022_v0, %v6968_v58  ;;  %v3361_v26 = vadd.f32 %v3360_v6, %v5654_v27 }
 0x5c6   :  { %v2691_v42 = vpop.f32.mrf.mxu3 }
 0x5c7   :  { %v2297_v4 = vmax.f32 %v7254_v24, 0.0  ;;  %v3562_v13 = vpack.c.bf16 %v3361_v26, %v3361_v26  ;;  %v2692_v25 = vadd.f32 %v2691_v42, %v5355_v52 }
 0x5c9   :  { %3691 = vst.msk [vmem:[%s7631_s5 + $0x13c] sm:$0xf] %vm3611_vm1, %v3562_v13  ;;  %v2866_v58 = vadd.f32 %v2692_v25, %v6978_v23  ;;  %v2367_v54 = vpack.c.bf16 %v2297_v4, %v2296_v63 }
 0x5ca   :  { %v2024_v61 = vpop.f32.mrf.mxu2 }
 0x5cb   :  { %v2994_v16 = vmax.f32 %v2866_v58, 0.0  ;;  %2733 = vmatmul.bf16.gmra.mxu3 %v2367_v54  ;;  %v2025_v3 = vadd.f32 %v2024_v61, %v5028_v14 }
 0x5cc   :  { %v3363_v28 = vpop.f32.mrf.mxu0 }
 0x5cd   :  { %v3364_v20 = vadd.f32 %v3363_v28, %v5654_v27  ;;  %v3073_v34 = vpack.c.bf16 %v2994_v16, %v2993_v37  ;;  %v7273_v23 = vadd.f32 %v2025_v3, %v6994_v12 }
 0x5ce   :  { %v2694_v55 = vpop.f32.mrf.mxu3 }
 0x5cf   :  { %v3563_v46 = vpack.c.bf16 %v3364_v20, %v3364_v20  ;;  %3402 = vmatmul.bf16.gmra.mxu0 %v3073_v34  ;;  %v2695_v51 = vadd.f32 %v2694_v55, %v5355_v52  ;;  %v2298_v47 = vmax.f32 %v7273_v23, 0.0 }
 0x5d1   :  { %3692 = vst.msk [vmem:[%s7631_s5 + $0x140] sm:$0xf] %vm3611_vm1, %v3563_v46  ;;  %v2867_v49 = vadd.f32 %v2695_v51, %v7005_v38 }
 0x5d2   :  { %v2026_v44 = vpop.f32.mrf.mxu2 }
 0x5d3   :  { %v2027_v8 = vadd.f32 %v2026_v44, %v5028_v14  ;;  %v2995_v63 = vmax.f32 %v2867_v49, 0.0 }
 0x5d4   :  { %v3365_v29 = vpop.f32.mrf.mxu0 }
 0x5d5   :  { %v7278_v31 = vadd.f32 %v2027_v8, %v7002_v15  ;;  %v3366_v40 = vadd.f32 %v3365_v29, %v5654_v27 }
 0x5d6   :  { %v2696_v43 = vpop.f32.mrf.mxu3 }
 0x5d7   :  { %v2299_v39 = vmax.f32 %v7278_v31, 0.0  ;;  %v3564_v12 = vpack.c.bf16 %v3366_v40, %v3366_v40  ;;  %v2697_v0 = vadd.f32 %v2696_v43, %v5355_v52 }
 0x5d9   :  { %3693 = vst.msk [vmem:[%s7631_s5 + $0x144] sm:$0xf] %vm3611_vm1, %v3564_v12  ;;  %v2868_v15 = vadd.f32 %v2697_v0, %v7012_v17  ;;  %v2368_v6 = vpack.c.bf16 %v2299_v39, %v2298_v47 }
 0x5da   :  { %v2029_v26 = vpop.f32.mrf.mxu2 }
 0x5db   :  { %v2996_v42 = vmax.f32 %v2868_v15, 0.0  ;;  %2738 = vmatmul.bf16.gmra.mxu3 %v2368_v6  ;;  %v2030_v13 = vadd.f32 %v2029_v26, %v5028_v14 }
 0x5dc   :  { %v3368_v1 = vpop.f32.mrf.mxu0 }
 0x5dd   :  { %v3369_v38 = vadd.f32 %v3368_v1, %v5654_v27  ;;  %v3074_v4 = vpack.c.bf16 %v2996_v42, %v2995_v63  ;;  %v7297_v17 = vadd.f32 %v2030_v13, %v7028_v5 }
 0x5de   :  { %v2699_v25 = vpop.f32.mrf.mxu3 }
 0x5df   :  { %v3565_v58 = vpack.c.bf16 %v3369_v38, %v3369_v38  ;;  %3407 = vmatmul.bf16.gmra.mxu0 %v3074_v4  ;;  %v2700_v61 = vadd.f32 %v2699_v25, %v5355_v52  ;;  %v2300_v34 = vmax.f32 %v7297_v17, 0.0 }
 0x5e1   :  { %3694 = vst.msk [vmem:[%s7631_s5 + $0x148] sm:$0xf] %vm3611_vm1, %v3565_v58  ;;  %v2869_v55 = vadd.f32 %v2700_v61, %v7039_v59 }
 0x5e2   :  { %v2031_v54 = vpop.f32.mrf.mxu2 }
 0x5e3   :  { %v2032_v37 = vadd.f32 %v2031_v54, %v5028_v14  ;;  %v2997_v29 = vmax.f32 %v2869_v55, 0.0 }
 0x5e4   :  { %v3370_v16 = vpop.f32.mrf.mxu0 }
 0x5e5   :  { %v7302_v28 = vadd.f32 %v2032_v37, %v7036_v21  ;;  %v3371_v20 = vadd.f32 %v3370_v16, %v5654_v27 }
 0x5e6   :  { %v2701_v3 = vpop.f32.mrf.mxu3 }
 0x5e7   :  { %v2301_v46 = vmax.f32 %v7302_v28, 0.0  ;;  %v3566_v5 = vpack.c.bf16 %v3371_v20, %v3371_v20  ;;  %v2702_v44 = vadd.f32 %v2701_v3, %v5355_v52 }
 0x5e9   :  { %3695 = vst.msk [vmem:[%s7631_s5 + $0x14c] sm:$0xf] %vm3611_vm1, %v3566_v5  ;;  %v2870_v21 = vadd.f32 %v2702_v44, %v7046_v9  ;;  %v2369_v51 = vpack.c.bf16 %v2301_v46, %v2300_v34 }
 0x5ea   :  { %v2034_v8 = vpop.f32.mrf.mxu2 }
 0x5eb   :  { %v2998_v40 = vmax.f32 %v2870_v21, 0.0  ;;  %2743 = vmatmul.bf16.gmra.mxu3 %v2369_v51  ;;  %v2035_v49 = vadd.f32 %v2034_v8, %v5028_v14 }
 0x5ec   :  { %v3373_v47 = vpop.f32.mrf.mxu0 }
 0x5ed   :  { %v3374_v59 = vadd.f32 %v3373_v47, %v5654_v27  ;;  %v3075_v43 = vpack.c.bf16 %v2998_v40, %v2997_v29  ;;  %v7321_v9 = vadd.f32 %v2035_v49, %v7062_v41 }
 0x5ee   :  { %v2704_v39 = vpop.f32.mrf.mxu3 }
 0x5ef   :  { %v3567_v12 = vpack.c.bf16 %v3374_v59, %v3374_v59  ;;  %3412 = vmatmul.bf16.gmra.mxu0 %v3075_v43  ;;  %v2705_v15 = vadd.f32 %v2704_v39, %v5355_v52  ;;  %v2302_v1 = vmax.f32 %v7321_v9, 0.0 }
 0x5f1   :  { %3696 = vst.msk [vmem:[%s7631_s5 + $0x150] sm:$0xf] %vm3611_vm1, %v3567_v12  ;;  %v2871_v4 = vadd.f32 %v2705_v15, %v7073_v62 }
 0x5f2   :  { %v2036_v0 = vpop.f32.mrf.mxu2 }
 0x5f3   :  { %v2037_v6 = vadd.f32 %v2036_v0, %v5028_v14  ;;  %v2999_v61 = vmax.f32 %v2871_v4, 0.0 }
 0x5f4   :  { %v3375_v26 = vpop.f32.mrf.mxu0 }
 0x5f5   :  { %v7326_v63 = vadd.f32 %v2037_v6, %v7070_v30  ;;  %v3376_v42 = vadd.f32 %v3375_v26, %v5654_v27 }
 0x5f6   :  { %v2706_v38 = vpop.f32.mrf.mxu3 }
 0x5f7   :  { %v2303_v13 = vmax.f32 %v7326_v63, 0.0  ;;  %v3568_v41 = vpack.c.bf16 %v3376_v42, %v3376_v42  ;;  %v2707_v25 = vadd.f32 %v2706_v38, %v5355_v52 }
 0x5f9   :  { %3697 = vst.msk [vmem:[%s7631_s5 + $0x154] sm:$0xf] %vm3611_vm1, %v3568_v41  ;;  %v2872_v30 = vadd.f32 %v2707_v25, %v7080_v33  ;;  %v2370_v58 = vpack.c.bf16 %v2303_v13, %v2302_v1 }
 0x5fa   :  { %v2039_v54 = vpop.f32.mrf.mxu2 }
 0x5fb   :  { %v3000_v37 = vmax.f32 %v2872_v30, 0.0  ;;  %2748 = vmatmul.bf16.gmra.mxu3 %v2370_v58  ;;  %v2040_v34 = vadd.f32 %v2039_v54, %v5028_v14 }
 0x5fc   :  { %v3378_v16 = vpop.f32.mrf.mxu0 }
 0x5fd   :  { %v3379_v62 = vadd.f32 %v3378_v16, %v5654_v27  ;;  %v3076_v20 = vpack.c.bf16 %v3000_v37, %v2999_v61  ;;  %v7345_v33 = vadd.f32 %v2040_v34, %v7096_v18 }
 0x5fe   :  { %v2709_v3 = vpop.f32.mrf.mxu3 }
 0x5ff   :  { %v3569_v55 = vpack.c.bf16 %v3379_v62, %v3379_v62  ;;  %3417 = vmatmul.bf16.gmra.mxu0 %v3076_v20  ;;  %v2710_v5 = vadd.f32 %v2709_v3, %v5355_v52  ;;  %v2304_v29 = vmax.f32 %v7345_v33, 0.0 }
 0x601   :  { %3698 = vst.msk [vmem:[%s7631_s5 + $0x158] sm:$0xf] %vm3611_vm1, %v3569_v55  ;;  %v2873_v47 = vadd.f32 %v2710_v5, %v7107_v48 }
 0x602   :  { %v2041_v46 = vpop.f32.mrf.mxu2 }
 0x603   :  { %v2042_v44 = vadd.f32 %v2041_v46, %v5028_v14  ;;  %v3001_v12 = vmax.f32 %v2873_v47, 0.0 }
 0x604   :  { %v3380_v21 = vpop.f32.mrf.mxu0 }
 0x605   :  { %v7350_v51 = vadd.f32 %v2042_v44, %v7104_v35  ;;  %v3381_v8 = vadd.f32 %v3380_v21, %v5654_v27 }
 0x606   :  { %v2711_v40 = vpop.f32.mrf.mxu3 }
 0x607   :  { %v2305_v59 = vmax.f32 %v7350_v51, 0.0  ;;  %v3570_v18 = vpack.c.bf16 %v3381_v8, %v3381_v8  ;;  %v2712_v43 = vadd.f32 %v2711_v40, %v5355_v52 }
 0x609   :  { %3699 = vst.msk [vmem:[%s7631_s5 + $0x15c] sm:$0xf] %vm3611_vm1, %v3570_v18  ;;  %v2874_v35 = vadd.f32 %v2712_v43, %v7114_v36  ;;  %v2371_v49 = vpack.c.bf16 %v2305_v59, %v2304_v29 }
 0x60a   :  { %v2044_v39 = vpop.f32.mrf.mxu2 }
 0x60b   :  { %v3002_v0 = vmax.f32 %v2874_v35, 0.0  ;;  %2753 = vmatmul.bf16.gmra.mxu3 %v2371_v49  ;;  %v2045_v26 = vadd.f32 %v2044_v39, %v5028_v14 }
 0x60c   :  { %v3383_v15 = vpop.f32.mrf.mxu0 }
 0x60d   :  { %v3384_v48 = vadd.f32 %v3383_v15, %v5654_v27  ;;  %v3077_v6 = vpack.c.bf16 %v3002_v0, %v3001_v12  ;;  %v7369_v36 = vadd.f32 %v2045_v26, %v7130_v11 }
 0x60e   :  { %v2714_v42 = vpop.f32.mrf.mxu3 }
 0x60f   :  { %v3571_v1 = vpack.c.bf16 %v3384_v48, %v3384_v48  ;;  %3422 = vmatmul.bf16.gmra.mxu0 %v3077_v6  ;;  %v2715_v4 = vadd.f32 %v2714_v42, %v5355_v52  ;;  %v2306_v58 = vmax.f32 %v7369_v36, 0.0 }
 0x611   :  { %3700 = vst.msk [vmem:[%s7631_s5 + $0x160] sm:$0xf] %vm3611_vm1, %v3571_v1  ;;  %v2875_v61 = vadd.f32 %v2715_v4, %v7141_v45 }
 0x612   :  { %v2046_v38 = vpop.f32.mrf.mxu2 }
 0x613   :  { %v2047_v13 = vadd.f32 %v2046_v38, %v5028_v14  ;;  %v3003_v34 = vmax.f32 %v2875_v61, 0.0 }
 0x614   :  { %v3385_v41 = vpop.f32.mrf.mxu0 }
 0x615   :  { %v7374_v25 = vadd.f32 %v2047_v13, %v7138_v2  ;;  %v3386_v30 = vadd.f32 %v3385_v41, %v5654_v27 }
 0x616   :  { %v2716_v54 = vpop.f32.mrf.mxu3 }
 0x617   :  { %v2307_v37 = vmax.f32 %v7374_v25, 0.0  ;;  %v3572_v11 = vpack.c.bf16 %v3386_v30, %v3386_v30  ;;  %v2717_v16 = vadd.f32 %v2716_v54, %v5355_v52 }
 0x619   :  { %3701 = vst.msk [vmem:[%s7631_s5 + $0x164] sm:$0xf] %vm3611_vm1, %v3572_v11  ;;  %v2876_v2 = vadd.f32 %v2717_v16, %v7148_v22  ;;  %v2372_v62 = vpack.c.bf16 %v2307_v37, %v2306_v58 }
 0x61a   :  { %v2049_v20 = vpop.f32.mrf.mxu2 }
 0x61b   :  { %v3004_v3 = vmax.f32 %v2876_v2, 0.0  ;;  %2758 = vmatmul.bf16.gmra.mxu3 %v2372_v62  ;;  %v2050_v5 = vadd.f32 %v2049_v20, %v5028_v14 }
 0x61c   :  { %v3388_v55 = vpop.f32.mrf.mxu0 }
 0x61d   :  { %v3389_v45 = vadd.f32 %v3388_v55, %v5654_v27  ;;  %v3078_v46 = vpack.c.bf16 %v3004_v3, %v3003_v34  ;;  %v7393_v22 = vadd.f32 %v2050_v5, %v7164_v50 }
 0x61e   :  { %v2719_v44 = vpop.f32.mrf.mxu3 }
 0x61f   :  { %v3573_v21 = vpack.c.bf16 %v3389_v45, %v3389_v45  ;;  %3427 = vmatmul.bf16.gmra.mxu0 %v3078_v46  ;;  %v2720_v29 = vadd.f32 %v2719_v44, %v5355_v52  ;;  %v2308_v43 = vmax.f32 %v7393_v22, 0.0 }
 0x621   :  { %3702 = vst.msk [vmem:[%s7631_s5 + $0x168] sm:$0xf] %vm3611_vm1, %v3573_v21  ;;  %v2877_v49 = vadd.f32 %v2720_v29, %v7175_v57 }
 0x622   :  { %v2051_v8 = vpop.f32.mrf.mxu2 }
 0x623   :  { %v2052_v40 = vadd.f32 %v2051_v8, %v5028_v14  ;;  %v3005_v0 = vmax.f32 %v2877_v49, 0.0 }
 0x624   :  { %v3390_v47 = vpop.f32.mrf.mxu0 }
 0x625   :  { %v7398_v59 = vadd.f32 %v2052_v40, %v7172_v60  ;;  %v3391_v18 = vadd.f32 %v3390_v47, %v5654_v27 }
 0x626   :  { %v2721_v35 = vpop.f32.mrf.mxu3 }
 0x627   :  { %v2309_v39 = vmax.f32 %v7398_v59, 0.0  ;;  %v3574_v50 = vpack.c.bf16 %v3391_v18, %v3391_v18  ;;  %v2722_v12 = vadd.f32 %v2721_v35, %v5355_v52 }
 0x629   :  { %3703 = vst.msk [vmem:[%s7631_s5 + $0x16c] sm:$0xf] %vm3611_vm1, %v3574_v50  ;;  %v2878_v14 = vadd.f32 %v2722_v12, %v7182_v7  ;;  %v2373_v60 = vpack.c.bf16 %v2309_v39, %v2308_v43 }
 0x62b   :  { %v3006_v15 = vmax.f32 %v2878_v14, 0.0  ;;  %2763 = vmatmul.bf16.gmra.mxu3 %v2373_v60 }
 0x62c   :  { %v3393_v48 = vpop.f32.mrf.mxu0 }
 0x62d   :  { %v3394_v6 = vadd.f32 %v3393_v48, %v5654_v27  ;;  %v3079_v57 = vpack.c.bf16 %v3006_v15, %v3005_v0 }
 0x62e   :  { %v2724_v26 = vpop.f32.mrf.mxu3 }
 0x62f   :  { %v3575_v42 = vpack.c.bf16 %v3394_v6, %v3394_v6  ;;  %3432 = vmatmul.bf16.gmra.mxu0 %v3079_v57  ;;  %v2725_v1 = vadd.f32 %v2724_v26, %v5355_v52 }
 0x631   :  { %3704 = vst.msk [vmem:[%s7631_s5 + $0x170] sm:$0xf] %vm3611_vm1, %v3575_v42  ;;  %v2879_v13 = vadd.f32 %v2725_v1, %v7201_v19 }
 0x633   :  { %v3007_v54 = vmax.f32 %v2879_v13, 0.0 }
 0x634   :  { %v3395_v38 = vpop.f32.mrf.mxu0 }
 0x635   :  { %v3396_v7 = vadd.f32 %v3395_v38, %v5654_v27 }
 0x636   :  { %v2726_v4 = vpop.f32.mrf.mxu3 }
 0x637   :  { %v3576_v41 = vpack.c.bf16 %v3396_v7, %v3396_v7  ;;  %v2727_v30 = vadd.f32 %v2726_v4, %v5355_v52 }
 0x639   :  { %3705 = vst.msk [vmem:[%s7631_s5 + $0x174] sm:$0xf] %vm3611_vm1, %v3576_v41  ;;  %v2880_v58 = vadd.f32 %v2727_v30, %v7206_v10 }
 0x63b   :  { %v3008_v61 = vmax.f32 %v2880_v58, 0.0 }
 0x63c   :  { %v3398_v37 = vpop.f32.mrf.mxu0 }
 0x63d   :  { %v3399_v11 = vadd.f32 %v3398_v37, %v5654_v27  ;;  %v3080_v16 = vpack.c.bf16 %v3008_v61, %v3007_v54 }
 0x63e   :  { %v2729_v2 = vpop.f32.mrf.mxu3 }
 0x63f   :  { %v3577_v62 = vpack.c.bf16 %v3399_v11, %v3399_v11  ;;  %3437 = vmatmul.bf16.gmra.mxu0 %v3080_v16  ;;  %v2730_v19 = vadd.f32 %v2729_v2, %v5355_v52 }
 0x641   :  { %3706 = vst.msk [vmem:[%s7631_s5 + $0x178] sm:$0xf] %vm3611_vm1, %v3577_v62  ;;  %v2881_v3 = vadd.f32 %v2730_v19, %v7225_v32 }
 0x643   :  { %v3009_v5 = vmax.f32 %v2881_v3, 0.0 }
 0x644   :  { %v3400_v20 = vpop.f32.mrf.mxu0 }
 0x645   :  { %v3401_v34 = vadd.f32 %v3400_v20, %v5654_v27 }
 0x646   :  { %v2731_v10 = vpop.f32.mrf.mxu3 }
 0x647   :  { %v3578_v55 = vpack.c.bf16 %v3401_v34, %v3401_v34  ;;  %v2732_v45 = vadd.f32 %v2731_v10, %v5355_v52 }
 0x649   :  { %3707 = vst.msk [vmem:[%s7631_s5 + $0x17c] sm:$0xf] %vm3611_vm1, %v3578_v55  ;;  %v2882_v46 = vadd.f32 %v2732_v45, %v7230_v53 }
 0x64b   :  { %v3010_v44 = vmax.f32 %v2882_v46, 0.0 }
 0x64c   :  { %v3403_v21 = vpop.f32.mrf.mxu0 }
 0x64d   :  { %v3404_v8 = vadd.f32 %v3403_v21, %v5654_v27  ;;  %v3081_v29 = vpack.c.bf16 %v3010_v44, %v3009_v5 }
 0x64e   :  { %v2734_v40 = vpop.f32.mrf.mxu3 }
 0x64f   :  { %v3579_v47 = vpack.c.bf16 %v3404_v8, %v3404_v8  ;;  %3442 = vmatmul.bf16.gmra.mxu0 %v3081_v29  ;;  %v2735_v32 = vadd.f32 %v2734_v40, %v5355_v52 }
 0x651   :  { %3708 = vst.msk [vmem:[%s7631_s5 + $0x180] sm:$0xf] %vm3611_vm1, %v3579_v47  ;;  %v2883_v35 = vadd.f32 %v2735_v32, %v7249_v56 }
 0x653   :  { %v3011_v12 = vmax.f32 %v2883_v35, 0.0 }
 0x654   :  { %v3405_v18 = vpop.f32.mrf.mxu0 }
 0x655   :  { %v3406_v43 = vadd.f32 %v3405_v18, %v5654_v27 }
 0x656   :  { %v2736_v53 = vpop.f32.mrf.mxu3 }
 0x657   :  { %v3580_v49 = vpack.c.bf16 %v3406_v43, %v3406_v43  ;;  %v2737_v39 = vadd.f32 %v2736_v53, %v5355_v52 }
 0x659   :  { %3709 = vst.msk [vmem:[%s7631_s5 + $0x184] sm:$0xf] %vm3611_vm1, %v3580_v49  ;;  %v2884_v50 = vadd.f32 %v2737_v39, %v7254_v24 }
 0x65b   :  { %v3012_v14 = vmax.f32 %v2884_v50, 0.0 }
 0x65c   :  { %v3408_v60 = vpop.f32.mrf.mxu0 }
 0x65d   :  { %v3409_v0 = vadd.f32 %v3408_v60, %v5654_v27  ;;  %v3082_v15 = vpack.c.bf16 %v3012_v14, %v3011_v12 }
 0x65e   :  { %v2739_v48 = vpop.f32.mrf.mxu3 }
 0x65f   :  { %v3581_v6 = vpack.c.bf16 %v3409_v0, %v3409_v0  ;;  %3447 = vmatmul.bf16.gmra.mxu0 %v3082_v15  ;;  %v2740_v56 = vadd.f32 %v2739_v48, %v5355_v52 }
 0x661   :  { %3710 = vst.msk [vmem:[%s7631_s5 + $0x188] sm:$0xf] %vm3611_vm1, %v3581_v6  ;;  %v2885_v42 = vadd.f32 %v2740_v56, %v7273_v23 }
 0x663   :  { %v3013_v4 = vmax.f32 %v2885_v42, 0.0 }
 0x664   :  { %v3410_v57 = vpop.f32.mrf.mxu0 }
 0x665   :  { %v3411_v26 = vadd.f32 %v3410_v57, %v5654_v27 }
 0x666   :  { %v2741_v24 = vpop.f32.mrf.mxu3 }
 0x667   :  { %v3582_v1 = vpack.c.bf16 %v3411_v26, %v3411_v26  ;;  %v2742_v38 = vadd.f32 %v2741_v24, %v5355_v52 }
 0x669   :  { %3711 = vst.msk [vmem:[%s7631_s5 + $0x18c] sm:$0xf] %vm3611_vm1, %v3582_v1  ;;  %v2886_v7 = vadd.f32 %v2742_v38, %v7278_v31 }
 0x66b   :  { %v3014_v13 = vmax.f32 %v2886_v7, 0.0 }
 0x66c   :  { %v3413_v41 = vpop.f32.mrf.mxu0 }
 0x66d   :  { %v3414_v30 = vadd.f32 %v3413_v41, %v5654_v27  ;;  %v3083_v58 = vpack.c.bf16 %v3014_v13, %v3013_v4 }
 0x66e   :  { %v2744_v54 = vpop.f32.mrf.mxu3 }
 0x66f   :  { %v3583_v61 = vpack.c.bf16 %v3414_v30, %v3414_v30  ;;  %3452 = vmatmul.bf16.gmra.mxu0 %v3083_v58  ;;  %v2745_v23 = vadd.f32 %v2744_v54, %v5355_v52 }
 0x671   :  { %3712 = vst.msk [vmem:[%s7631_s5 + $0x190] sm:$0xf] %vm3611_vm1, %v3583_v61  ;;  %v2887_v16 = vadd.f32 %v2745_v23, %v7297_v17 }
 0x673   :  { %v3015_v20 = vmax.f32 %v2887_v16, 0.0 }
 0x674   :  { %v3415_v37 = vpop.f32.mrf.mxu0 }
 0x675   :  { %v3416_v11 = vadd.f32 %v3415_v37, %v5654_v27 }
 0x676   :  { %v2746_v31 = vpop.f32.mrf.mxu3 }
 0x677   :  { %v3584_v2 = vpack.c.bf16 %v3416_v11, %v3416_v11  ;;  %v2747_v62 = vadd.f32 %v2746_v31, %v5355_v52 }
 0x679   :  { %3713 = vst.msk [vmem:[%s7631_s5 + $0x194] sm:$0xf] %vm3611_vm1, %v3584_v2  ;;  %v2888_v19 = vadd.f32 %v2747_v62, %v7302_v28 }
 0x67b   :  { %v3016_v34 = vmax.f32 %v2888_v19, 0.0 }
 0x67c   :  { %v3418_v10 = vpop.f32.mrf.mxu0 }
 0x67d   :  { %v3419_v3 = vadd.f32 %v3418_v10, %v5654_v27  ;;  %v3084_v55 = vpack.c.bf16 %v3016_v34, %v3015_v20 }
 0x67e   :  { %v2749_v45 = vpop.f32.mrf.mxu3 }
 0x67f   :  { %v3585_v46 = vpack.c.bf16 %v3419_v3, %v3419_v3  ;;  %3457 = vmatmul.bf16.gmra.mxu0 %v3084_v55  ;;  %v2750_v17 = vadd.f32 %v2749_v45, %v5355_v52 }
 0x681   :  { %3714 = vst.msk [vmem:[%s7631_s5 + $0x198] sm:$0xf] %vm3611_vm1, %v3585_v46  ;;  %v2889_v21 = vadd.f32 %v2750_v17, %v7321_v9 }
 0x683   :  { %v3017_v47 = vmax.f32 %v2889_v21, 0.0 }
 0x684   :  { %v3420_v5 = vpop.f32.mrf.mxu0 }
 0x685   :  { %v3421_v44 = vadd.f32 %v3420_v5, %v5654_v27 }
 0x686   :  { %v2751_v28 = vpop.f32.mrf.mxu3 }
 0x687   :  { %v3586_v8 = vpack.c.bf16 %v3421_v44, %v3421_v44  ;;  %v2752_v29 = vadd.f32 %v2751_v28, %v5355_v52 }
 0x689   :  { %3715 = vst.msk [vmem:[%s7631_s5 + $0x19c] sm:$0xf] %vm3611_vm1, %v3586_v8  ;;  %v2890_v40 = vadd.f32 %v2752_v29, %v7326_v63 }
 0x68b   :  { %v3018_v32 = vmax.f32 %v2890_v40, 0.0 }
 0x68c   :  { %v3423_v18 = vpop.f32.mrf.mxu0 }
 0x68d   :  { %v3424_v43 = vadd.f32 %v3423_v18, %v5654_v27  ;;  %v3085_v53 = vpack.c.bf16 %v3018_v32, %v3017_v47 }
 0x68e   :  { %v2754_v35 = vpop.f32.mrf.mxu3 }
 0x68f   :  { %v3587_v49 = vpack.c.bf16 %v3424_v43, %v3424_v43  ;;  %3462 = vmatmul.bf16.gmra.mxu0 %v3085_v53  ;;  %v2755_v9 = vadd.f32 %v2754_v35, %v5355_v52 }
 0x691   :  { %3716 = vst.msk [vmem:[%s7631_s5 + $0x1a0] sm:$0xf] %vm3611_vm1, %v3587_v49  ;;  %v2891_v12 = vadd.f32 %v2755_v9, %v7345_v33 }
 0x693   :  { %v3019_v15 = vmax.f32 %v2891_v12, 0.0 }
 0x694   :  { %v3425_v39 = vpop.f32.mrf.mxu0 }
 0x695   :  { %v3426_v50 = vadd.f32 %v3425_v39, %v5654_v27 }
 0x696   :  { %v2756_v63 = vpop.f32.mrf.mxu3 }
 0x697   :  { %v3588_v14 = vpack.c.bf16 %v3426_v50, %v3426_v50  ;;  %v2757_v60 = vadd.f32 %v2756_v63, %v5355_v52 }
 0x699   :  { %3717 = vst.msk [vmem:[%s7631_s5 + $0x1a4] sm:$0xf] %vm3611_vm1, %v3588_v14  ;;  %v2892_v0 = vadd.f32 %v2757_v60, %v7350_v51 }
 0x69b   :  { %v3020_v48 = vmax.f32 %v2892_v0, 0.0 }
 0x69c   :  { %v3428_v6 = vpop.f32.mrf.mxu0 }
 0x69d   :  { %v3429_v56 = vadd.f32 %v3428_v6, %v5654_v27  ;;  %v3086_v57 = vpack.c.bf16 %v3020_v48, %v3019_v15 }
 0x69e   :  { %v2759_v26 = vpop.f32.mrf.mxu3 }
 0x69f   :  { %v3589_v24 = vpack.c.bf16 %v3429_v56, %v3429_v56  ;;  %3467 = vmatmul.bf16.gmra.mxu0 %v3086_v57  ;;  %v2760_v33 = vadd.f32 %v2759_v26, %v5355_v52 }
 0x6a1   :  { %3718 = vst.msk [vmem:[%s7631_s5 + $0x1a8] sm:$0xf] %vm3611_vm1, %v3589_v24  ;;  %v2893_v38 = vadd.f32 %v2760_v33, %v7369_v36 }
 0x6a3   :  { %v3021_v41 = vmax.f32 %v2893_v38, 0.0 }
 0x6a4   :  { %v3430_v42 = vpop.f32.mrf.mxu0 }
 0x6a5   :  { %v3431_v1 = vadd.f32 %v3430_v42, %v5654_v27 }
 0x6a6   :  { %v2761_v51 = vpop.f32.mrf.mxu3 }
 0x6a7   :  { %v3590_v7 = vpack.c.bf16 %v3431_v1, %v3431_v1  ;;  %v2762_v4 = vadd.f32 %v2761_v51, %v5355_v52 }
 0x6a9   :  { %3719 = vst.msk [vmem:[%s7631_s5 + $0x1ac] sm:$0xf] %vm3611_vm1, %v3590_v7  ;;  %v2894_v13 = vadd.f32 %v2762_v4, %v7374_v25 }
 0x6ab   :  { %v3022_v30 = vmax.f32 %v2894_v13, 0.0 }
 0x6ac   :  { %v3433_v58 = vpop.f32.mrf.mxu0 }
 0x6ad   :  { %v3434_v54 = vadd.f32 %v3433_v58, %v5654_v27  ;;  %v3087_v61 = vpack.c.bf16 %v3022_v30, %v3021_v41 }
 0x6ae   :  { %v2764_v23 = vpop.f32.mrf.mxu3 }
 0x6af   :  { %v3591_v37 = vpack.c.bf16 %v3434_v54, %v3434_v54  ;;  %3472 = vmatmul.bf16.gmra.mxu0 %v3087_v61  ;;  %v2765_v36 = vadd.f32 %v2764_v23, %v5355_v52 }
 0x6b1   :  { %3720 = vst.msk [vmem:[%s7631_s5 + $0x1b0] sm:$0xf] %vm3611_vm1, %v3591_v37  ;;  %v2895_v16 = vadd.f32 %v2765_v36, %v7393_v22 }
 0x6b3   :  { %v3023_v20 = vmax.f32 %v2895_v16, 0.0 }
 0x6b4   :  { %v3435_v11 = vpop.f32.mrf.mxu0 }
 0x6b5   :  { %v3436_v31 = vadd.f32 %v3435_v11, %v5654_v27 }
 0x6b6   :  { %v2766_v25 = vpop.f32.mrf.mxu3 }
 0x6b7   :  { %v3592_v2 = vpack.c.bf16 %v3436_v31, %v3436_v31  ;;  %v2767_v62 = vadd.f32 %v2766_v25, %v5355_v52 }
 0x6b9   :  { %3721 = vst.msk [vmem:[%s7631_s5 + $0x1b4] sm:$0xf] %vm3611_vm1, %v3592_v2  ;;  %v2896_v19 = vadd.f32 %v2767_v62, %v7398_v59 }
 0x6bb   :  { %v3024_v34 = vmax.f32 %v2896_v19, 0.0 }
 0x6bc   :  { %v3438_v10 = vpop.f32.mrf.mxu0 }
 0x6bd   :  { %v3088_v3 = vpack.c.bf16 %v3024_v34, %v3023_v20  ;;  %v3439_v55 = vadd.f32 %v3438_v10, %v5654_v27 }
 0x6bf   :  { %v3593_v45 = vpack.c.bf16 %v3439_v55, %v3439_v55  ;;  %3477 = vmatmul.bf16.vlgmr.msra.gmra.mxu3 %v3088_v3 }
 0x6c1   :  { %3722 = vst.msk [vmem:[%s7631_s5 + $0x1b8] sm:$0xf] %vm3611_vm1, %v3593_v45 }
 0x6c4   :  { %v3440_v52 = vpop.f32.mrf.mxu0 }
 0x6c5   :  { %v3441_v22 = vadd.f32 %v3440_v52, %v5654_v27 }
 0x6c7   :  { %v3594_v46 = vpack.c.bf16 %v3441_v22, %v3441_v22 }
 0x6c9   :  { %3723 = vst.msk [vmem:[%s7631_s5 + $0x1bc] sm:$0xf] %vm3611_vm1, %v3594_v46 }
 0x6cc   :  { %v3443_v59 = vpop.f32.mrf.mxu0 }
 0x6cd   :  { %v3444_v17 = vadd.f32 %v3443_v59, %v5654_v27 }
 0x6cf   :  { %v3595_v5 = vpack.c.bf16 %v3444_v17, %v3444_v17 }
 0x6d1   :  { %3724 = vst.msk [vmem:[%s7631_s5 + $0x1c0] sm:$0xf] %vm3611_vm1, %v3595_v5 }
 0x6d4   :  { %v3445_v44 = vpop.f32.mrf.mxu0 }
 0x6d5   :  { %v3446_v28 = vadd.f32 %v3445_v44, %v5654_v27 }
 0x6d7   :  { %v3596_v21 = vpack.c.bf16 %v3446_v28, %v3446_v28 }
 0x6d9   :  { %3725 = vst.msk [vmem:[%s7631_s5 + $0x1c4] sm:$0xf] %vm3611_vm1, %v3596_v21 }
 0x6dc   :  { %v3448_v8 = vpop.f32.mrf.mxu0 }
 0x6dd   :  { %v3449_v29 = vadd.f32 %v3448_v8, %v5654_v27 }
 0x6df   :  { %v3597_v40 = vpack.c.bf16 %v3449_v29, %v3449_v29 }
 0x6e1   :  { %3726 = vst.msk [vmem:[%s7631_s5 + $0x1c8] sm:$0xf] %vm3611_vm1, %v3597_v40 }
 0x6e4   :  { %v3450_v47 = vpop.f32.mrf.mxu0 }
 0x6e5   :  { %v3451_v32 = vadd.f32 %v3450_v47, %v5654_v27 }
 0x6e7   :  { %v3598_v18 = vpack.c.bf16 %v3451_v32, %v3451_v32 }
 0x6e9   :  { %3727 = vst.msk [vmem:[%s7631_s5 + $0x1cc] sm:$0xf] %vm3611_vm1, %v3598_v18 }
 0x6ec   :  { %v3453_v43 = vpop.f32.mrf.mxu0 }
 0x6ed   :  { %v3454_v53 = vadd.f32 %v3453_v43, %v5654_v27 }
 0x6ef   :  { %v3599_v35 = vpack.c.bf16 %v3454_v53, %v3454_v53 }
 0x6f1   :  { %3728 = vst.msk [vmem:[%s7631_s5 + $0x1d0] sm:$0xf] %vm3611_vm1, %v3599_v35 }
 0x6f4   :  { %v3455_v49 = vpop.f32.mrf.mxu0 }
 0x6f5   :  { %v3456_v9 = vadd.f32 %v3455_v49, %v5654_v27 }
 0x6f7   :  { %v3600_v39 = vpack.c.bf16 %v3456_v9, %v3456_v9 }
 0x6f9   :  { %3729 = vst.msk [vmem:[%s7631_s5 + $0x1d4] sm:$0xf] %vm3611_vm1, %v3600_v39 }
 0x6fc   :  { %v3458_v50 = vpop.f32.mrf.mxu0 }
 0x6fd   :  { %v3459_v63 = vadd.f32 %v3458_v50, %v5654_v27 }
 0x6ff   :  { %v3601_v12 = vpack.c.bf16 %v3459_v63, %v3459_v63 }
 0x701   :  { %3730 = vst.msk [vmem:[%s7631_s5 + $0x1d8] sm:$0xf] %vm3611_vm1, %v3601_v12 }
 0x704   :  { %v3460_v14 = vpop.f32.mrf.mxu0 }
 0x705   :  { %v3461_v60 = vadd.f32 %v3460_v14, %v5654_v27 }
 0x707   :  { %v3602_v0 = vpack.c.bf16 %v3461_v60, %v3461_v60 }
 0x709   :  { %3731 = vst.msk [vmem:[%s7631_s5 + $0x1dc] sm:$0xf] %vm3611_vm1, %v3602_v0 }
 0x70c   :  { %v3463_v15 = vpop.f32.mrf.mxu0 }
 0x70d   :  { %v3464_v48 = vadd.f32 %v3463_v15, %v5654_v27 }
 0x70f   :  { %v3603_v6 = vpack.c.bf16 %v3464_v48, %v3464_v48 }
 0x711   :  { %3732 = vst.msk [vmem:[%s7631_s5 + $0x1e0] sm:$0xf] %vm3611_vm1, %v3603_v6 }
 0x714   :  { %v3465_v56 = vpop.f32.mrf.mxu0 }
 0x715   :  { %v3466_v57 = vadd.f32 %v3465_v56, %v5654_v27 }
 0x717   :  { %v3604_v26 = vpack.c.bf16 %v3466_v57, %v3466_v57 }
 0x719   :  { %3733 = vst.msk [vmem:[%s7631_s5 + $0x1e4] sm:$0xf] %vm3611_vm1, %v3604_v26 }
 0x71c   :  { %v3468_v24 = vpop.f32.mrf.mxu0 }
 0x71d   :  { %v3469_v33 = vadd.f32 %v3468_v24, %v5654_v27 }
 0x71f   :  { %v3605_v42 = vpack.c.bf16 %v3469_v33, %v3469_v33 }
 0x721   :  { %3734 = vst.msk [vmem:[%s7631_s5 + $0x1e8] sm:$0xf] %vm3611_vm1, %v3605_v42 }
 0x724   :  { %v3470_v1 = vpop.f32.mrf.mxu0 }
 0x725   :  { %v3471_v51 = vadd.f32 %v3470_v1, %v5654_v27 }
 0x727   :  { %v3606_v38 = vpack.c.bf16 %v3471_v51, %v3471_v51 }
 0x729   :  { %3735 = vst.msk [vmem:[%s7631_s5 + $0x1ec] sm:$0xf] %vm3611_vm1, %v3606_v38 }
 0x72c   :  { %v3473_v7 = vpop.f32.mrf.mxu0 }
 0x72d   :  { %v3474_v4 = vadd.f32 %v3473_v7, %v5654_v27 }
 0x72f   :  { %v3607_v13 = vpack.c.bf16 %v3474_v4, %v3474_v4 }
 0x731   :  { %3736 = vst.msk [vmem:[%s7631_s5 + $0x1f0] sm:$0xf] %vm3611_vm1, %v3607_v13 }
 0x734   :  { %v3475_v41 = vpop.f32.mrf.mxu0 }
 0x735   :  { %v3476_v30 = vadd.f32 %v3475_v41, %v5654_v27 }
 0x737   :  { %v3608_v58 = vpack.c.bf16 %v3476_v30, %v3476_v30 }
 0x739   :  { %3737 = vst.msk [vmem:[%s7631_s5 + $0x1f4] sm:$0xf] %vm3611_vm1, %v3608_v58 }
 0x742   :  { %v3478_v54 = vpop.f32.mrf.mxu3 }
 0x743   :  { %v3479_v61 = vadd.f32 %v3478_v54, %v5654_v27 }
 0x745   :  { %v3609_v23 = vpack.c.bf16 %v3479_v61, %v3479_v61 }
 0x747   :  { %3738 = vst.msk [vmem:[%s7631_s5 + $0x1f8] sm:$0xf] %vm3611_vm1, %v3609_v23 }
 0x74a   :  { %v3480_v37 = vpop.f32.mrf.mxu3 }
 0x74b   :  { %v3481_v36 = vadd.f32 %v3480_v37, %v5654_v27 }
 0x74d   :  { %v3610_v11 = vpack.c.bf16 %v3481_v36, %v3481_v36 }
 0x74f   :  { %3739 = vst.msk [vmem:[%s7631_s5 + $0x1fc] sm:$0xf] %vm3611_vm1, %v3610_v11 }

</bundles_post_ra>
